<compile_context>
chip_gen: v7x
topology: tpu7x:2x2x1
jax: 0.10.0
libtpu: 0.0.40
codegen_flags: <defaults>
</compile_context>

<pallas_src>
import functools
import math

import jax
import jax.numpy as jnp
from jax.experimental import pallas as pl
from jax.experimental.pallas import tpu as pltpu

_PI = math.pi
_TWO_PI = 2.0 * math.pi


def _rbf_critic_kernel(x_ref, g_ref, w_ref, o_ref, f_ref):
    """x_ref: (2, BT) VMEM      row 0 = theta, row 1 = omega (batch on lanes)
       g_ref: (NC_PAD, 4) VMEM  resident distance-expansion matrix (sign folded)
       w_ref: (8, NC_PAD) VMEM  resident; row 0 = linear weights (+bias at NC)
       o_ref: (1, BT) VMEM      output row (lane-dense)
       f_ref: (8, BT) VMEM      scratch; rows 0..3 = per-batch K=4 feature block
    """
    theta = x_ref[0:1, :]                       # (1, BT)
    omega = x_ref[1:2, :]                       # (1, BT)

    # Angle wrap into [-pi, pi): closed-form equivalent of the PyTorch loop.
    theta = theta - _TWO_PI * jnp.floor((theta + _PI) * (1.0 / _TWO_PI))

    # K=4 feature block f = [theta^2 + omega^2, theta, omega, 1]  (~3 VPU ops).
    f_ref[0:1, :] = theta * theta + omega * omega
    f_ref[1:2, :] = theta
    f_ref[2:3, :] = omega
    f_ref[3:4, :] = jnp.ones_like(theta)

    # arg_j = -((theta - c_th_j)^2 + (omega - c_om_j)^2) / sigma_j^2, via the MXU.
    arg = jnp.dot(g_ref[...], f_ref[0:4, :],
                  preferred_element_type=jnp.float32,
                  precision=jax.lax.Precision.HIGHEST)        # (NC_PAD, BT)
    phi = jnp.exp(arg)                                        # EUP; only hot op left

    # Weighted reduction over centres as an MXU matvec; bias rides in slot NC.
    out = jnp.dot(w_ref[...], phi,
                  preferred_element_type=jnp.float32,
                  precision=jax.lax.Precision.HIGHEST)        # (8, BT); row 0 is real
    o_ref[...] = out[0:1, :]


def _round_up(a, b):
    return ((a + b - 1) // b) * b


@functools.partial(jax.jit, static_argnames=("block_b",))
def rbf_critic_forward(x, centres, log_sigmas, lin_w, lin_b, *, block_b=2048):
    """x: (B, 2) or (2,) float32; returns (B, 1) (or (1,) for a single state)."""
    squeeze = (x.ndim == 1)
    if squeeze:
        x = x[None, :]
    x = x.astype(jnp.float32)
    B = x.shape[0]
    NC = centres.shape[0]

    # Centres on sublanes -> only 8-alignment needed (review item 1): 226 -> 232.
    nc_pad = _round_up(NC + 1, 8)

    c_th = centres[:, 0].astype(jnp.float32)
    c_om = centres[:, 1].astype(jnp.float32)
    inv_sig_sq = jnp.exp(-2.0 * log_sigmas.astype(jnp.float32))    # 1 / sigma^2

    # Distance-expansion matrix g (sign folded in; padded rows stay all-zero so
    # arg = 0 -> phi = 1 there, which the bias slot relies on).
    g = jnp.zeros((nc_pad, 4), jnp.float32)
    g = g.at[:NC, 0].set(-inv_sig_sq)
    g = g.at[:NC, 1].set(2.0 * c_th * inv_sig_sq)
    g = g.at[:NC, 2].set(2.0 * c_om * inv_sig_sq)
    g = g.at[:NC, 3].set(-(c_th * c_th + c_om * c_om) * inv_sig_sq)

    # Weight slab: row 0 = linear weights, bias in padded slot NC, rows 1..7 = 0.
    w_slab = jnp.zeros((8, nc_pad), jnp.float32)
    w_slab = w_slab.at[0, :NC].set(lin_w.reshape(-1).astype(jnp.float32))
    w_slab = w_slab.at[0, NC].set(lin_b.reshape(-1)[0].astype(jnp.float32))

    # Batch tile: lane-dense (multiple of 128), capped at block_b.  If the whole
    # batch fits one tile, split it in two so the "parallel" grid axis has >= 2
    # steps and both v7x TensorCores get work (no-op cost on v5e/v6e).
    b128 = _round_up(B, 128)
    if b128 > block_b:
        bt = block_b
    else:
        bt = max(128, _round_up(b128 // 2, 128))
    b_pad = _round_up(B, bt)
    n_tiles = b_pad // bt

    x_t = x.T                                   # (2, B): batch on the lane axis
    if b_pad != B:
        x_t = jnp.pad(x_t, ((0, 0), (0, b_pad - B)))

    # Advisory cost hint: ~10*nc_pad flops + nc_pad exps per sample, ~12 B/sample IO.
    cost = pl.CostEstimate(
        flops=int(b_pad) * (2 * 4 * nc_pad + 2 * nc_pad + 16),
        transcendentals=int(b_pad) * nc_pad,
        bytes_accessed=int(b_pad) * 12 + nc_pad * 12 * 4,
    )
    # Live VMEM per tile is ~2 big (nc_pad, bt) f32 temporaries (arg, phi) plus
    # small I/O; budget 6 copies for compiler slack, clamp inside v7x's 64 MiB.
    vmem_limit = int(min(48 * 2**20, max(16 * 2**20, 24 * nc_pad * bt)))

    out = pl.pallas_call(
        _rbf_critic_kernel,
        out_shape=jax.ShapeDtypeStruct((1, b_pad), jnp.float32),
        grid_spec=pltpu.PrefetchScalarGridSpec(
            num_scalar_prefetch=0,
            grid=(n_tiles,),
            in_specs=[
                pl.BlockSpec((2, bt), lambda i: (0, i)),        # x tile (pipelined)
                pl.BlockSpec((nc_pad, 4), lambda i: (0, 0)),    # g (resident)
                pl.BlockSpec((8, nc_pad), lambda i: (0, 0)),    # weights (resident)
            ],
            out_specs=pl.BlockSpec((1, bt), lambda i: (0, i)),
            scratch_shapes=[pltpu.VMEM((8, bt), jnp.float32)],  # K=4 feature block
        ),
        compiler_params=pltpu.CompilerParams(
            dimension_semantics=("parallel",),                  # megacore on v7x
            vmem_limit_bytes=vmem_limit,
        ),
        cost_estimate=cost,
    )(x_t, g, w_slab)

    result = out[0, :B]
    if squeeze:
        return result             # shape (1,), like lin1 on a single state
    return result[:, None]        # shape (B, 1), matching nn.Linear(225, 1)


if __name__ == "__main__":
    key = jax.random.PRNGKey(0)
    k_x, k_w, k_b = jax.random.split(key, 3)

    # Module parameters (match __init__): 15x15 grid of centres over
    # theta in [-pi, pi], omega in [-2.5*pi, 2.5*pi]; log_sigmas init to 0
    # (torch-rbf default -> sigma = 1); lin1 weights random (Linear default-ish).
    N = 15
    theta_c = jnp.linspace(-_PI, _PI, N, dtype=jnp.float32)
    omega_c = jnp.linspace(-2.5 * _PI, 2.5 * _PI, N, dtype=jnp.float32)
    tt, ww = jnp.meshgrid(theta_c, omega_c, indexing="ij")
    centres = jnp.stack([tt.reshape(-1), ww.reshape(-1)], axis=-1)   # (225, 2)
    log_sigmas = jnp.zeros((N * N,), jnp.float32)
    bound = 1.0 / math.sqrt(N * N)
    lin_w = jax.random.uniform(k_w, (1, N * N), jnp.float32, -bound, bound)
    lin_b = jax.random.uniform(k_b, (1,), jnp.float32, -bound, bound)

    # Small batch of states (theta, omega); thetas deliberately outside
    # [-pi, pi] to exercise the wrap.  B=1000 -> bt=512, grid of 2 tiles.
    B = 1000
    x = jax.random.normal(k_x, (B, 2), jnp.float32) * jnp.array([3.0, 4.0], jnp.float32)

    out = jax.block_until_ready(rbf_critic_forward(x, centres, log_sigmas, lin_w, lin_b))

    # Pure-JAX reference of the exact PyTorch forward (direct (x-c)^2 form).
    theta_ref = x[:, 0] - _TWO_PI * jnp.floor((x[:, 0] + _PI) / _TWO_PI)
    xw = jnp.stack([theta_ref, x[:, 1]], axis=-1)                    # (B, 2)
    diff = xw[:, None, :] - centres[None, :, :]                      # (B, 225, 2)
    dist = jnp.sqrt(jnp.sum(diff * diff, axis=-1)) / jnp.exp(log_sigmas)[None, :]
    phi = jnp.exp(-dist * dist)                                      # gaussian basis
    ref = jnp.sum(phi * lin_w[0][None, :], axis=-1, keepdims=True) + lin_b[0]

    assert out.shape == (B, 1), out.shape
    # Tolerance widened to 2e-4: the MXU expanded-distance form differs from the
    # direct form by up to a few 1e-5 absolute (f32 cancellation near a centre).
    assert jnp.allclose(out, ref, rtol=2e-4, atol=2e-4), float(jnp.max(jnp.abs(out - ref)))

    # Unbatched single-state path, like the PyTorch module's forward on a 2-vector.
    x1 = jnp.array([4.0, -1.5], jnp.float32)
    out1 = jax.block_until_ready(rbf_critic_forward(x1, centres, log_sigmas, lin_w, lin_b))
    assert out1.shape == (1,), out1.shape
    t1 = x1[0] - _TWO_PI * jnp.floor((x1[0] + _PI) / _TWO_PI)
    d1 = jnp.stack([t1, x1[1]])[None, :] - centres
    phi1 = jnp.exp(-jnp.sum(d1 * d1, axis=-1) / jnp.exp(log_sigmas) ** 2)
    ref1 = jnp.sum(phi1 * lin_w[0]) + lin_b[0]
    assert jnp.allclose(out1[0], ref1, rtol=2e-4, atol=2e-4), (out1, ref1)

    print("KERNEL_OK")
</pallas_src>

<mosaic_0001>
module attributes {stable_mosaic.version = 11 : i64} {
  func.func @_rbf_critic_kernel(%arg0: i32, %arg1: memref<2x512xf32, #tpu.memory_space<vmem>>, %arg2: memref<232x4xf32, #tpu.memory_space<vmem>>, %arg3: memref<8x232xf32, #tpu.memory_space<vmem>>, %arg4: memref<1x512xf32, #tpu.memory_space<vmem>>, %arg5: memref<8x512xf32, #tpu.memory_space<vmem>>) attributes {dimension_semantics = [#tpu.dimension_semantics<parallel>], iteration_bounds = array<i64: 2>, scalar_prefetch = 0 : i64, scratch_operands = 1 : i64, tpu.core_type = #tpu.core_type<tc>, window_params = [{transform_indices = @transform_0, window_bounds = array<i64: 2, 512>}, {pipeline_mode = #tpu.pipeline_mode<synchronous>, transform_indices = @transform_1, window_bounds = array<i64: 232, 4>}, {pipeline_mode = #tpu.pipeline_mode<synchronous>, transform_indices = @transform_2, window_bounds = array<i64: 8, 232>}, {transform_indices = @transform_3, window_bounds = array<i64: 1, 512>}]} {
    %c0 = arith.constant 0 : index
    %c0_0 = arith.constant 0 : index
    %0 = vector.load %arg1[%c0, %c0_0] : memref<2x512xf32, #tpu.memory_space<vmem>>, vector<1x512xf32>
    %c1 = arith.constant 1 : index
    %c0_1 = arith.constant 0 : index
    %1 = vector.load %arg1[%c1, %c0_1] : memref<2x512xf32, #tpu.memory_space<vmem>>, vector<1x512xf32>
    %cst = arith.constant 3.14159274 : f32
    %2 = vector.broadcast %cst : f32 to vector<1x512xf32>
    %3 = arith.addf %0, %2 : vector<1x512xf32>
    %cst_2 = arith.constant 0.159154937 : f32
    %4 = vector.broadcast %cst_2 : f32 to vector<1x512xf32>
    %5 = arith.mulf %3, %4 : vector<1x512xf32>
    %6 = math.floor %5 : vector<1x512xf32>
    %cst_3 = arith.constant 6.28318548 : f32
    %7 = vector.broadcast %cst_3 : f32 to vector<1x512xf32>
    %8 = arith.mulf %7, %6 : vector<1x512xf32>
    %9 = arith.subf %0, %8 : vector<1x512xf32>
    %10 = arith.mulf %9, %9 : vector<1x512xf32>
    %11 = arith.mulf %1, %1 : vector<1x512xf32>
    %12 = arith.addf %10, %11 : vector<1x512xf32>
    %c0_4 = arith.constant 0 : index
    %c0_5 = arith.constant 0 : index
    %13 = vector.load %arg5[%c0_4, %c0_5] : memref<8x512xf32, #tpu.memory_space<vmem>>, vector<1x512xf32>
    tpu.vector_store %arg5[%c0_4, %c0_5], %12 {strides = array<i32>} : memref<8x512xf32, #tpu.memory_space<vmem>>, vector<1x512xf32>,
    %c1_6 = arith.constant 1 : index
    %c0_7 = arith.constant 0 : index
    %14 = vector.load %arg5[%c1_6, %c0_7] : memref<8x512xf32, #tpu.memory_space<vmem>>, vector<1x512xf32>
    tpu.vector_store %arg5[%c1_6, %c0_7], %9 {strides = array<i32>} : memref<8x512xf32, #tpu.memory_space<vmem>>, vector<1x512xf32>,
    %c2 = arith.constant 2 : index
    %c0_8 = arith.constant 0 : index
    %15 = vector.load %arg5[%c2, %c0_8] : memref<8x512xf32, #tpu.memory_space<vmem>>, vector<1x512xf32>
    tpu.vector_store %arg5[%c2, %c0_8], %1 {strides = array<i32>} : memref<8x512xf32, #tpu.memory_space<vmem>>, vector<1x512xf32>,
    %cst_9 = arith.constant 1.000000e+00 : f32
    %16 = vector.broadcast %cst_9 : f32 to vector<1x512xf32>
    %c3 = arith.constant 3 : index
    %c0_10 = arith.constant 0 : index
    %17 = vector.load %arg5[%c3, %c0_10] : memref<8x512xf32, #tpu.memory_space<vmem>>, vector<1x512xf32>
    tpu.vector_store %arg5[%c3, %c0_10], %16 {strides = array<i32>} : memref<8x512xf32, #tpu.memory_space<vmem>>, vector<1x512xf32>,
    %c0_11 = arith.constant 0 : index
    %c0_12 = arith.constant 0 : index
    %18 = vector.load %arg2[%c0_11, %c0_12] : memref<232x4xf32, #tpu.memory_space<vmem>>, vector<232x4xf32>
    %c0_13 = arith.constant 0 : index
    %c0_14 = arith.constant 0 : index
    %19 = vector.load %arg5[%c0_13, %c0_14] : memref<8x512xf32, #tpu.memory_space<vmem>>, vector<4x512xf32>
    %cst_15 = arith.constant dense<0.000000e+00> : vector<232x512xf32>
    %20 = tpu.matmul %18, %19, %cst_15 {dimension_numbers = #tpu.dot_dimension_numbers<[1], [0], [0], [1], [0, 0, 1, 1], [], []>, precision = #tpu.contract_precision<fp32>} : vector<232x4xf32>, vector<4x512xf32>, vector<232x512xf32> -> vector<232x512xf32>
    %21 = math.exp %20 : vector<232x512xf32>
    %c0_16 = arith.constant 0 : index
    %c0_17 = arith.constant 0 : index
    %22 = vector.load %arg3[%c0_16, %c0_17] : memref<8x232xf32, #tpu.memory_space<vmem>>, vector<8x232xf32>
    %cst_18 = arith.constant dense<0.000000e+00> : vector<8x512xf32>
    %23 = tpu.matmul %22, %21, %cst_18 {dimension_numbers = #tpu.dot_dimension_numbers<[1], [0], [0], [1], [0, 0, 1, 1], [], []>, precision = #tpu.contract_precision<fp32>} : vector<8x232xf32>, vector<232x512xf32>, vector<8x512xf32> -> vector<8x512xf32>
    %24 = vector.extract_strided_slice %23 {offsets = [0, 0], sizes = [1, 512], strides = [1, 1]} : vector<8x512xf32> to vector<1x512xf32>
    %c0_19 = arith.constant 0 : index
    %c0_20 = arith.constant 0 : index
    %25 = vector.load %arg4[%c0_19, %c0_20] : memref<1x512xf32, #tpu.memory_space<vmem>>, vector<1x512xf32>
    tpu.vector_store %arg4[%c0_19, %c0_20], %24 {strides = array<i32>} : memref<1x512xf32, #tpu.memory_space<vmem>>, vector<1x512xf32>,
    return
  }
  func.func @transform_0(%arg0: i32) -> (i32, i32) {
    %c0_i32 = arith.constant 0 : i32
    %c0_i32_0 = arith.constant 0 : i32
    return %c0_i32, %arg0 : i32, i32
  }
  func.func @transform_1(%arg0: i32) -> (i32, i32) {
    %c0_i32 = arith.constant 0 : i32
    %c0_i32_0 = arith.constant 0 : i32
    %c0_i32_1 = arith.constant 0 : i32
    return %c0_i32, %c0_i32_0 : i32, i32
  }
  func.func @transform_2(%arg0: i32) -> (i32, i32) {
    %c0_i32 = arith.constant 0 : i32
    %c0_i32_0 = arith.constant 0 : i32
    %c0_i32_1 = arith.constant 0 : i32
    return %c0_i32, %c0_i32_0 : i32, i32
  }
  func.func @transform_3(%arg0: i32) -> (i32, i32) {
    %c0_i32 = arith.constant 0 : i32
    %c0_i32_0 = arith.constant 0 : i32
    return %c0_i32, %arg0 : i32, i32
  }
}

</mosaic_0001>

<bundles_post_ra>
// kernel: rbf_critic_forward.1
= control target key start
LH: loop header
LB: loop body
LE: loop exit
PB: predicated region body
PF: predicated region fallthrough
CT: control target
= control target key end

     0   :  { %s8293_s12 = smov 0   ;;  %s11272_s0 = inlined_call_operand.vmem [shape: f32[2,1024], index: 0, kind: input, shape index: {}]   ;;  %s11273_s1 = inlined_call_operand.vmem [shape: f32[232,4], index: 1, kind: input, shape index: {}]   ;;  %s11274_s2 = inlined_call_operand.vmem [shape: f32[8,232], index: 2, kind: input, shape index: {}]   ;;  %s11275_s3 = inlined_call_operand.vmem [shape: f32[1,1024], index: 3, kind: output, shape index: {}]  }
   0x1 LB: > { %s6736_s13 = sadd.s32 4294967295, %s8268_s12   ;;  %p6740_p0 = scmp.ge.s32.totalorder %s8268_s12, 1  ;;  %s8268_s12 = sphi %s8293_s12, %s13_s12  }
   0x2   : > { %p138_p1 = scmp.lt.s32.totalorder %s8268_s12, 3 }
   0x4   : > { %p139_p2 = pnand %p6740_p0, %p138_p1 }
   0x6   : > { %142 = sbr.rel (%p139_p2) target bundleno = 1558 (0x616), region = 32 }
   0xd   : > { %s6741_s14 = sshll.u32 %s6736_s13, 2  ;;  %v11276_v0 = vlaneseq  ;;  %v11326_v1 = vmov 0.0   ;;  %v11793_v2 = vmov 0  ;;  %v8271_v3 = vmov 1.0   ;;  %v198_v7 = vld [vmem:[%s11273_s1] sm:$0xff]  ;;  %v199_v10 = vld [vmem:[%s11273_s1 + $0x8] sm:$0xff] }
   0xe   : > { %p162_p3 = scmp.lt.s32.totalorder %s6741_s14, 7  ;;  %398 = vmatprep.mubr.f32.mxu0 %v11326_v1  ;;  %2235 = vmatprep.mubr.f32.mxu1 %v11326_v1  ;;  %vm231_vm1 = vcmask 31744   ;;  %v200_v15 = vld [vmem:[%s11273_s1 + $0x10] sm:$0xff]  ;;  %v201_v22 = vld [vmem:[%s11273_s1 + $0x18] sm:$0xff]  ;;  %v202_v28 = vld [vmem:[%s11273_s1 + $0x20] sm:$0xff]  ;;  %vm319_vm2 = vcmask 1043456  }
   0xf   : > { %vm8304_vm0 = vcmp.lt.s32.totalorder %v11276_v0, 512  ;;  %v233_v9 = vsel %vm231_vm1, %v198_v7, 0  ;;  %v236_v14 = vsel %vm231_vm1, %v199_v10, 0  ;;  %v239_v19 = vsel %vm231_vm1, %v200_v15, 0  ;;  %v203_v33 = vld [vmem:[%s11273_s1 + $0x28] sm:$0xff]  ;;  %v204_v38 = vld [vmem:[%s11273_s1 + $0x30] sm:$0xff] }
  0x10   : > { %v11794_v2 = vsel %vm8304_vm0, 4294967295, %v11793_v2  ;;  %s12560_s14 = smov (!%p162_p3, %s6741_s14), 7  ;;  %196 = vst.msk [vmem:[#allocation2 + $0x3] ss:$8 sm:$0xf] %vm8304_vm0, %v8271_v3  ;;  %v8325_v13 = vand.u32 4294901760, %v233_v9 }
  0x11   : > { %11795 = vst [vmem:[#allocation3_spill] sm:$0xff] %v11794_v2  ;;  %s6742_s15 = sshll.u32 %s12560_s14, 1  ;;  %v8331_v18 = vand.u32 4294901760, %v236_v14  ;;  %v8342_v24 = vand.u32 4294901760, %v239_v19  ;;  %v242_v27 = vsel %vm231_vm1, %v201_v22, 0  ;;  %v245_v32 = vsel %vm231_vm1, %v202_v28, 0  ;;  %s170_s6 = scalar_lea.vmem %s11275_s3, %s12560_s14 }
  0x12   : > { %s165_s18 = scalar_lea.vmem %s11272_s0, %s6742_s15  ;;  %v8337_v21 = vsub.f32 %v233_v9, %v8325_v13  ;;  %v8362_v31 = vand.u32 4294901760, %v242_v27  ;;  %v8373_v36 = vand.u32 4294901760, %v245_v32  ;;  %v248_v37 = vsel %vm231_vm1, %v203_v33, 0  ;;  %v206_v28 = vld [vmem:[%s11273_s1 + $0x40] sm:$0xff] }
  0x13   : > { %v172_v4 = vld [vmem:[%s165_s18] ss:$2 sm:$0xf]  ;;  %v6744_v5 = vld [vmem:[%s165_s18 + $0x1] ss:$2 sm:$0xf]  ;;  %v8345_v25 = vsub.f32 %v236_v14, %v8331_v18  ;;  %v8357_v29 = vsub.f32 %v239_v19, %v8342_v24 }
  0x14   : > { %v175_v6 = vadd.f32 3.1415927, %v172_v4  ;;  %193 = vst.msk [vmem:[#allocation2 + $0x2] ss:$8 sm:$0xf] %vm8304_vm0, %v6744_v5  ;;  %v181_v17 = vmul.f32 %v6744_v5, %v6744_v5  ;;  %v8350_v26 = vand.u32 4294901760, %v8337_v21  ;;  %v8382_v43 = vsub.f32 %v242_v27, %v8362_v31 }
  0x15   : > { %v8360_v30 = vand.u32 4294901760, %v8345_v25  ;;  %v8371_v35 = vand.u32 4294901760, %v8357_v29  ;;  %v251_v54 = vsel %vm231_vm1, %v204_v38, 0  ;;  %v8408_v58 = vand.u32 4294901760, %v248_v37 }
  0x16   : > { %v176_v8 = vmul.f32 0.15915494, %v175_v6  ;;  %11796 = vst [vmem:[#allocation4_spill] sm:$0xff] %v8350_v26  ;;  %v402_v34 = vsub.f32 %v8337_v21, %v8350_v26  ;;  %v8418_v61 = vand.u32 4294901760, %v8382_v43  ;;  %v8421_v62 = vsub.f32 %v245_v32, %v8373_v36 }
  0x17   : > { %11797 = vst [vmem:[#allocation5_spill] sm:$0xff] %v8360_v30  ;;  %11798 = vst [vmem:[#allocation6_spill] sm:$0xff] %v8371_v35  ;;  %v413_v42 = vsub.f32 %v8345_v25, %v8360_v30  ;;  %v424_v60 = vsub.f32 %v8357_v29, %v8371_v35  ;;  %v8438_v10 = vand.u32 4294901760, %v251_v54  ;;  %vm4240_vm3 = vcmask 850944  }
  0x18   : > { %v177_v11 = vfloor.f32 %v176_v8  ;;  %v403_v48 = vand.u32 4294901760, %v402_v34  ;;  %11799 = vst [vmem:[#allocation7_spill] sm:$0xff] %v8418_v61  ;;  %v435_v14 = vsub.f32 %v8382_v43, %v8418_v61  ;;  %v8449_v15 = vand.u32 4294901760, %v8421_v62  ;;  %v220_v61 = vld [vmem:[%s11273_s1 + $0xb0] sm:$0xff] }
  0x19   : > { %v414_v63 = vand.u32 4294901760, %v413_v42  ;;  %v8464_v33 = vsub.f32 %v251_v54, %v8438_v10 }
  0x1a   : > { %v178_v12 = vmul.f32 6.2831855, %v177_v11  ;;  %v205_v11 = vld [vmem:[%s11273_s1 + $0x38] sm:$0xff]  ;;  %11800 = vst [vmem:[#allocation8_spill] sm:$0xff] %v8449_v15  ;;  %v436_v34 = vand.u32 4294901760, %v435_v14 }
  0x1b   : > { %v254_v27 = vsel %vm231_vm1, %v205_v11, 0  ;;  %v8481_v42 = vand.u32 4294901760, %v8464_v33 }
  0x1c   : > { %v179_v16 = vsub.f32 %v172_v4, %v178_v12  ;;  %v8468_v38 = vand.u32 4294901760, %v254_v27 }
  0x1d   : > { %11802 = vst [vmem:[#allocation10_spill] sm:$0xff] %v8481_v42  ;;  %v468_v54 = vsub.f32 %v8464_v33, %v8481_v42 }
  0x1e   : > { %v180_v20 = vmul.f32 %v179_v16, %v179_v16  ;;  %190 = vst.msk [vmem:[#allocation2 + $0x1] ss:$8 sm:$0xf] %vm8304_vm0, %v179_v16  ;;  %v8452_v16 = vsub.f32 %v248_v37, %v8408_v58  ;;  %v446_v37 = vsub.f32 %v8421_v62, %v8449_v15 }
  0x1f   : > { %v469_v11 = vand.u32 4294901760, %v468_v54 }
  0x20   : > { %v182_v23 = vadd.f32 %v181_v17, %v180_v20  ;;  %v425_v17 = vand.u32 4294901760, %v424_v60  ;;  %v8461_v32 = vand.u32 4294901760, %v8452_v16 }
  0x22   : > { %187 = vst.msk [vmem:[#allocation2] ss:$8 sm:$0xf] %vm8304_vm0, %v182_v23  ;;  %11801 = vst [vmem:[#allocation9_spill] sm:$0xff] %v8461_v32 }
  0x29   : > { %v228_v39 = vld [vmem:[#allocation2 + $0x8] sm:$0xf]  ;;  %v230_v40 = vld [vmem:[#allocation2 + $0x18] sm:$0xf]  ;;  %v227_v41 = vld [vmem:[#allocation2] sm:$0xf] }
  0x2a   : > { %v324_v44 = vsel %vm319_vm2, %v228_v39, 0  ;;  %v330_v45 = vsel %vm319_vm2, %v230_v40, 0  ;;  %v321_v46 = vsel %vm319_vm2, %v227_v41, 0  ;;  %v229_v47 = vld [vmem:[#allocation2 + $0x10] sm:$0xf]  ;;  %v257_v39 = vsel %vm231_vm1, %v206_v28, 0 }
  0x2b   : > { %v8387_v49 = vand.u32 4294901760, %v324_v44  ;;  %v8389_v50 = vand.u32 4294901760, %v330_v45  ;;  %v8391_v51 = vand.u32 4294901760, %v321_v46  ;;  %v327_v52 = vsel %vm319_vm2, %v229_v47, 0  ;;  %v207_v40 = vld [vmem:[%s11273_s1 + $0x48] sm:$0xff] }
  0x2c   : > { %v8394_v53 = vand.u32 4294901760, %v327_v52  ;;  %v457_v41 = vsub.f32 %v8452_v16, %v8461_v32  ;;  %v260_v47 = vsel %vm231_vm1, %v207_v40, 0  ;;  %v211_v40 = vld [vmem:[%s11273_s1 + $0x68] sm:$0xff] }
  0x2d   : > { %333 = vmatprep.subr.mxu0 %v8387_v49  ;;  %2170 = vmatprep.subr.mxu1 %v8389_v50  ;;  %v8400_v55 = vsub.f32 %v321_v46, %v8391_v51  ;;  %v8403_v56 = vsub.f32 %v324_v44, %v8387_v49  ;;  %v8406_v57 = vsub.f32 %v330_v45, %v8389_v50  ;;  %v447_v44 = vand.u32 4294901760, %v446_v37 }
  0x2e   : > { %335 = vmatpush1.msra.mxu0 %v8391_v51  ;;  %2172 = vmatpush1.msra.mxu1 %v8394_v53  ;;  %v8413_v59 = vsub.f32 %v327_v52, %v8394_v53  ;;  %v8484_v45 = vsub.f32 %v254_v27, %v8468_v38  ;;  %v8486_v46 = vand.u32 4294901760, %v257_v39  ;;  %v458_v52 = vand.u32 4294901760, %v457_v41 }
  0x2f   : > { %404 = vmatmul.mubr.f32.vlgmr.msra.gmra.mrb[0].mxu0 %v403_v48  ;;  %2241 = vmatmul.mubr.f32.vlgmr.msra.gmra.mrb[0].mxu1 %v403_v48  ;;  %v11280_v3 = vand.u32 4294901760, %v8403_v56  ;;  %v11279_v4 = vand.u32 4294901760, %v8406_v57  ;;  %v11278_v5 = vand.u32 4294901760, %v8400_v55  ;;  %v208_v48 = vld [vmem:[%s11273_s1 + $0x50] sm:$0xff]  ;;  %v272_v54 = vsel %vm231_vm1, %v211_v40, 0 }
  0x30   : > { %409 = vmatprep.mubr.f32.mxu0 %v11326_v1  ;;  %2246 = vmatprep.mubr.f32.mxu1 %v11326_v1  ;;  %v11277_v6 = vand.u32 4294901760, %v8413_v59  ;;  %v8497_v60 = vand.u32 4294901760, %v8484_v45 }
  0x31   : > { %v721_v7 = vsub.f32 %v8403_v56, %v11280_v3  ;;  %v2558_v8 = vsub.f32 %v8406_v57, %v11279_v4  ;;  %v727_v9 = vsub.f32 %v8400_v55, %v11278_v5 }
  0x32   : > { %v2564_v12 = vsub.f32 %v8413_v59, %v11277_v6  ;;  %11803 = vst [vmem:[#allocation11_spill] sm:$0xff] %v8497_v60  ;;  %v479_v14 = vsub.f32 %v8484_v45, %v8497_v60  ;;  %v214_v6 = vld [vmem:[%s11273_s1 + $0x80] sm:$0xff] }
  0x33   : > { %415 = vmatmul.mubr.f32.gmra.mrb[2].mxu0 %v414_v63  ;;  %2252 = vmatmul.mubr.f32.gmra.mrb[2].mxu1 %v414_v63  ;;  %v722_v19 = vand.u32 4294901760, %v721_v7  ;;  %v2559_v20 = vand.u32 4294901760, %v2558_v8  ;;  %v728_v22 = vand.u32 4294901760, %v727_v9  ;;  %v8500_v63 = vsub.f32 %v257_v39, %v8486_v46  ;;  %v209_v9 = vld [vmem:[%s11273_s1 + $0x58] sm:$0xff] }
  0x34   : > { %420 = vmatprep.mubr.f32.mxu0 %v11326_v1  ;;  %2257 = vmatprep.mubr.f32.mxu1 %v11326_v1  ;;  %v2565_v23 = vand.u32 4294901760, %v2564_v12  ;;  %v8502_v7 = vand.u32 4294901760, %v260_v47  ;;  %v263_v8 = vsel %vm231_vm1, %v208_v48, 0  ;;  %v480_v28 = vand.u32 4294901760, %v479_v14 }
  0x35   : > { %723 = vmatprep.subr.mxu0 %v722_v19  ;;  %2560 = vmatprep.subr.mxu1 %v2559_v20  ;;  %v8510_v12 = vand.u32 4294901760, %v263_v8  ;;  %v266_v20 = vsel %vm231_vm1, %v209_v9, 0  ;;  %v281_v3 = vsel %vm231_vm1, %v214_v6, 0  ;;  %v216_v6 = vld [vmem:[%s11273_s1 + $0x90] sm:$0xff] }
  0x36   : > { %729 = vmatpush1.msra.mxu0 %v728_v22  ;;  %2566 = vmatpush1.msra.mxu1 %v2565_v23  ;;  %v8518_v19 = vsub.f32 %v260_v47, %v8502_v7  ;;  %v210_v22 = vld [vmem:[%s11273_s1 + $0x60] sm:$0xff]  ;;  %v8526_v23 = vand.u32 4294901760, %v266_v20 }
  0x37   : > { %426 = vmatmul.mubr.f32.gmra.mrb[4].mxu0 %v425_v17  ;;  %2263 = vmatmul.mubr.f32.gmra.mrb[4].mxu1 %v425_v17  ;;  %v8515_v17 = vand.u32 4294901760, %v8500_v63  ;;  %v269_v27 = vsel %vm231_vm1, %v210_v22, 0  ;;  %v8535_v39 = vsub.f32 %v263_v8, %v8510_v12  ;;  %v212_v8 = vld [vmem:[%s11273_s1 + $0x70] sm:$0xff]  ;;  %v8566_v22 = vand.u32 4294901760, %v272_v54 }
  0x38   : > { %431 = vmatprep.mubr.f32.mxu0 %v11326_v1  ;;  %2268 = vmatprep.mubr.f32.mxu1 %v11326_v1  ;;  %v8532_v37 = vand.u32 4294901760, %v8518_v19  ;;  %v8542_v41 = vand.u32 4294901760, %v269_v27 }
  0x39   : > { %998 = vmatprep.subr.mxu0 %v8403_v56  ;;  %2835 = vmatprep.subr.mxu1 %v8406_v57  ;;  %11804 = vst [vmem:[#allocation12_spill] sm:$0xff] %v8515_v17  ;;  %v8547_v48 = vand.u32 4294901760, %v8535_v39 }
  0x3a   : > { %11805 = vst [vmem:[#allocation13_spill] sm:$0xff] %v8532_v37  ;;  %v501_v47 = vsub.f32 %v8518_v19, %v8532_v37  ;;  %v8559_v9 = vsub.f32 %v269_v27, %v8542_v41  ;;  %v213_v27 = vld [vmem:[%s11273_s1 + $0x78] sm:$0xff] }
  0x3b   : > { %437 = vmatmul.mubr.f32.gmra.mrb[6].mxu0 %v436_v34  ;;  %2274 = vmatmul.mubr.f32.gmra.mrb[6].mxu1 %v436_v34  ;;  %v490_v34 = vsub.f32 %v8500_v63, %v8515_v17  ;;  %11806 = vst [vmem:[#allocation14_spill] sm:$0xff] %v8547_v48  ;;  %v512_v14 = vsub.f32 %v8535_v39, %v8547_v48 }
  0x3c   : > { %442 = vmatprep.mubr.f32.mxu0 %v11326_v1  ;;  %2279 = vmatprep.mubr.f32.mxu1 %v11326_v1 }
  0x3d   : > { %v513_v40 = vand.u32 4294901760, %v512_v14 }
  0x3f   : > { %448 = vmatmul.mubr.f32.gmra.mrb[8].mxu0 %v447_v44  ;;  %2285 = vmatmul.mubr.f32.gmra.mrb[8].mxu1 %v447_v44  ;;  %v491_v44 = vand.u32 4294901760, %v490_v34  ;;  %v8575_v34 = vand.u32 4294901760, %v8559_v9 }
  0x40   : > { %453 = vmatprep.mubr.f32.mxu0 %v11326_v1  ;;  %2290 = vmatprep.mubr.f32.mxu1 %v11326_v1 }
  0x41   : > { %11808 = vst [vmem:[#allocation16_spill] sm:$0xff] %v8575_v34 }
  0x43   : > { %459 = vmatmul.mubr.f32.gmra.mrb[10].mxu0 %v458_v52  ;;  %2296 = vmatmul.mubr.f32.gmra.mrb[10].mxu1 %v458_v52  ;;  %v8550_v52 = vsub.f32 %v266_v20, %v8526_v23 }
  0x44   : > { %464 = vmatprep.mubr.f32.mxu0 %v11326_v1  ;;  %2301 = vmatprep.mubr.f32.mxu1 %v11326_v1 }
  0x45   : > { %v8564_v20 = vand.u32 4294901760, %v8550_v52 }
  0x47   : > { %470 = vmatmul.mubr.f32.gmra.mrb[12].mxu0 %v469_v11  ;;  %2307 = vmatmul.mubr.f32.gmra.mrb[12].mxu1 %v469_v11  ;;  %v502_v11 = vand.u32 4294901760, %v501_v47  ;;  %11807 = vst [vmem:[#allocation15_spill] sm:$0xff] %v8564_v20  ;;  %v8580_v47 = vsub.f32 %v272_v54, %v8566_v22 }
  0x48   : > { %475 = vmatprep.mubr.f32.mxu0 %v11326_v1  ;;  %2312 = vmatprep.mubr.f32.mxu1 %v11326_v1 }
  0x49   : > { %11809 = vst [vmem:[#allocation17_spill] sm:$0xff] %v8580_v47  ;;  %v8593_v54 = vand.u32 4294901760, %v8580_v47 }
  0x4b   : > { %481 = vmatmul.mubr.f32.gmra.mrb[14].mxu0 %v480_v28  ;;  %2318 = vmatmul.mubr.f32.gmra.mrb[14].mxu1 %v480_v28  ;;  %v275_v28 = vsel %vm231_vm1, %v212_v8, 0  ;;  %v278_v8 = vsel %vm231_vm1, %v213_v27, 0  ;;  %11810 = vst [vmem:[#allocation18_spill] sm:$0xff] %v8593_v54  ;;  %v215_v27 = vld [vmem:[%s11273_s1 + $0x88] sm:$0xff] }
  0x4c   : > { %486 = vmatprep.mubr.f32.mxu0 %v11326_v1  ;;  %2323 = vmatprep.mubr.f32.mxu1 %v11326_v1  ;;  %v8582_v0 = vand.u32 4294901760, %v275_v28  ;;  %v8598_v4 = vand.u32 4294901760, %v278_v8 }
  0x4e   : > { %v8596_v5 = vsub.f32 %v275_v28, %v8582_v0  ;;  %v545_v28 = vsub.f32 %v8580_v47, %v8593_v54 }
  0x4f   : > { %492 = vmatmul.mubr.f32.gmra.mrb[16].mxu0 %v491_v44  ;;  %2329 = vmatmul.mubr.f32.gmra.mrb[16].mxu1 %v491_v44  ;;  %v523_v44 = vsub.f32 %v8550_v52, %v8564_v20  ;;  %v8615_v20 = vand.u32 4294901760, %v281_v3 }
  0x50   : > { %497 = vmatprep.mubr.f32.mxu0 %v11326_v1  ;;  %2334 = vmatprep.mubr.f32.mxu1 %v11326_v1  ;;  %11811 = vst [vmem:[#allocation19_spill] sm:$0xff] %v8596_v5  ;;  %v8610_v2 = vand.u32 4294901760, %v8596_v5 }
  0x51   : > { %v524_v14 = vand.u32 4294901760, %v523_v44  ;;  %v284_v44 = vsel %vm231_vm1, %v215_v27, 0  ;;  %v546_v27 = vand.u32 4294901760, %v545_v28  ;;  %v8631_v48 = vsub.f32 %v281_v3, %v8615_v20 }
  0x52   : > { %11812 = vst [vmem:[#allocation20_spill] sm:$0xff] %v8610_v2 }
  0x53   : > { %503 = vmatmul.mubr.f32.gmra.mrb[18].mxu0 %v502_v11  ;;  %2340 = vmatmul.mubr.f32.gmra.mrb[18].mxu1 %v502_v11  ;;  %v534_v11 = vsub.f32 %v8559_v9, %v8575_v34  ;;  %v8613_v34 = vsub.f32 %v278_v8, %v8598_v4  ;;  %v556_v8 = vsub.f32 %v8596_v5, %v8610_v2  ;;  %v8643_v2 = vand.u32 4294901760, %v8631_v48 }
  0x54   : > { %508 = vmatprep.mubr.f32.mxu0 %v11326_v1  ;;  %2345 = vmatprep.mubr.f32.mxu1 %v11326_v1  ;;  %11815 = vst [vmem:[#allocation23_spill] sm:$0xff] %v8631_v48 }
  0x55   : > { %11813 = vst [vmem:[#allocation21_spill] sm:$0xff] %v8613_v34  ;;  %v8628_v54 = vand.u32 4294901760, %v8613_v34  ;;  %11816 = vst [vmem:[#allocation24_spill] sm:$0xff] %v8643_v2 }
  0x57   : > { %514 = vmatmul.mubr.f32.gmra.mrb[20].mxu0 %v513_v40  ;;  %2351 = vmatmul.mubr.f32.gmra.mrb[20].mxu1 %v513_v40  ;;  %v535_v40 = vand.u32 4294901760, %v534_v11  ;;  %v8622_v11 = vand.u32 4294901760, %v284_v44  ;;  %11814 = vst [vmem:[#allocation22_spill] sm:$0xff] %v8628_v54  ;;  %v567_v28 = vsub.f32 %v8613_v34, %v8628_v54 }
  0x58   : > { %519 = vmatprep.mubr.f32.mxu0 %v11326_v1  ;;  %2356 = vmatprep.mubr.f32.mxu1 %v11326_v1 }
  0x59   : > { %v8646_v3 = vsub.f32 %v284_v44, %v8622_v11  ;;  %v568_v54 = vand.u32 4294901760, %v567_v28  ;;  %v578_v44 = vsub.f32 %v8631_v48, %v8643_v2 }
  0x5b   : > { %525 = vmatmul.mubr.f32.gmra.mrb[22].mxu0 %v524_v14  ;;  %2362 = vmatmul.mubr.f32.gmra.mrb[22].mxu1 %v524_v14  ;;  %v287_v14 = vsel %vm231_vm1, %v216_v6, 0  ;;  %v217_v6 = vld [vmem:[%s11273_s1 + $0x98] sm:$0xff]  ;;  %11817 = vst [vmem:[#allocation25_spill] sm:$0xff] %v8646_v3  ;;  %v8660_v60 = vand.u32 4294901760, %v8646_v3  ;;  %v579_v28 = vand.u32 4294901760, %v578_v44 }
  0x5c   : > { %530 = vmatprep.mubr.f32.mxu0 %v11326_v1  ;;  %2367 = vmatprep.mubr.f32.mxu1 %v11326_v1  ;;  %v8638_v37 = vand.u32 4294901760, %v287_v14  ;;  %v290_v17 = vsel %vm231_vm1, %v217_v6, 0 }
  0x5d   : > { %11819 = vst [vmem:[#allocation27_spill] sm:$0xff] %v8660_v60  ;;  %v8662_v42 = vand.u32 4294901760, %v290_v17  ;;  %v589_v2 = vsub.f32 %v8646_v3, %v8660_v60  ;;  %v11828_v3 = vmov 0.0  }
  0x5f   : > { %536 = vmatmul.mubr.f32.gmra.mrb[24].mxu0 %v535_v40  ;;  %2373 = vmatmul.mubr.f32.gmra.mrb[24].mxu1 %v535_v40  ;;  %v557_v40 = vand.u32 4294901760, %v556_v8  ;;  %v8655_v8 = vsub.f32 %v287_v14, %v8638_v37  ;;  %v219_v14 = vld [vmem:[%s11273_s1 + $0xa8] sm:$0xff]  ;;  %v8676_v32 = vsub.f32 %v290_v17, %v8662_v42  ;;  %v590_v44 = vand.u32 4294901760, %v589_v2 }
  0x60   : > { %541 = vmatprep.mubr.f32.mxu0 %v11326_v1  ;;  %2378 = vmatprep.mubr.f32.mxu1 %v11326_v1 }
  0x61   : > { %11818 = vst [vmem:[#allocation26_spill] sm:$0xff] %v8655_v8  ;;  %11821 = vst [vmem:[#allocation29_spill] sm:$0xff] %v8676_v32  ;;  %v8689_v17 = vand.u32 4294901760, %v8676_v32 }
  0x63   : > { %547 = vmatmul.mubr.f32.gmra.mrb[26].mxu0 %v546_v27  ;;  %2384 = vmatmul.mubr.f32.gmra.mrb[26].mxu1 %v546_v27  ;;  %v218_v27 = vld [vmem:[%s11273_s1 + $0xa0] sm:$0xff]  ;;  %11822 = vst [vmem:[#allocation30_spill] sm:$0xff] %v8689_v17 }
  0x64   : > { %552 = vmatprep.mubr.f32.mxu0 %v11326_v1  ;;  %2389 = vmatprep.mubr.f32.mxu1 %v11326_v1  ;;  %v293_v6 = vsel %vm231_vm1, %v218_v27, 0  ;;  %v296_v27 = vsel %vm231_vm1, %v219_v14, 0  ;;  %v221_v14 = vld [vmem:[%s11273_s1 + $0xb8] sm:$0xff] }
  0x65   : > { %v8678_v15 = vand.u32 4294901760, %v293_v6  ;;  %v8694_v35 = vand.u32 4294901760, %v296_v27  ;;  %v302_v2 = vsel %vm231_vm1, %v221_v14, 0 }
  0x67   : > { %558 = vmatmul.mubr.f32.gmra.mrb[28].mxu0 %v557_v40  ;;  %2395 = vmatmul.mubr.f32.gmra.mrb[28].mxu1 %v557_v40  ;;  %v8671_v40 = vand.u32 4294901760, %v8655_v8  ;;  %v8692_v60 = vsub.f32 %v293_v6, %v8678_v15  ;;  %v611_v6 = vsub.f32 %v8676_v32, %v8689_v17  ;;  %v8709_v26 = vsub.f32 %v296_v27, %v8694_v35 }
  0x68   : > { %563 = vmatprep.mubr.f32.mxu0 %v11326_v1  ;;  %2400 = vmatprep.mubr.f32.mxu1 %v11326_v1 }
  0x69   : > { %11820 = vst [vmem:[#allocation28_spill] sm:$0xff] %v8671_v40  ;;  %11823 = vst [vmem:[#allocation31_spill] sm:$0xff] %v8692_v60  ;;  %v8706_v30 = vand.u32 4294901760, %v8692_v60  ;;  %v612_v14 = vand.u32 4294901760, %v611_v6  ;;  %v8724_v17 = vand.u32 4294901760, %v8709_v26 }
  0x6a   : > { %11825 = vst [vmem:[#allocation33_spill] sm:$0xff] %v8709_v26 }
  0x6b   : > { %569 = vmatmul.mubr.f32.gmra.mrb[30].mxu0 %v568_v54  ;;  %2406 = vmatmul.mubr.f32.gmra.mrb[30].mxu1 %v568_v54  ;;  %v600_v54 = vsub.f32 %v8655_v8, %v8671_v40  ;;  %v299_v40 = vsel %vm231_vm1, %v220_v61, 0  ;;  %11824 = vst [vmem:[#allocation32_spill] sm:$0xff] %v8706_v30  ;;  %v222_v61 = vld [vmem:[%s11273_s1 + $0xc0] sm:$0xff]  ;;  %v622_v27 = vsub.f32 %v8692_v60, %v8706_v30  ;;  %11826 = vst [vmem:[#allocation34_spill] sm:$0xff] %v8724_v17 }
  0x6c   : > { %574 = vmatprep.mubr.f32.mxu0 %v11326_v1  ;;  %2411 = vmatprep.mubr.f32.mxu1 %v11326_v1  ;;  %v8711_v8 = vand.u32 4294901760, %v299_v40  ;;  %v633_v30 = vsub.f32 %v8709_v26, %v8724_v17 }
  0x6d   : > { %v623_v6 = vand.u32 4294901760, %v622_v27 }
  0x6e   : > { %v8727_v32 = vsub.f32 %v299_v40, %v8711_v8 }
  0x6f   : > { %580 = vmatmul.mubr.f32.gmra.mrb[32].mxu0 %v579_v28  ;;  %2417 = vmatmul.mubr.f32.gmra.mrb[32].mxu1 %v579_v28  ;;  %v601_v28 = vand.u32 4294901760, %v600_v54  ;;  %v8718_v54 = vand.u32 4294901760, %v302_v2 }
  0x70   : > { %585 = vmatprep.mubr.f32.mxu0 %v11326_v1  ;;  %2422 = vmatprep.mubr.f32.mxu1 %v11326_v1  ;;  %11827 = vst [vmem:[#allocation35_spill] sm:$0xff] %v8727_v32  ;;  %v8740_v40 = vand.u32 4294901760, %v8727_v32 }
  0x71   : > { %v8743_v60 = vsub.f32 %v302_v2, %v8718_v54 }
  0x72   : > { %11829 = vst [vmem:[#allocation36_spill] sm:$0xff] %v8740_v40  ;;  %v644_v27 = vsub.f32 %v8727_v32, %v8740_v40 }
  0x73   : > { %591 = vmatmul.mubr.f32.gmra.mrb[34].mxu0 %v590_v44  ;;  %2428 = vmatmul.mubr.f32.gmra.mrb[34].mxu1 %v590_v44  ;;  %v305_v44 = vsel %vm231_vm1, %v222_v61, 0  ;;  %11830 = vst [vmem:[#allocation37_spill] sm:$0xff] %v8743_v60  ;;  %v8755_v17 = vand.u32 4294901760, %v8743_v60 }
  0x74   : > { %596 = vmatprep.mubr.f32.mxu0 %v11326_v1  ;;  %2433 = vmatprep.mubr.f32.mxu1 %v11326_v1  ;;  %v223_v1 = vld [vmem:[%s11273_s1 + $0xc8] sm:$0xff]  ;;  %v8734_v61 = vand.u32 4294901760, %v305_v44  ;;  %v645_v40 = vand.u32 4294901760, %v644_v27 }
  0x75   : > { %11831 = vst [vmem:[#allocation38_spill] sm:$0xff] %v8755_v17 }
  0x76   : > { %v8758_v2 = vsub.f32 %v305_v44, %v8734_v61  ;;  %v655_v44 = vsub.f32 %v8743_v60, %v8755_v17 }
  0x77   : > { %602 = vmatmul.mubr.f32.gmra.mrb[36].mxu0 %v601_v28  ;;  %2439 = vmatmul.mubr.f32.gmra.mrb[36].mxu1 %v601_v28  ;;  %v308_v28 = vsel %vm231_vm1, %v223_v1, 0  ;;  %v224_v1 = vld [vmem:[%s11273_s1 + $0xd0] sm:$0xff] }
  0x78   : > { %607 = vmatprep.mubr.f32.mxu0 %v11828_v3  ;;  %2444 = vmatprep.mubr.f32.mxu1 %v11828_v3  ;;  %v8750_v48 = vand.u32 4294901760, %v308_v28  ;;  %v311_v26 = vsel %vm231_vm1, %v224_v1, 0  ;;  %v8772_v32 = vand.u32 4294901760, %v8758_v2  ;;  %v656_v27 = vand.u32 4294901760, %v655_v44 }
  0x79   : > { %v8774_v34 = vand.u32 4294901760, %v311_v26 }
  0x7a   : > { %11832 = vst [vmem:[#allocation39_spill] sm:$0xff] %v8772_v32  ;;  %v666_v17 = vsub.f32 %v8758_v2, %v8772_v32 }
  0x7b   : > { %613 = vmatmul.mubr.f32.gmra.mrb[38].mxu0 %v612_v14  ;;  %2450 = vmatmul.mubr.f32.gmra.mrb[38].mxu1 %v612_v14  ;;  %v634_v14 = vand.u32 4294901760, %v633_v30  ;;  %v8767_v30 = vsub.f32 %v308_v28, %v8750_v48  ;;  %v226_v28 = vld [vmem:[%s11273_s1 + $0xe0] sm:$0xff]  ;;  %v8788_v60 = vsub.f32 %v311_v26, %v8774_v34 }
  0x7c   : > { %618 = vmatprep.mubr.f32.mxu0 %v11828_v3  ;;  %2455 = vmatprep.mubr.f32.mxu1 %v11828_v3 }
  0x7d   : > { %v8798_v44 = vand.u32 4294901760, %v8788_v60 }
  0x7f   : > { %624 = vmatmul.mubr.f32.gmra.mrb[40].mxu0 %v623_v6  ;;  %2461 = vmatmul.mubr.f32.gmra.mrb[40].mxu1 %v623_v6  ;;  %v225_v6 = vld [vmem:[%s11273_s1 + $0xd8] sm:$0xff]  ;;  %11834 = vst [vmem:[#allocation41_spill] sm:$0xff] %v8798_v44 }
  0x80   : > { %629 = vmatprep.mubr.f32.mxu0 %v11828_v3  ;;  %2466 = vmatprep.mubr.f32.mxu1 %v11828_v3  ;;  %v314_v1 = vsel %vm231_vm1, %v225_v6, 0  ;;  %v317_v6 = vsel %vm231_vm1, %v226_v28, 0 }
  0x81   : > { %v8790_v5 = vand.u32 4294901760, %v314_v1  ;;  %v8803_v32 = vand.u32 4294901760, %v317_v6 }
  0x83   : > { %635 = vmatmul.mubr.f32.gmra.mrb[42].mxu0 %v634_v14  ;;  %2472 = vmatmul.mubr.f32.gmra.mrb[42].mxu1 %v634_v14  ;;  %v8783_v14 = vand.u32 4294901760, %v8767_v30  ;;  %v8801_v26 = vsub.f32 %v314_v1, %v8790_v5 }
  0x84   : > { %640 = vmatprep.mubr.f32.mxu0 %v11828_v3  ;;  %2477 = vmatprep.mubr.f32.mxu1 %v11828_v3 }
  0x85   : > { %11833 = vst [vmem:[#allocation40_spill] sm:$0xff] %v8783_v14  ;;  %v677_v47 = vsub.f32 %v8767_v30, %v8783_v14  ;;  %v688_v14 = vsub.f32 %v8788_v60, %v8798_v44 }
  0x87   : > { %646 = vmatmul.mubr.f32.gmra.mrb[44].mxu0 %v645_v40  ;;  %2483 = vmatmul.mubr.f32.gmra.mrb[44].mxu1 %v645_v40  ;;  %v667_v40 = vand.u32 4294901760, %v666_v17  ;;  %v678_v28 = vand.u32 4294901760, %v677_v47  ;;  %v8810_v17 = vand.u32 4294901760, %v8801_v26  ;;  %v689_v1 = vand.u32 4294901760, %v688_v14 }
  0x88   : > { %651 = vmatprep.mubr.f32.mxu0 %v11828_v3  ;;  %2488 = vmatprep.mubr.f32.mxu1 %v11828_v3 }
  0x8b   : > { %657 = vmatmul.mubr.f32.gmra.mrb[46].mxu0 %v656_v27  ;;  %2494 = vmatmul.mubr.f32.gmra.mrb[46].mxu1 %v656_v27  ;;  %v8813_v27 = vsub.f32 %v317_v6, %v8803_v32 }
  0x8c   : > { %662 = vmatprep.mubr.f32.mxu0 %v11828_v3  ;;  %2499 = vmatprep.mubr.f32.mxu1 %v11828_v3 }
  0x8d   : > { %v8820_v47 = vand.u32 4294901760, %v8813_v27 }
  0x8f   : > { %668 = vmatmul.mubr.f32.gmra.mrb[48].mxu0 %v667_v40  ;;  %2505 = vmatmul.mubr.f32.gmra.mrb[48].mxu1 %v667_v40  ;;  %v699_v40 = vsub.f32 %v8801_v26, %v8810_v17  ;;  %v710_v44 = vsub.f32 %v8813_v27, %v8820_v47 }
  0x90   : > { %673 = vmatprep.mubr.f32.mxu0 %v11828_v3  ;;  %2510 = vmatprep.mubr.f32.mxu1 %v11828_v3 }
  0x91   : > { %v700_v6 = vand.u32 4294901760, %v699_v40  ;;  %v711_v14 = vand.u32 4294901760, %v710_v44  ;;  %v11835_v44 = vand.u32 4294901760, %v8403_v56  ;;  %v11841_v56 = vld [vmem:[#allocation25_spill] sm:$0xff]  ;;  %v11862_v40 = vld [vmem:[#allocation16_spill] sm:$0xff] }
  0x93   : > { %679 = vmatmul.mubr.f32.gmra.mrb[50].mxu0 %v678_v28  ;;  %2516 = vmatmul.mubr.f32.gmra.mrb[50].mxu1 %v678_v28  ;;  %v11836_v28 = vand.u32 4294901760, %v8406_v57  ;;  %v11842_v57 = vld [vmem:[#allocation26_spill] sm:$0xff] }
  0x94   : > { %684 = vmatprep.mubr.f32.mxu0 %v11828_v3  ;;  %2521 = vmatprep.mubr.f32.mxu1 %v11828_v3 }
  0x97   : > { %690 = vmatmul.mubr.f32.gmra.mrb[52].mxu0 %v689_v1  ;;  %2527 = vmatmul.mubr.f32.gmra.mrb[52].mxu1 %v689_v1  ;;  %v11861_v1 = vld [vmem:[#allocation15_spill] sm:$0xff] }
  0x98   : > { %695 = vmatprep.mubr.f32.mxu0 %v11828_v3  ;;  %2532 = vmatprep.mubr.f32.mxu1 %v11828_v3 }
  0x9b   : > { %701 = vmatmul.mubr.f32.gmra.mrb[54].mxu0 %v700_v6  ;;  %2538 = vmatmul.mubr.f32.gmra.mrb[54].mxu1 %v700_v6  ;;  %v11863_v6 = vld [vmem:[#allocation18_spill] sm:$0xff] }
  0x9c   : > { %706 = vmatprep.mubr.f32.mxu0 %v11828_v3  ;;  %2543 = vmatprep.mubr.f32.mxu1 %v11828_v3 }
  0x9f   : > { %712 = vmatmul.mubr.f32.gmra.mrb[56].mxu0 %v711_v14  ;;  %2549 = vmatmul.mubr.f32.gmra.mrb[56].mxu1 %v711_v14  ;;  %v11864_v14 = vld [vmem:[#allocation20_spill] sm:$0xff] }
  0xa0   : > { %792 = vmatprep.mubr.f32.mxu0 %v11828_v3  ;;  %2629 = vmatprep.mubr.f32.mxu1 %v11828_v3 }
  0xa3   : > { %794 = vmatmul.mubr.f32.vlgmr.msra.gmra.mrb[0].mxu0 %v8325_v13  ;;  %2631 = vmatmul.mubr.f32.vlgmr.msra.gmra.mrb[0].mxu1 %v8325_v13 }
  0xa4   : > { %799 = vmatprep.mubr.f32.mxu0 %v11828_v3  ;;  %2636 = vmatprep.mubr.f32.mxu1 %v11828_v3 }
  0xa5   : > { %1001 = vmatpush1.msra.mxu0 %v8400_v55  ;;  %2838 = vmatpush1.msra.mxu1 %v8413_v59 }
  0xa6   : > { %1298 = vmatprep.subr.mxu0 %v8387_v49  ;;  %3135 = vmatprep.subr.mxu1 %v8389_v50 }
  0xa7   : > { %801 = vmatmul.mubr.f32.gmra.mrb[2].mxu0 %v8331_v18  ;;  %2638 = vmatmul.mubr.f32.gmra.mrb[2].mxu1 %v8331_v18 }
  0xa8   : > { %806 = vmatprep.mubr.f32.mxu0 %v11828_v3  ;;  %2643 = vmatprep.mubr.f32.mxu1 %v11828_v3 }
  0xab   : > { %808 = vmatmul.mubr.f32.gmra.mrb[4].mxu0 %v8342_v24  ;;  %2645 = vmatmul.mubr.f32.gmra.mrb[4].mxu1 %v8342_v24 }
  0xac   : > { %813 = vmatprep.mubr.f32.mxu0 %v11828_v3  ;;  %2650 = vmatprep.mubr.f32.mxu1 %v11828_v3 }
  0xaf   : > { %815 = vmatmul.mubr.f32.gmra.mrb[6].mxu0 %v8362_v31  ;;  %2652 = vmatmul.mubr.f32.gmra.mrb[6].mxu1 %v8362_v31 }
  0xb0   : > { %820 = vmatprep.mubr.f32.mxu0 %v11828_v3  ;;  %2657 = vmatprep.mubr.f32.mxu1 %v11828_v3 }
  0xb3   : > { %822 = vmatmul.mubr.f32.gmra.mrb[8].mxu0 %v8373_v36  ;;  %2659 = vmatmul.mubr.f32.gmra.mrb[8].mxu1 %v8373_v36 }
  0xb4   : > { %827 = vmatprep.mubr.f32.mxu0 %v11828_v3  ;;  %2664 = vmatprep.mubr.f32.mxu1 %v11828_v3 }
  0xb7   : > { %829 = vmatmul.mubr.f32.gmra.mrb[10].mxu0 %v8408_v58  ;;  %2666 = vmatmul.mubr.f32.gmra.mrb[10].mxu1 %v8408_v58 }
  0xb8   : > { %834 = vmatprep.mubr.f32.mxu0 %v11828_v3  ;;  %2671 = vmatprep.mubr.f32.mxu1 %v11828_v3 }
  0xbb   : > { %836 = vmatmul.mubr.f32.gmra.mrb[12].mxu0 %v8438_v10  ;;  %2673 = vmatmul.mubr.f32.gmra.mrb[12].mxu1 %v8438_v10 }
  0xbc   : > { %841 = vmatprep.mubr.f32.mxu0 %v11828_v3  ;;  %2678 = vmatprep.mubr.f32.mxu1 %v11828_v3 }
  0xbf   : > { %843 = vmatmul.mubr.f32.gmra.mrb[14].mxu0 %v8468_v38  ;;  %2680 = vmatmul.mubr.f32.gmra.mrb[14].mxu1 %v8468_v38 }
  0xc0   : > { %848 = vmatprep.mubr.f32.mxu0 %v11828_v3  ;;  %2685 = vmatprep.mubr.f32.mxu1 %v11828_v3 }
  0xc3   : > { %850 = vmatmul.mubr.f32.gmra.mrb[16].mxu0 %v8486_v46  ;;  %2687 = vmatmul.mubr.f32.gmra.mrb[16].mxu1 %v8486_v46 }
  0xc4   : > { %855 = vmatprep.mubr.f32.mxu0 %v11828_v3  ;;  %2692 = vmatprep.mubr.f32.mxu1 %v11828_v3 }
  0xc7   : > { %857 = vmatmul.mubr.f32.gmra.mrb[18].mxu0 %v8502_v7  ;;  %2694 = vmatmul.mubr.f32.gmra.mrb[18].mxu1 %v8502_v7 }
  0xc8   : > { %862 = vmatprep.mubr.f32.mxu0 %v11828_v3  ;;  %2699 = vmatprep.mubr.f32.mxu1 %v11828_v3 }
  0xcb   : > { %864 = vmatmul.mubr.f32.gmra.mrb[20].mxu0 %v8510_v12  ;;  %2701 = vmatmul.mubr.f32.gmra.mrb[20].mxu1 %v8510_v12 }
  0xcc   : > { %869 = vmatprep.mubr.f32.mxu0 %v11828_v3  ;;  %2706 = vmatprep.mubr.f32.mxu1 %v11828_v3 }
  0xcf   : > { %871 = vmatmul.mubr.f32.gmra.mrb[22].mxu0 %v8526_v23  ;;  %2708 = vmatmul.mubr.f32.gmra.mrb[22].mxu1 %v8526_v23 }
  0xd0   : > { %876 = vmatprep.mubr.f32.mxu0 %v11828_v3  ;;  %2713 = vmatprep.mubr.f32.mxu1 %v11828_v3 }
  0xd3   : > { %878 = vmatmul.mubr.f32.gmra.mrb[24].mxu0 %v8542_v41  ;;  %2715 = vmatmul.mubr.f32.gmra.mrb[24].mxu1 %v8542_v41 }
  0xd4   : > { %883 = vmatprep.mubr.f32.mxu0 %v11828_v3  ;;  %2720 = vmatprep.mubr.f32.mxu1 %v11828_v3 }
  0xd7   : > { %885 = vmatmul.mubr.f32.gmra.mrb[26].mxu0 %v8566_v22  ;;  %2722 = vmatmul.mubr.f32.gmra.mrb[26].mxu1 %v8566_v22 }
  0xd8   : > { %890 = vmatprep.mubr.f32.mxu0 %v11828_v3  ;;  %2727 = vmatprep.mubr.f32.mxu1 %v11828_v3 }
  0xdb   : > { %892 = vmatmul.mubr.f32.gmra.mrb[28].mxu0 %v8582_v0  ;;  %2729 = vmatmul.mubr.f32.gmra.mrb[28].mxu1 %v8582_v0 }
  0xdc   : > { %897 = vmatprep.mubr.f32.mxu0 %v11828_v3  ;;  %2734 = vmatprep.mubr.f32.mxu1 %v11828_v3 }
  0xdf   : > { %899 = vmatmul.mubr.f32.gmra.mrb[30].mxu0 %v8598_v4  ;;  %2736 = vmatmul.mubr.f32.gmra.mrb[30].mxu1 %v8598_v4 }
  0xe0   : > { %904 = vmatprep.mubr.f32.mxu0 %v11828_v3  ;;  %2741 = vmatprep.mubr.f32.mxu1 %v11828_v3 }
  0xe3   : > { %906 = vmatmul.mubr.f32.gmra.mrb[32].mxu0 %v8615_v20  ;;  %2743 = vmatmul.mubr.f32.gmra.mrb[32].mxu1 %v8615_v20 }
  0xe4   : > { %911 = vmatprep.mubr.f32.mxu0 %v11828_v3  ;;  %2748 = vmatprep.mubr.f32.mxu1 %v11828_v3 }
  0xe7   : > { %913 = vmatmul.mubr.f32.gmra.mrb[34].mxu0 %v8622_v11  ;;  %2750 = vmatmul.mubr.f32.gmra.mrb[34].mxu1 %v8622_v11 }
  0xe8   : > { %918 = vmatprep.mubr.f32.mxu0 %v11828_v3  ;;  %2755 = vmatprep.mubr.f32.mxu1 %v11828_v3 }
  0xeb   : > { %920 = vmatmul.mubr.f32.gmra.mrb[36].mxu0 %v8638_v37  ;;  %2757 = vmatmul.mubr.f32.gmra.mrb[36].mxu1 %v8638_v37 }
  0xec   : > { %925 = vmatprep.mubr.f32.mxu0 %v11828_v3  ;;  %2762 = vmatprep.mubr.f32.mxu1 %v11828_v3 }
  0xef   : > { %927 = vmatmul.mubr.f32.gmra.mrb[38].mxu0 %v8662_v42  ;;  %2764 = vmatmul.mubr.f32.gmra.mrb[38].mxu1 %v8662_v42 }
  0xf0   : > { %932 = vmatprep.mubr.f32.mxu0 %v11828_v3  ;;  %2769 = vmatprep.mubr.f32.mxu1 %v11828_v3 }
  0xf3   : > { %934 = vmatmul.mubr.f32.gmra.mrb[40].mxu0 %v8678_v15  ;;  %2771 = vmatmul.mubr.f32.gmra.mrb[40].mxu1 %v8678_v15 }
  0xf4   : > { %939 = vmatprep.mubr.f32.mxu0 %v11828_v3  ;;  %2776 = vmatprep.mubr.f32.mxu1 %v11828_v3 }
  0xf7   : > { %941 = vmatmul.mubr.f32.gmra.mrb[42].mxu0 %v8694_v35  ;;  %2778 = vmatmul.mubr.f32.gmra.mrb[42].mxu1 %v8694_v35 }
  0xf8   : > { %946 = vmatprep.mubr.f32.mxu0 %v11828_v3  ;;  %2783 = vmatprep.mubr.f32.mxu1 %v11828_v3 }
  0xfb   : > { %948 = vmatmul.mubr.f32.gmra.mrb[44].mxu0 %v8711_v8  ;;  %2785 = vmatmul.mubr.f32.gmra.mrb[44].mxu1 %v8711_v8 }
  0xfc   : > { %953 = vmatprep.mubr.f32.mxu0 %v11828_v3  ;;  %2790 = vmatprep.mubr.f32.mxu1 %v11828_v3 }
  0xff   : > { %955 = vmatmul.mubr.f32.gmra.mrb[46].mxu0 %v8718_v54  ;;  %2792 = vmatmul.mubr.f32.gmra.mrb[46].mxu1 %v8718_v54 }
 0x100   : > { %960 = vmatprep.mubr.f32.mxu0 %v11828_v3  ;;  %2797 = vmatprep.mubr.f32.mxu1 %v11828_v3 }
 0x103   : > { %962 = vmatmul.mubr.f32.gmra.mrb[48].mxu0 %v8734_v61  ;;  %2799 = vmatmul.mubr.f32.gmra.mrb[48].mxu1 %v8734_v61 }
 0x104   : > { %967 = vmatprep.mubr.f32.mxu0 %v11828_v3  ;;  %2804 = vmatprep.mubr.f32.mxu1 %v11828_v3 }
 0x107   : > { %969 = vmatmul.mubr.f32.gmra.mrb[50].mxu0 %v8750_v48  ;;  %2806 = vmatmul.mubr.f32.gmra.mrb[50].mxu1 %v8750_v48 }
 0x108   : > { %974 = vmatprep.mubr.f32.mxu0 %v11828_v3  ;;  %2811 = vmatprep.mubr.f32.mxu1 %v11828_v3 }
 0x10b   : > { %976 = vmatmul.mubr.f32.gmra.mrb[52].mxu0 %v8774_v34  ;;  %2813 = vmatmul.mubr.f32.gmra.mrb[52].mxu1 %v8774_v34 }
 0x10c   : > { %981 = vmatprep.mubr.f32.mxu0 %v11828_v3  ;;  %2818 = vmatprep.mubr.f32.mxu1 %v11828_v3 }
 0x10f   : > { %983 = vmatmul.mubr.f32.gmra.mrb[54].mxu0 %v8790_v5  ;;  %2820 = vmatmul.mubr.f32.gmra.mrb[54].mxu1 %v8790_v5 }
 0x110   : > { %988 = vmatprep.mubr.f32.mxu0 %v11828_v3  ;;  %2825 = vmatprep.mubr.f32.mxu1 %v11828_v3 }
 0x113   : > { %990 = vmatmul.mubr.f32.gmra.mrb[56].mxu0 %v8803_v32  ;;  %2827 = vmatmul.mubr.f32.gmra.mrb[56].mxu1 %v8803_v32 }
 0x114   : > { %1064 = vmatprep.mubr.f32.mxu0 %v11828_v3  ;;  %2901 = vmatprep.mubr.f32.mxu1 %v11828_v3 }
 0x117   : > { %1067 = vmatmul.mubr.f32.vlgmr.msra.gmra.mrb[0].mxu0 %v8337_v21  ;;  %2904 = vmatmul.mubr.f32.vlgmr.msra.gmra.mrb[0].mxu1 %v8337_v21  ;;  %v11837_v21 = vld [vmem:[#allocation17_spill] sm:$0xff] }
 0x118   : > { %1072 = vmatprep.mubr.f32.mxu0 %v11828_v3  ;;  %2909 = vmatprep.mubr.f32.mxu1 %v11828_v3 }
 0x119   : > { %1300 = vmatpush1.msra.mxu0 %v8391_v51  ;;  %3137 = vmatpush1.msra.mxu1 %v8394_v53 }
 0x11a   : > { %1628 = vmatprep.subr.mxu0 %v11835_v44  ;;  %3465 = vmatprep.subr.mxu1 %v11836_v28  ;;  %v11865_v44 = vld [vmem:[#allocation22_spill] sm:$0xff]  ;;  %v11866_v28 = vld [vmem:[#allocation24_spill] sm:$0xff] }
 0x11b   : > { %1075 = vmatmul.mubr.f32.gmra.mrb[2].mxu0 %v8345_v25  ;;  %2912 = vmatmul.mubr.f32.gmra.mrb[2].mxu1 %v8345_v25  ;;  %v11838_v25 = vld [vmem:[#allocation19_spill] sm:$0xff] }
 0x11c   : > { %1080 = vmatprep.mubr.f32.mxu0 %v11828_v3  ;;  %2917 = vmatprep.mubr.f32.mxu1 %v11828_v3 }
 0x11f   : > { %1083 = vmatmul.mubr.f32.gmra.mrb[4].mxu0 %v8357_v29  ;;  %2920 = vmatmul.mubr.f32.gmra.mrb[4].mxu1 %v8357_v29  ;;  %v11839_v29 = vld [vmem:[#allocation21_spill] sm:$0xff] }
 0x120   : > { %1088 = vmatprep.mubr.f32.mxu0 %v11828_v3  ;;  %2925 = vmatprep.mubr.f32.mxu1 %v11828_v3 }
 0x123   : > { %1091 = vmatmul.mubr.f32.gmra.mrb[6].mxu0 %v8382_v43  ;;  %2928 = vmatmul.mubr.f32.gmra.mrb[6].mxu1 %v8382_v43  ;;  %v11840_v43 = vld [vmem:[#allocation23_spill] sm:$0xff] }
 0x124   : > { %1096 = vmatprep.mubr.f32.mxu0 %v11828_v3  ;;  %2933 = vmatprep.mubr.f32.mxu1 %v11828_v3 }
 0x127   : > { %1099 = vmatmul.mubr.f32.gmra.mrb[8].mxu0 %v8421_v62  ;;  %2936 = vmatmul.mubr.f32.gmra.mrb[8].mxu1 %v8421_v62  ;;  %v11843_v62 = vld [vmem:[#allocation29_spill] sm:$0xff] }
 0x128   : > { %1104 = vmatprep.mubr.f32.mxu0 %v11828_v3  ;;  %2941 = vmatprep.mubr.f32.mxu1 %v11828_v3 }
 0x12b   : > { %1107 = vmatmul.mubr.f32.gmra.mrb[10].mxu0 %v8452_v16  ;;  %2944 = vmatmul.mubr.f32.gmra.mrb[10].mxu1 %v8452_v16  ;;  %v11844_v16 = vld [vmem:[#allocation31_spill] sm:$0xff] }
 0x12c   : > { %1112 = vmatprep.mubr.f32.mxu0 %v11828_v3  ;;  %2949 = vmatprep.mubr.f32.mxu1 %v11828_v3 }
 0x12f   : > { %1115 = vmatmul.mubr.f32.gmra.mrb[12].mxu0 %v8464_v33  ;;  %2952 = vmatmul.mubr.f32.gmra.mrb[12].mxu1 %v8464_v33  ;;  %v11845_v33 = vld [vmem:[#allocation33_spill] sm:$0xff] }
 0x130   : > { %1120 = vmatprep.mubr.f32.mxu0 %v11828_v3  ;;  %2957 = vmatprep.mubr.f32.mxu1 %v11828_v3 }
 0x133   : > { %1123 = vmatmul.mubr.f32.gmra.mrb[14].mxu0 %v8484_v45  ;;  %2960 = vmatmul.mubr.f32.gmra.mrb[14].mxu1 %v8484_v45  ;;  %v11846_v45 = vld [vmem:[#allocation35_spill] sm:$0xff] }
 0x134   : > { %1128 = vmatprep.mubr.f32.mxu0 %v11828_v3  ;;  %2965 = vmatprep.mubr.f32.mxu1 %v11828_v3 }
 0x137   : > { %1131 = vmatmul.mubr.f32.gmra.mrb[16].mxu0 %v8500_v63  ;;  %2968 = vmatmul.mubr.f32.gmra.mrb[16].mxu1 %v8500_v63  ;;  %v11847_v63 = vld [vmem:[#allocation37_spill] sm:$0xff] }
 0x138   : > { %1136 = vmatprep.mubr.f32.mxu0 %v11828_v3  ;;  %2973 = vmatprep.mubr.f32.mxu1 %v11828_v3 }
 0x13b   : > { %1139 = vmatmul.mubr.f32.gmra.mrb[18].mxu0 %v8518_v19  ;;  %2976 = vmatmul.mubr.f32.gmra.mrb[18].mxu1 %v8518_v19  ;;  %v11849_v19 = vand.u32 4294901760, %v8400_v55  ;;  %v11853_v55 = vld [vmem:[#allocation7_spill] sm:$0xff] }
 0x13c   : > { %1144 = vmatprep.mubr.f32.mxu0 %v11828_v3  ;;  %2981 = vmatprep.mubr.f32.mxu1 %v11828_v3 }
 0x13f   : > { %1147 = vmatmul.mubr.f32.gmra.mrb[20].mxu0 %v8535_v39  ;;  %2984 = vmatmul.mubr.f32.gmra.mrb[20].mxu1 %v8535_v39  ;;  %v11850_v39 = vand.u32 4294901760, %v8413_v59  ;;  %v11856_v59 = vld [vmem:[#allocation10_spill] sm:$0xff] }
 0x140   : > { %1152 = vmatprep.mubr.f32.mxu0 %v11828_v3  ;;  %2989 = vmatprep.mubr.f32.mxu1 %v11828_v3 }
 0x143   : > { %1155 = vmatmul.mubr.f32.gmra.mrb[22].mxu0 %v8550_v52  ;;  %2992 = vmatmul.mubr.f32.gmra.mrb[22].mxu1 %v8550_v52  ;;  %v11851_v52 = vld [vmem:[#allocation5_spill] sm:$0xff] }
 0x144   : > { %1160 = vmatprep.mubr.f32.mxu0 %v11828_v3  ;;  %2997 = vmatprep.mubr.f32.mxu1 %v11828_v3 }
 0x147   : > { %1163 = vmatmul.mubr.f32.gmra.mrb[24].mxu0 %v8559_v9  ;;  %3000 = vmatmul.mubr.f32.gmra.mrb[24].mxu1 %v8559_v9  ;;  %v11852_v9 = vld [vmem:[#allocation6_spill] sm:$0xff] }
 0x148   : > { %1168 = vmatprep.mubr.f32.mxu0 %v11828_v3  ;;  %3005 = vmatprep.mubr.f32.mxu1 %v11828_v3 }
 0x14b   : > { %1171 = vmatmul.mubr.f32.gmra.mrb[26].mxu0 %v11837_v21  ;;  %3008 = vmatmul.mubr.f32.gmra.mrb[26].mxu1 %v11837_v21  ;;  %v11867_v21 = vld [vmem:[#allocation27_spill] sm:$0xff] }
 0x14c   : > { %1176 = vmatprep.mubr.f32.mxu0 %v11828_v3  ;;  %3013 = vmatprep.mubr.f32.mxu1 %v11828_v3 }
 0x14f   : > { %1179 = vmatmul.mubr.f32.gmra.mrb[28].mxu0 %v11838_v25  ;;  %3016 = vmatmul.mubr.f32.gmra.mrb[28].mxu1 %v11838_v25  ;;  %v11868_v25 = vld [vmem:[#allocation28_spill] sm:$0xff] }
 0x150   : > { %1184 = vmatprep.mubr.f32.mxu0 %v11828_v3  ;;  %3021 = vmatprep.mubr.f32.mxu1 %v11828_v3 }
 0x153   : > { %1187 = vmatmul.mubr.f32.gmra.mrb[30].mxu0 %v11839_v29  ;;  %3024 = vmatmul.mubr.f32.gmra.mrb[30].mxu1 %v11839_v29  ;;  %v11869_v29 = vld [vmem:[#allocation30_spill] sm:$0xff] }
 0x154   : > { %1192 = vmatprep.mubr.f32.mxu0 %v11828_v3  ;;  %3029 = vmatprep.mubr.f32.mxu1 %v11828_v3 }
 0x157   : > { %1195 = vmatmul.mubr.f32.gmra.mrb[32].mxu0 %v11840_v43  ;;  %3032 = vmatmul.mubr.f32.gmra.mrb[32].mxu1 %v11840_v43  ;;  %v11870_v43 = vld [vmem:[#allocation32_spill] sm:$0xff] }
 0x158   : > { %1200 = vmatprep.mubr.f32.mxu0 %v11828_v3  ;;  %3037 = vmatprep.mubr.f32.mxu1 %v11828_v3 }
 0x15b   : > { %1203 = vmatmul.mubr.f32.gmra.mrb[34].mxu0 %v11841_v56  ;;  %3040 = vmatmul.mubr.f32.gmra.mrb[34].mxu1 %v11841_v56  ;;  %v11871_v56 = vld [vmem:[#allocation34_spill] sm:$0xff] }
 0x15c   : > { %1208 = vmatprep.mubr.f32.mxu0 %v11828_v3  ;;  %3045 = vmatprep.mubr.f32.mxu1 %v11828_v3 }
 0x15f   : > { %1211 = vmatmul.mubr.f32.gmra.mrb[36].mxu0 %v11842_v57  ;;  %3048 = vmatmul.mubr.f32.gmra.mrb[36].mxu1 %v11842_v57  ;;  %v11872_v57 = vld [vmem:[#allocation36_spill] sm:$0xff] }
 0x160   : > { %1216 = vmatprep.mubr.f32.mxu0 %v11828_v3  ;;  %3053 = vmatprep.mubr.f32.mxu1 %v11828_v3 }
 0x163   : > { %1219 = vmatmul.mubr.f32.gmra.mrb[38].mxu0 %v11843_v62  ;;  %3056 = vmatmul.mubr.f32.gmra.mrb[38].mxu1 %v11843_v62  ;;  %v11873_v62 = vld [vmem:[#allocation38_spill] sm:$0xff] }
 0x164   : > { %1224 = vmatprep.mubr.f32.mxu0 %v11828_v3  ;;  %3061 = vmatprep.mubr.f32.mxu1 %v11828_v3 }
 0x167   : > { %1227 = vmatmul.mubr.f32.gmra.mrb[40].mxu0 %v11844_v16  ;;  %3064 = vmatmul.mubr.f32.gmra.mrb[40].mxu1 %v11844_v16  ;;  %v11874_v16 = vld [vmem:[#allocation39_spill] sm:$0xff] }
 0x168   : > { %1232 = vmatprep.mubr.f32.mxu0 %v11828_v3  ;;  %3069 = vmatprep.mubr.f32.mxu1 %v11828_v3 }
 0x16b   : > { %1235 = vmatmul.mubr.f32.gmra.mrb[42].mxu0 %v11845_v33  ;;  %3072 = vmatmul.mubr.f32.gmra.mrb[42].mxu1 %v11845_v33  ;;  %v11875_v33 = vld [vmem:[#allocation40_spill] sm:$0xff] }
 0x16c   : > { %1240 = vmatprep.mubr.f32.mxu0 %v11828_v3  ;;  %3077 = vmatprep.mubr.f32.mxu1 %v11828_v3 }
 0x16f   : > { %1243 = vmatmul.mubr.f32.gmra.mrb[44].mxu0 %v11846_v45  ;;  %3080 = vmatmul.mubr.f32.gmra.mrb[44].mxu1 %v11846_v45  ;;  %v11876_v45 = vld [vmem:[#allocation41_spill] sm:$0xff] }
 0x170   : > { %1248 = vmatprep.mubr.f32.mxu0 %v11828_v3  ;;  %3085 = vmatprep.mubr.f32.mxu1 %v11828_v3 }
 0x173   : > { %1251 = vmatmul.mubr.f32.gmra.mrb[46].mxu0 %v11847_v63  ;;  %3088 = vmatmul.mubr.f32.gmra.mrb[46].mxu1 %v11847_v63 }
 0x174   : > { %1256 = vmatprep.mubr.f32.mxu0 %v11828_v3  ;;  %3093 = vmatprep.mubr.f32.mxu1 %v11828_v3 }
 0x177   : > { %1259 = vmatmul.mubr.f32.gmra.mrb[48].mxu0 %v8758_v2  ;;  %3096 = vmatmul.mubr.f32.gmra.mrb[48].mxu1 %v8758_v2  ;;  %v11857_v2 = vld [vmem:[#allocation11_spill] sm:$0xff] }
 0x178   : > { %1264 = vmatprep.mubr.f32.mxu0 %v11828_v3  ;;  %3101 = vmatprep.mubr.f32.mxu1 %v11828_v3 }
 0x17b   : > { %1267 = vmatmul.mubr.f32.gmra.mrb[50].mxu0 %v8767_v30  ;;  %3104 = vmatmul.mubr.f32.gmra.mrb[50].mxu1 %v8767_v30  ;;  %v11858_v30 = vld [vmem:[#allocation12_spill] sm:$0xff] }
 0x17c   : > { %1272 = vmatprep.mubr.f32.mxu0 %v11828_v3  ;;  %3109 = vmatprep.mubr.f32.mxu1 %v11828_v3 }
 0x17f   : > { %1275 = vmatmul.mubr.f32.gmra.mrb[52].mxu0 %v8788_v60  ;;  %3112 = vmatmul.mubr.f32.gmra.mrb[52].mxu1 %v8788_v60  ;;  %v11848_v60 = vld [vmem:[#allocation4_spill] sm:$0xff] }
 0x180   : > { %1280 = vmatprep.mubr.f32.mxu0 %v11828_v3  ;;  %3117 = vmatprep.mubr.f32.mxu1 %v11828_v3 }
 0x183   : > { %1283 = vmatmul.mubr.f32.gmra.mrb[54].mxu0 %v8801_v26  ;;  %3120 = vmatmul.mubr.f32.gmra.mrb[54].mxu1 %v8801_v26  ;;  %v11859_v26 = vld [vmem:[#allocation13_spill] sm:$0xff] }
 0x184   : > { %1288 = vmatprep.mubr.f32.mxu0 %v11828_v3  ;;  %3125 = vmatprep.mubr.f32.mxu1 %v11828_v3 }
 0x187   : > { %1291 = vmatmul.mubr.f32.gmra.mrb[56].mxu0 %v8813_v27  ;;  %3128 = vmatmul.mubr.f32.gmra.mrb[56].mxu1 %v8813_v27  ;;  %v11860_v27 = vld [vmem:[#allocation14_spill] sm:$0xff] }
 0x188   : > { %1363 = vmatprep.mubr.f32.mxu0 %v11828_v3  ;;  %3200 = vmatprep.mubr.f32.mxu1 %v11828_v3 }
 0x18b   : > { %1367 = vmatmul.mubr.f32.vlgmr.msra.gmra.mrb[0].mxu0 %v11848_v60  ;;  %3204 = vmatmul.mubr.f32.vlgmr.msra.gmra.mrb[0].mxu1 %v11848_v60 }
 0x18c   : > { %1372 = vmatprep.mubr.f32.mxu0 %v11828_v3  ;;  %3209 = vmatprep.mubr.f32.mxu1 %v11828_v3 }
 0x18d   : > { %1632 = vmatpush1.msra.mxu0 %v11849_v19  ;;  %3469 = vmatpush1.msra.mxu1 %v11850_v39  ;;  %v4239_v39 = vld [vmem:[%s11274_s2 + $0x8] sm:$0xff] }
 0x18e   : > { %1900 = vmatprep.subr.mxu0 %v8387_v49  ;;  %3737 = vmatprep.subr.mxu1 %v8389_v50  ;;  %v11854_v49 = vld [vmem:[#allocation8_spill] sm:$0xff]  ;;  %v11855_v50 = vld [vmem:[#allocation9_spill] sm:$0xff] }
 0x18f   : > { %1376 = vmatmul.mubr.f32.gmra.mrb[2].mxu0 %v11851_v52  ;;  %3213 = vmatmul.mubr.f32.gmra.mrb[2].mxu1 %v11851_v52 }
 0x190   : > { %1381 = vmatprep.mubr.f32.mxu0 %v11828_v3  ;;  %3218 = vmatprep.mubr.f32.mxu1 %v11828_v3 }
 0x193   : > { %1385 = vmatmul.mubr.f32.gmra.mrb[4].mxu0 %v11852_v9  ;;  %3222 = vmatmul.mubr.f32.gmra.mrb[4].mxu1 %v11852_v9 }
 0x194   : > { %1390 = vmatprep.mubr.f32.mxu0 %v11828_v3  ;;  %3227 = vmatprep.mubr.f32.mxu1 %v11828_v3 }
 0x197   : > { %1394 = vmatmul.mubr.f32.gmra.mrb[6].mxu0 %v11853_v55  ;;  %3231 = vmatmul.mubr.f32.gmra.mrb[6].mxu1 %v11853_v55 }
 0x198   : > { %1399 = vmatprep.mubr.f32.mxu0 %v11828_v3  ;;  %3236 = vmatprep.mubr.f32.mxu1 %v11828_v3 }
 0x19b   : > { %1403 = vmatmul.mubr.f32.gmra.mrb[8].mxu0 %v11854_v49  ;;  %3240 = vmatmul.mubr.f32.gmra.mrb[8].mxu1 %v11854_v49 }
 0x19c   : > { %1408 = vmatprep.mubr.f32.mxu0 %v11828_v3  ;;  %3245 = vmatprep.mubr.f32.mxu1 %v11828_v3 }
 0x19f   : > { %1412 = vmatmul.mubr.f32.gmra.mrb[10].mxu0 %v11855_v50  ;;  %3249 = vmatmul.mubr.f32.gmra.mrb[10].mxu1 %v11855_v50 }
 0x1a0   : > { %1417 = vmatprep.mubr.f32.mxu0 %v11828_v3  ;;  %3254 = vmatprep.mubr.f32.mxu1 %v11828_v3 }
 0x1a3   : > { %1421 = vmatmul.mubr.f32.gmra.mrb[12].mxu0 %v11856_v59  ;;  %3258 = vmatmul.mubr.f32.gmra.mrb[12].mxu1 %v11856_v59  ;;  %v9440_v59 = vsel %vm4240_vm3, %v4239_v39, 0 }
 0x1a4   : > { %1426 = vmatprep.mubr.f32.mxu0 %v11828_v3  ;;  %3263 = vmatprep.mubr.f32.mxu1 %v11828_v3 }
 0x1a7   : > { %1430 = vmatmul.mubr.f32.gmra.mrb[14].mxu0 %v11857_v2  ;;  %3267 = vmatmul.mubr.f32.gmra.mrb[14].mxu1 %v11857_v2 }
 0x1a8   : > { %1435 = vmatprep.mubr.f32.mxu0 %v11828_v3  ;;  %3272 = vmatprep.mubr.f32.mxu1 %v11828_v3 }
 0x1ab   : > { %1439 = vmatmul.mubr.f32.gmra.mrb[16].mxu0 %v11858_v30  ;;  %3276 = vmatmul.mubr.f32.gmra.mrb[16].mxu1 %v11858_v30 }
 0x1ac   : > { %1444 = vmatprep.mubr.f32.mxu0 %v11828_v3  ;;  %3281 = vmatprep.mubr.f32.mxu1 %v11828_v3 }
 0x1af   : > { %1448 = vmatmul.mubr.f32.gmra.mrb[18].mxu0 %v11859_v26  ;;  %3285 = vmatmul.mubr.f32.gmra.mrb[18].mxu1 %v11859_v26 }
 0x1b0   : > { %1453 = vmatprep.mubr.f32.mxu0 %v11828_v3  ;;  %3290 = vmatprep.mubr.f32.mxu1 %v11828_v3 }
 0x1b3   : > { %1457 = vmatmul.mubr.f32.gmra.mrb[20].mxu0 %v11860_v27  ;;  %3294 = vmatmul.mubr.f32.gmra.mrb[20].mxu1 %v11860_v27 }
 0x1b4   : > { %1462 = vmatprep.mubr.f32.mxu0 %v11828_v3  ;;  %3299 = vmatprep.mubr.f32.mxu1 %v11828_v3 }
 0x1b7   : > { %1466 = vmatmul.mubr.f32.gmra.mrb[22].mxu0 %v11861_v1  ;;  %3303 = vmatmul.mubr.f32.gmra.mrb[22].mxu1 %v11861_v1 }
 0x1b8   : > { %1471 = vmatprep.mubr.f32.mxu0 %v11828_v3  ;;  %3308 = vmatprep.mubr.f32.mxu1 %v11828_v3 }
 0x1bb   : > { %1475 = vmatmul.mubr.f32.gmra.mrb[24].mxu0 %v11862_v40  ;;  %3312 = vmatmul.mubr.f32.gmra.mrb[24].mxu1 %v11862_v40 }
 0x1bc   : > { %1480 = vmatprep.mubr.f32.mxu0 %v11828_v3  ;;  %3317 = vmatprep.mubr.f32.mxu1 %v11828_v3 }
 0x1bf   : > { %1484 = vmatmul.mubr.f32.gmra.mrb[26].mxu0 %v11863_v6  ;;  %3321 = vmatmul.mubr.f32.gmra.mrb[26].mxu1 %v11863_v6 }
 0x1c0   : > { %1489 = vmatprep.mubr.f32.mxu0 %v11828_v3  ;;  %3326 = vmatprep.mubr.f32.mxu1 %v11828_v3 }
 0x1c3   : > { %1493 = vmatmul.mubr.f32.gmra.mrb[28].mxu0 %v11864_v14  ;;  %3330 = vmatmul.mubr.f32.gmra.mrb[28].mxu1 %v11864_v14 }
 0x1c4   : > { %1498 = vmatprep.mubr.f32.mxu0 %v11828_v3  ;;  %3335 = vmatprep.mubr.f32.mxu1 %v11828_v3 }
 0x1c7   : > { %1502 = vmatmul.mubr.f32.gmra.mrb[30].mxu0 %v11865_v44  ;;  %3339 = vmatmul.mubr.f32.gmra.mrb[30].mxu1 %v11865_v44 }
 0x1c8   : > { %1507 = vmatprep.mubr.f32.mxu0 %v11828_v3  ;;  %3344 = vmatprep.mubr.f32.mxu1 %v11828_v3 }
 0x1cb   : > { %1511 = vmatmul.mubr.f32.gmra.mrb[32].mxu0 %v11866_v28  ;;  %3348 = vmatmul.mubr.f32.gmra.mrb[32].mxu1 %v11866_v28 }
 0x1cc   : > { %1516 = vmatprep.mubr.f32.mxu0 %v11828_v3  ;;  %3353 = vmatprep.mubr.f32.mxu1 %v11828_v3 }
 0x1cf   : > { %1520 = vmatmul.mubr.f32.gmra.mrb[34].mxu0 %v11867_v21  ;;  %3357 = vmatmul.mubr.f32.gmra.mrb[34].mxu1 %v11867_v21 }
 0x1d0   : > { %1525 = vmatprep.mubr.f32.mxu0 %v11828_v3  ;;  %3362 = vmatprep.mubr.f32.mxu1 %v11828_v3 }
 0x1d3   : > { %1529 = vmatmul.mubr.f32.gmra.mrb[36].mxu0 %v11868_v25  ;;  %3366 = vmatmul.mubr.f32.gmra.mrb[36].mxu1 %v11868_v25 }
 0x1d4   : > { %1534 = vmatprep.mubr.f32.mxu0 %v11828_v3  ;;  %3371 = vmatprep.mubr.f32.mxu1 %v11828_v3 }
 0x1d7   : > { %1538 = vmatmul.mubr.f32.gmra.mrb[38].mxu0 %v11869_v29  ;;  %3375 = vmatmul.mubr.f32.gmra.mrb[38].mxu1 %v11869_v29 }
 0x1d8   : > { %1543 = vmatprep.mubr.f32.mxu0 %v11828_v3  ;;  %3380 = vmatprep.mubr.f32.mxu1 %v11828_v3 }
 0x1db   : > { %1547 = vmatmul.mubr.f32.gmra.mrb[40].mxu0 %v11870_v43  ;;  %3384 = vmatmul.mubr.f32.gmra.mrb[40].mxu1 %v11870_v43 }
 0x1dc   : > { %1552 = vmatprep.mubr.f32.mxu0 %v11828_v3  ;;  %3389 = vmatprep.mubr.f32.mxu1 %v11828_v3 }
 0x1df   : > { %1556 = vmatmul.mubr.f32.gmra.mrb[42].mxu0 %v11871_v56  ;;  %3393 = vmatmul.mubr.f32.gmra.mrb[42].mxu1 %v11871_v56 }
 0x1e0   : > { %1561 = vmatprep.mubr.f32.mxu0 %v11828_v3  ;;  %3398 = vmatprep.mubr.f32.mxu1 %v11828_v3 }
 0x1e3   : > { %1565 = vmatmul.mubr.f32.gmra.mrb[44].mxu0 %v11872_v57  ;;  %3402 = vmatmul.mubr.f32.gmra.mrb[44].mxu1 %v11872_v57 }
 0x1e4   : > { %1570 = vmatprep.mubr.f32.mxu0 %v11828_v3  ;;  %3407 = vmatprep.mubr.f32.mxu1 %v11828_v3 }
 0x1e7   : > { %1574 = vmatmul.mubr.f32.gmra.mrb[46].mxu0 %v11873_v62  ;;  %3411 = vmatmul.mubr.f32.gmra.mrb[46].mxu1 %v11873_v62 }
 0x1e8   : > { %1579 = vmatprep.mubr.f32.mxu0 %v11828_v3  ;;  %3416 = vmatprep.mubr.f32.mxu1 %v11828_v3 }
 0x1eb   : > { %1583 = vmatmul.mubr.f32.gmra.mrb[48].mxu0 %v11874_v16  ;;  %3420 = vmatmul.mubr.f32.gmra.mrb[48].mxu1 %v11874_v16 }
 0x1ec   : > { %1588 = vmatprep.mubr.f32.mxu0 %v11828_v3  ;;  %3425 = vmatprep.mubr.f32.mxu1 %v11828_v3 }
 0x1ef   : > { %1592 = vmatmul.mubr.f32.gmra.mrb[50].mxu0 %v11875_v33  ;;  %3429 = vmatmul.mubr.f32.gmra.mrb[50].mxu1 %v11875_v33  ;;  %v9448_v33 = vand.u32 4294901760, %v9440_v59 }
 0x1f0   : > { %1597 = vmatprep.mubr.f32.mxu0 %v11828_v3  ;;  %3434 = vmatprep.mubr.f32.mxu1 %v11828_v3 }
 0x1f1   : > { %11880 = vst [vmem:[#allocation23_spill] sm:$0xff] %v9448_v33 }
 0x1f3   : > { %1601 = vmatmul.mubr.f32.gmra.mrb[52].mxu0 %v11876_v45  ;;  %3438 = vmatmul.mubr.f32.gmra.mrb[52].mxu1 %v11876_v45 }
 0x1f4   : > { %1606 = vmatprep.mubr.f32.mxu0 %v11828_v3  ;;  %3443 = vmatprep.mubr.f32.mxu1 %v11828_v3 }
 0x1f7   : > { %1610 = vmatmul.mubr.f32.gmra.mrb[54].mxu0 %v8810_v17  ;;  %3447 = vmatmul.mubr.f32.gmra.mrb[54].mxu1 %v8810_v17 }
 0x1f8   : > { %1615 = vmatprep.mubr.f32.mxu0 %v11828_v3  ;;  %3452 = vmatprep.mubr.f32.mxu1 %v11828_v3 }
 0x1fb   : > { %1619 = vmatmul.mubr.f32.gmra.mrb[56].mxu0 %v8820_v47  ;;  %3456 = vmatmul.mubr.f32.gmra.mrb[56].mxu1 %v8820_v47 }
 0x1fc   : > { %1695 = vmatprep.mubr.f32.mxu0 %v11828_v3  ;;  %3532 = vmatprep.mubr.f32.mxu1 %v11828_v3 }
 0x1ff   : > { %1697 = vmatmul.mubr.f32.vlgmr.msra.gmra.mrb[0].mxu0 %v8325_v13  ;;  %3534 = vmatmul.mubr.f32.vlgmr.msra.gmra.mrb[0].mxu1 %v8325_v13 }
 0x200   : > { %1702 = vmatprep.mubr.f32.mxu0 %v11828_v3  ;;  %3539 = vmatprep.mubr.f32.mxu1 %v11828_v3 }
 0x201   : > { %1902 = vmatpush1.msra.mxu0 %v8391_v51  ;;  %3739 = vmatpush1.msra.mxu1 %v8394_v53 }
 0x203   : > { %1704 = vmatmul.mubr.f32.gmra.mrb[2].mxu0 %v8331_v18  ;;  %3541 = vmatmul.mubr.f32.gmra.mrb[2].mxu1 %v8331_v18 }
 0x204   : > { %1709 = vmatprep.mubr.f32.mxu0 %v11828_v3  ;;  %3546 = vmatprep.mubr.f32.mxu1 %v11828_v3 }
 0x207   : > { %1711 = vmatmul.mubr.f32.gmra.mrb[4].mxu0 %v8342_v24  ;;  %3548 = vmatmul.mubr.f32.gmra.mrb[4].mxu1 %v8342_v24 }
 0x208   : > { %1716 = vmatprep.mubr.f32.mxu0 %v11828_v3  ;;  %3553 = vmatprep.mubr.f32.mxu1 %v11828_v3 }
 0x20b   : > { %1718 = vmatmul.mubr.f32.gmra.mrb[6].mxu0 %v8362_v31  ;;  %3555 = vmatmul.mubr.f32.gmra.mrb[6].mxu1 %v8362_v31 }
 0x20c   : > { %1723 = vmatprep.mubr.f32.mxu0 %v11828_v3  ;;  %3560 = vmatprep.mubr.f32.mxu1 %v11828_v3 }
 0x20f   : > { %1725 = vmatmul.mubr.f32.gmra.mrb[8].mxu0 %v8373_v36  ;;  %3562 = vmatmul.mubr.f32.gmra.mrb[8].mxu1 %v8373_v36 }
 0x210   : > { %1730 = vmatprep.mubr.f32.mxu0 %v11828_v3  ;;  %3567 = vmatprep.mubr.f32.mxu1 %v11828_v3 }
 0x213   : > { %1732 = vmatmul.mubr.f32.gmra.mrb[10].mxu0 %v8408_v58  ;;  %3569 = vmatmul.mubr.f32.gmra.mrb[10].mxu1 %v8408_v58 }
 0x214   : > { %1737 = vmatprep.mubr.f32.mxu0 %v11828_v3  ;;  %3574 = vmatprep.mubr.f32.mxu1 %v11828_v3 }
 0x217   : > { %1739 = vmatmul.mubr.f32.gmra.mrb[12].mxu0 %v8438_v10  ;;  %3576 = vmatmul.mubr.f32.gmra.mrb[12].mxu1 %v8438_v10 }
 0x218   : > { %1744 = vmatprep.mubr.f32.mxu0 %v11828_v3  ;;  %3581 = vmatprep.mubr.f32.mxu1 %v11828_v3 }
 0x21b   : > { %1746 = vmatmul.mubr.f32.gmra.mrb[14].mxu0 %v8468_v38  ;;  %3583 = vmatmul.mubr.f32.gmra.mrb[14].mxu1 %v8468_v38 }
 0x21c   : > { %1751 = vmatprep.mubr.f32.mxu0 %v11828_v3  ;;  %3588 = vmatprep.mubr.f32.mxu1 %v11828_v3 }
 0x21f   : > { %1753 = vmatmul.mubr.f32.gmra.mrb[16].mxu0 %v8486_v46  ;;  %3590 = vmatmul.mubr.f32.gmra.mrb[16].mxu1 %v8486_v46 }
 0x220   : > { %1758 = vmatprep.mubr.f32.mxu0 %v11828_v3  ;;  %3595 = vmatprep.mubr.f32.mxu1 %v11828_v3 }
 0x223   : > { %1760 = vmatmul.mubr.f32.gmra.mrb[18].mxu0 %v8502_v7  ;;  %3597 = vmatmul.mubr.f32.gmra.mrb[18].mxu1 %v8502_v7 }
 0x224   : > { %1765 = vmatprep.mubr.f32.mxu0 %v11828_v3  ;;  %3602 = vmatprep.mubr.f32.mxu1 %v11828_v3 }
 0x227   : > { %1767 = vmatmul.mubr.f32.gmra.mrb[20].mxu0 %v8510_v12  ;;  %3604 = vmatmul.mubr.f32.gmra.mrb[20].mxu1 %v8510_v12 }
 0x228   : > { %1772 = vmatprep.mubr.f32.mxu0 %v11828_v3  ;;  %3609 = vmatprep.mubr.f32.mxu1 %v11828_v3 }
 0x22b   : > { %1774 = vmatmul.mubr.f32.gmra.mrb[22].mxu0 %v8526_v23  ;;  %3611 = vmatmul.mubr.f32.gmra.mrb[22].mxu1 %v8526_v23 }
 0x22c   : > { %1779 = vmatprep.mubr.f32.mxu0 %v11828_v3  ;;  %3616 = vmatprep.mubr.f32.mxu1 %v11828_v3 }
 0x22f   : > { %1781 = vmatmul.mubr.f32.gmra.mrb[24].mxu0 %v8542_v41  ;;  %3618 = vmatmul.mubr.f32.gmra.mrb[24].mxu1 %v8542_v41 }
 0x230   : > { %1786 = vmatprep.mubr.f32.mxu0 %v11828_v3  ;;  %3623 = vmatprep.mubr.f32.mxu1 %v11828_v3 }
 0x233   : > { %1788 = vmatmul.mubr.f32.gmra.mrb[26].mxu0 %v8566_v22  ;;  %3625 = vmatmul.mubr.f32.gmra.mrb[26].mxu1 %v8566_v22 }
 0x234   : > { %1793 = vmatprep.mubr.f32.mxu0 %v11828_v3  ;;  %3630 = vmatprep.mubr.f32.mxu1 %v11828_v3 }
 0x237   : > { %1795 = vmatmul.mubr.f32.gmra.mrb[28].mxu0 %v8582_v0  ;;  %3632 = vmatmul.mubr.f32.gmra.mrb[28].mxu1 %v8582_v0 }
 0x238   : > { %1800 = vmatprep.mubr.f32.mxu0 %v11828_v3  ;;  %3637 = vmatprep.mubr.f32.mxu1 %v11828_v3 }
 0x23b   : > { %1802 = vmatmul.mubr.f32.gmra.mrb[30].mxu0 %v8598_v4  ;;  %3639 = vmatmul.mubr.f32.gmra.mrb[30].mxu1 %v8598_v4 }
 0x23c   : > { %1807 = vmatprep.mubr.f32.mxu0 %v11828_v3  ;;  %3644 = vmatprep.mubr.f32.mxu1 %v11828_v3 }
 0x23f   : > { %1809 = vmatmul.mubr.f32.gmra.mrb[32].mxu0 %v8615_v20  ;;  %3646 = vmatmul.mubr.f32.gmra.mrb[32].mxu1 %v8615_v20 }
 0x240   : > { %1814 = vmatprep.mubr.f32.mxu0 %v11828_v3  ;;  %3651 = vmatprep.mubr.f32.mxu1 %v11828_v3 }
 0x243   : > { %1816 = vmatmul.mubr.f32.gmra.mrb[34].mxu0 %v8622_v11  ;;  %3653 = vmatmul.mubr.f32.gmra.mrb[34].mxu1 %v8622_v11 }
 0x244   : > { %1821 = vmatprep.mubr.f32.mxu0 %v11828_v3  ;;  %3658 = vmatprep.mubr.f32.mxu1 %v11828_v3 }
 0x247   : > { %1823 = vmatmul.mubr.f32.gmra.mrb[36].mxu0 %v8638_v37  ;;  %3660 = vmatmul.mubr.f32.gmra.mrb[36].mxu1 %v8638_v37 }
 0x248   : > { %1828 = vmatprep.mubr.f32.mxu0 %v11828_v3  ;;  %3665 = vmatprep.mubr.f32.mxu1 %v11828_v3 }
 0x24b   : > { %1830 = vmatmul.mubr.f32.gmra.mrb[38].mxu0 %v8662_v42  ;;  %3667 = vmatmul.mubr.f32.gmra.mrb[38].mxu1 %v8662_v42 }
 0x24c   : > { %1835 = vmatprep.mubr.f32.mxu0 %v11828_v3  ;;  %3672 = vmatprep.mubr.f32.mxu1 %v11828_v3 }
 0x24f   : > { %1837 = vmatmul.mubr.f32.gmra.mrb[40].mxu0 %v8678_v15  ;;  %3674 = vmatmul.mubr.f32.gmra.mrb[40].mxu1 %v8678_v15 }
 0x250   : > { %1842 = vmatprep.mubr.f32.mxu0 %v11828_v3  ;;  %3679 = vmatprep.mubr.f32.mxu1 %v11828_v3 }
 0x253   : > { %1844 = vmatmul.mubr.f32.gmra.mrb[42].mxu0 %v8694_v35  ;;  %3681 = vmatmul.mubr.f32.gmra.mrb[42].mxu1 %v8694_v35 }
 0x254   : > { %1849 = vmatprep.mubr.f32.mxu0 %v11828_v3  ;;  %3686 = vmatprep.mubr.f32.mxu1 %v11828_v3 }
 0x257   : > { %1851 = vmatmul.mubr.f32.gmra.mrb[44].mxu0 %v8711_v8  ;;  %3688 = vmatmul.mubr.f32.gmra.mrb[44].mxu1 %v8711_v8 }
 0x258   : > { %1856 = vmatprep.mubr.f32.mxu0 %v11828_v3  ;;  %3693 = vmatprep.mubr.f32.mxu1 %v11828_v3 }
 0x25b   : > { %1858 = vmatmul.mubr.f32.gmra.mrb[46].mxu0 %v8718_v54  ;;  %3695 = vmatmul.mubr.f32.gmra.mrb[46].mxu1 %v8718_v54 }
 0x25c   : > { %1863 = vmatprep.mubr.f32.mxu0 %v11828_v3  ;;  %3700 = vmatprep.mubr.f32.mxu1 %v11828_v3 }
 0x25f   : > { %1865 = vmatmul.mubr.f32.gmra.mrb[48].mxu0 %v8734_v61  ;;  %3702 = vmatmul.mubr.f32.gmra.mrb[48].mxu1 %v8734_v61 }
 0x260   : > { %1870 = vmatprep.mubr.f32.mxu0 %v11828_v3  ;;  %3707 = vmatprep.mubr.f32.mxu1 %v11828_v3 }
 0x263   : > { %1872 = vmatmul.mubr.f32.gmra.mrb[50].mxu0 %v8750_v48  ;;  %3709 = vmatmul.mubr.f32.gmra.mrb[50].mxu1 %v8750_v48 }
 0x264   : > { %1877 = vmatprep.mubr.f32.mxu0 %v11828_v3  ;;  %3714 = vmatprep.mubr.f32.mxu1 %v11828_v3 }
 0x267   : > { %1879 = vmatmul.mubr.f32.gmra.mrb[52].mxu0 %v8774_v34  ;;  %3716 = vmatmul.mubr.f32.gmra.mrb[52].mxu1 %v8774_v34 }
 0x268   : > { %1884 = vmatprep.mubr.f32.mxu0 %v11828_v3  ;;  %3721 = vmatprep.mubr.f32.mxu1 %v11828_v3 }
 0x26b   : > { %1886 = vmatmul.mubr.f32.gmra.mrb[54].mxu0 %v8790_v5  ;;  %3723 = vmatmul.mubr.f32.gmra.mrb[54].mxu1 %v8790_v5 }
 0x26c   : > { %1891 = vmatprep.mubr.f32.mxu0 %v11828_v3  ;;  %3728 = vmatprep.mubr.f32.mxu1 %v11828_v3 }
 0x26f   : > { %1893 = vmatmul.mubr.f32.gmra.mrb[56].mxu0 %v8803_v32  ;;  %3730 = vmatmul.mubr.f32.gmra.mrb[56].mxu1 %v8803_v32 }
 0x270   : > { %1965 = vmatprep.mubr.f32.mxu0 %v11828_v3  ;;  %3802 = vmatprep.mubr.f32.mxu1 %v11828_v3 }
 0x273   : > { %1967 = vmatmul.mubr.f32.vlgmr.msra.gmra.mrb[0].mxu0 %v8325_v13  ;;  %3804 = vmatmul.mubr.f32.vlgmr.msra.gmra.mrb[0].mxu1 %v8325_v13 }
 0x274   : > { %1972 = vmatprep.mubr.f32.mxu0 %v11828_v3  ;;  %3809 = vmatprep.mubr.f32.mxu1 %v11828_v3 }
 0x277   : > { %1974 = vmatmul.mubr.f32.gmra.mrb[2].mxu0 %v8331_v18  ;;  %3811 = vmatmul.mubr.f32.gmra.mrb[2].mxu1 %v8331_v18 }
 0x278   : > { %1979 = vmatprep.mubr.f32.mxu0 %v11828_v3  ;;  %3816 = vmatprep.mubr.f32.mxu1 %v11828_v3 }
 0x27b   : > { %1981 = vmatmul.mubr.f32.gmra.mrb[4].mxu0 %v8342_v24  ;;  %3818 = vmatmul.mubr.f32.gmra.mrb[4].mxu1 %v8342_v24 }
 0x27c   : > { %1986 = vmatprep.mubr.f32.mxu0 %v11828_v3  ;;  %3823 = vmatprep.mubr.f32.mxu1 %v11828_v3 }
 0x27f   : > { %1988 = vmatmul.mubr.f32.gmra.mrb[6].mxu0 %v8362_v31  ;;  %3825 = vmatmul.mubr.f32.gmra.mrb[6].mxu1 %v8362_v31 }
 0x280   : > { %1993 = vmatprep.mubr.f32.mxu0 %v11828_v3  ;;  %3830 = vmatprep.mubr.f32.mxu1 %v11828_v3 }
 0x283   : > { %1995 = vmatmul.mubr.f32.gmra.mrb[8].mxu0 %v8373_v36  ;;  %3832 = vmatmul.mubr.f32.gmra.mrb[8].mxu1 %v8373_v36 }
 0x284   : > { %2000 = vmatprep.mubr.f32.mxu0 %v11828_v3  ;;  %3837 = vmatprep.mubr.f32.mxu1 %v11828_v3 }
 0x287   : > { %2002 = vmatmul.mubr.f32.gmra.mrb[10].mxu0 %v8408_v58  ;;  %3839 = vmatmul.mubr.f32.gmra.mrb[10].mxu1 %v8408_v58 }
 0x288   : > { %2007 = vmatprep.mubr.f32.mxu0 %v11828_v3  ;;  %3844 = vmatprep.mubr.f32.mxu1 %v11828_v3 }
 0x28b   : > { %2009 = vmatmul.mubr.f32.gmra.mrb[12].mxu0 %v8438_v10  ;;  %3846 = vmatmul.mubr.f32.gmra.mrb[12].mxu1 %v8438_v10 }
 0x28c   : > { %2014 = vmatprep.mubr.f32.mxu0 %v11828_v3  ;;  %3851 = vmatprep.mubr.f32.mxu1 %v11828_v3 }
 0x28f   : > { %2016 = vmatmul.mubr.f32.gmra.mrb[14].mxu0 %v8468_v38  ;;  %3853 = vmatmul.mubr.f32.gmra.mrb[14].mxu1 %v8468_v38 }
 0x290   : > { %2021 = vmatprep.mubr.f32.mxu0 %v11828_v3  ;;  %3858 = vmatprep.mubr.f32.mxu1 %v11828_v3 }
 0x293   : > { %2023 = vmatmul.mubr.f32.gmra.mrb[16].mxu0 %v8486_v46  ;;  %3860 = vmatmul.mubr.f32.gmra.mrb[16].mxu1 %v8486_v46 }
 0x294   : > { %2028 = vmatprep.mubr.f32.mxu0 %v11828_v3  ;;  %3865 = vmatprep.mubr.f32.mxu1 %v11828_v3 }
 0x297   : > { %2030 = vmatmul.mubr.f32.gmra.mrb[18].mxu0 %v8502_v7  ;;  %3867 = vmatmul.mubr.f32.gmra.mrb[18].mxu1 %v8502_v7 }
 0x298   : > { %2035 = vmatprep.mubr.f32.mxu0 %v11828_v3  ;;  %3872 = vmatprep.mubr.f32.mxu1 %v11828_v3 }
 0x29b   : > { %2037 = vmatmul.mubr.f32.gmra.mrb[20].mxu0 %v8510_v12  ;;  %3874 = vmatmul.mubr.f32.gmra.mrb[20].mxu1 %v8510_v12 }
 0x29c   : > { %2042 = vmatprep.mubr.f32.mxu0 %v11828_v3  ;;  %3879 = vmatprep.mubr.f32.mxu1 %v11828_v3 }
 0x29f   : > { %2044 = vmatmul.mubr.f32.gmra.mrb[22].mxu0 %v8526_v23  ;;  %3881 = vmatmul.mubr.f32.gmra.mrb[22].mxu1 %v8526_v23 }
 0x2a0   : > { %2049 = vmatprep.mubr.f32.mxu0 %v11828_v3  ;;  %3886 = vmatprep.mubr.f32.mxu1 %v11828_v3 }
 0x2a3   : > { %2051 = vmatmul.mubr.f32.gmra.mrb[24].mxu0 %v8542_v41  ;;  %3888 = vmatmul.mubr.f32.gmra.mrb[24].mxu1 %v8542_v41 }
 0x2a4   : > { %2056 = vmatprep.mubr.f32.mxu0 %v11828_v3  ;;  %3893 = vmatprep.mubr.f32.mxu1 %v11828_v3 }
 0x2a7   : > { %2058 = vmatmul.mubr.f32.gmra.mrb[26].mxu0 %v8566_v22  ;;  %3895 = vmatmul.mubr.f32.gmra.mrb[26].mxu1 %v8566_v22 }
 0x2a8   : > { %2063 = vmatprep.mubr.f32.mxu0 %v11828_v3  ;;  %3900 = vmatprep.mubr.f32.mxu1 %v11828_v3 }
 0x2ab   : > { %2065 = vmatmul.mubr.f32.gmra.mrb[28].mxu0 %v8582_v0  ;;  %3902 = vmatmul.mubr.f32.gmra.mrb[28].mxu1 %v8582_v0 }
 0x2ac   : > { %2070 = vmatprep.mubr.f32.mxu0 %v11828_v3  ;;  %3907 = vmatprep.mubr.f32.mxu1 %v11828_v3 }
 0x2af   : > { %2072 = vmatmul.mubr.f32.gmra.mrb[30].mxu0 %v8598_v4  ;;  %3909 = vmatmul.mubr.f32.gmra.mrb[30].mxu1 %v8598_v4 }
 0x2b0   : > { %2077 = vmatprep.mubr.f32.mxu0 %v11828_v3  ;;  %3914 = vmatprep.mubr.f32.mxu1 %v11828_v3 }
 0x2b3   : > { %2079 = vmatmul.mubr.f32.gmra.mrb[32].mxu0 %v8615_v20  ;;  %3916 = vmatmul.mubr.f32.gmra.mrb[32].mxu1 %v8615_v20 }
 0x2b4   : > { %2084 = vmatprep.mubr.f32.mxu0 %v11828_v3  ;;  %3921 = vmatprep.mubr.f32.mxu1 %v11828_v3 }
 0x2b7   : > { %2086 = vmatmul.mubr.f32.gmra.mrb[34].mxu0 %v8622_v11  ;;  %3923 = vmatmul.mubr.f32.gmra.mrb[34].mxu1 %v8622_v11 }
 0x2b8   : > { %2091 = vmatprep.mubr.f32.mxu0 %v11828_v3  ;;  %3928 = vmatprep.mubr.f32.mxu1 %v11828_v3 }
 0x2bb   : > { %2093 = vmatmul.mubr.f32.gmra.mrb[36].mxu0 %v8638_v37  ;;  %3930 = vmatmul.mubr.f32.gmra.mrb[36].mxu1 %v8638_v37 }
 0x2bc   : > { %2098 = vmatprep.mubr.f32.mxu0 %v11828_v3  ;;  %3935 = vmatprep.mubr.f32.mxu1 %v11828_v3 }
 0x2bf   : > { %2100 = vmatmul.mubr.f32.gmra.mrb[38].mxu0 %v8662_v42  ;;  %3937 = vmatmul.mubr.f32.gmra.mrb[38].mxu1 %v8662_v42 }
 0x2c0   : > { %2105 = vmatprep.mubr.f32.mxu0 %v11828_v3  ;;  %3942 = vmatprep.mubr.f32.mxu1 %v11828_v3 }
 0x2c3   : > { %2107 = vmatmul.mubr.f32.gmra.mrb[40].mxu0 %v8678_v15  ;;  %3944 = vmatmul.mubr.f32.gmra.mrb[40].mxu1 %v8678_v15 }
 0x2c4   : > { %2112 = vmatprep.mubr.f32.mxu0 %v11828_v3  ;;  %3949 = vmatprep.mubr.f32.mxu1 %v11828_v3 }
 0x2c7   : > { %2114 = vmatmul.mubr.f32.gmra.mrb[42].mxu0 %v8694_v35  ;;  %3951 = vmatmul.mubr.f32.gmra.mrb[42].mxu1 %v8694_v35 }
 0x2c8   : > { %2119 = vmatprep.mubr.f32.mxu0 %v11828_v3  ;;  %3956 = vmatprep.mubr.f32.mxu1 %v11828_v3 }
 0x2cb   : > { %2121 = vmatmul.mubr.f32.gmra.mrb[44].mxu0 %v8711_v8  ;;  %3958 = vmatmul.mubr.f32.gmra.mrb[44].mxu1 %v8711_v8 }
 0x2cc   : > { %2126 = vmatprep.mubr.f32.mxu0 %v11828_v3  ;;  %3963 = vmatprep.mubr.f32.mxu1 %v11828_v3 }
 0x2cf   : > { %2128 = vmatmul.mubr.f32.gmra.mrb[46].mxu0 %v8718_v54  ;;  %3965 = vmatmul.mubr.f32.gmra.mrb[46].mxu1 %v8718_v54 }
 0x2d0   : > { %2133 = vmatprep.mubr.f32.mxu0 %v11828_v3  ;;  %3970 = vmatprep.mubr.f32.mxu1 %v11828_v3 }
 0x2d3   : > { %2135 = vmatmul.mubr.f32.gmra.mrb[48].mxu0 %v8734_v61  ;;  %3972 = vmatmul.mubr.f32.gmra.mrb[48].mxu1 %v8734_v61 }
 0x2d4   : > { %2140 = vmatprep.mubr.f32.mxu0 %v11828_v3  ;;  %3977 = vmatprep.mubr.f32.mxu1 %v11828_v3 }
 0x2d7   : > { %2142 = vmatmul.mubr.f32.gmra.mrb[50].mxu0 %v8750_v48  ;;  %3979 = vmatmul.mubr.f32.gmra.mrb[50].mxu1 %v8750_v48 }
 0x2d8   : > { %2147 = vmatprep.mubr.f32.mxu0 %v11828_v3  ;;  %3984 = vmatprep.mubr.f32.mxu1 %v11828_v3 }
 0x2db   : > { %2149 = vmatmul.mubr.f32.gmra.mrb[52].mxu0 %v8774_v34  ;;  %3986 = vmatmul.mubr.f32.gmra.mrb[52].mxu1 %v8774_v34 }
 0x2dc   : > { %2154 = vmatprep.mubr.f32.mxu0 %v11828_v3  ;;  %3991 = vmatprep.mubr.f32.mxu1 %v11828_v3 }
 0x2df   : > { %2156 = vmatmul.mubr.f32.gmra.mrb[54].mxu0 %v8790_v5  ;;  %3993 = vmatmul.mubr.f32.gmra.mrb[54].mxu1 %v8790_v5 }
 0x2e0   : > { %2161 = vmatprep.mubr.f32.mxu0 %v11828_v3  ;;  %3998 = vmatprep.mubr.f32.mxu1 %v11828_v3 }
 0x2e3   : > { %2163 = vmatmul.mubr.f32.gmra.mrb[56].mxu0 %v8803_v32  ;;  %4000 = vmatmul.mubr.f32.gmra.mrb[56].mxu1 %v8803_v32 }
 0x346   : > { %v1968_v0 = vpop.f32.mrb[0].mxu0  ;;  %v3805_v13 = vpop.f32.mrb[0].mxu1 }
 0x347   : > { %v4006_v18 = vmul.f32 1.442695, %v1968_v0  ;;  %v4010_v24 = vmul.f32 1.442695, %v3805_v13  ;;  %v1970_v31 = vpop.f32.mrb[1].mxu0  ;;  %v3807_v35 = vpop.f32.mrb[1].mxu1 }
 0x348   : > { %v4008_v36 = vmul.f32 1.442695, %v1970_v31  ;;  %v4012_v51 = vmul.f32 1.442695, %v3807_v35 }
 0x349   : > { %8030 = vpow2.f32 %v4006_v18 }
 0x34a   : > { %8032 = vpow2.f32 %v4010_v24  ;;  %v1975_v53 = vpop.f32.mrb[2].mxu0  ;;  %v3812_v58 = vpop.f32.mrb[2].mxu1 }
 0x34b   : > { %8034 = vpow2.f32 %v4008_v36  ;;  %v4014_v4 = vmul.f32 1.442695, %v1975_v53  ;;  %v4018_v5 = vmul.f32 1.442695, %v3812_v58  ;;  %v1977_v10 = vpop.f32.mrb[3].mxu0  ;;  %v3814_v15 = vpop.f32.mrb[3].mxu1 }
 0x34c   : > { %8036 = vpow2.f32 %v4012_v51  ;;  %v4016_v38 = vmul.f32 1.442695, %v1977_v10  ;;  %v4020_v32 = vmul.f32 1.442695, %v3814_v15 }
 0x34d   : > { %8038 = vpow2.f32 %v4014_v4 }
 0x34e   : > { %8040 = vpow2.f32 %v4018_v5  ;;  %v1982_v42 = vpop.f32.mrb[4].mxu0  ;;  %v3819_v46 = vpop.f32.mrb[4].mxu1 }
 0x34f   : > { %8042 = vpow2.f32 %v4016_v38  ;;  %v4022_v7 = vmul.f32 1.442695, %v1982_v42  ;;  %v4026_v12 = vmul.f32 1.442695, %v3819_v46  ;;  %v1984_v23 = vpop.f32.mrb[5].mxu0  ;;  %v3821_v37 = vpop.f32.mrb[5].mxu1 }
 0x350   : > { %8044 = vpow2.f32 %v4020_v32  ;;  %v4024_v41 = vmul.f32 1.442695, %v1984_v23  ;;  %v4028_v48 = vmul.f32 1.442695, %v3821_v37 }
 0x351   : > { %8046 = vpow2.f32 %v4022_v7 }
 0x352   : > { %8048 = vpow2.f32 %v4026_v12  ;;  %v1989_v20 = vpop.f32.mrb[6].mxu0  ;;  %v3826_v22 = vpop.f32.mrb[6].mxu1 }
 0x353   : > { %v9428_v34 = vpop.eup %8030  ;;  %8050 = vpow2.f32 %v4024_v41  ;;  %v4030_v11 = vmul.f32 1.442695, %v1989_v20  ;;  %v4034_v3 = vmul.f32 1.442695, %v3826_v22  ;;  %v1991_v8 = vpop.f32.mrb[7].mxu0 }
 0x354   : > { %v3828_v54 = vpop.f32.mrb[7].mxu1  ;;  %v9430_v61 = vpop.eup %8032  ;;  %8052 = vpow2.f32 %v4028_v48  ;;  %v4032_v17 = vmul.f32 1.442695, %v1991_v8  ;;  %v4246_v63 = vand.u32 4294901760, %v9428_v34 }
 0x355   : > { %v4036_v47 = vmul.f32 1.442695, %v3828_v54  ;;  %v8035_v60 = vpop.eup %8034  ;;  %8054 = vpow2.f32 %v4030_v11  ;;  %v5452_v19 = vand.u32 4294901760, %v9430_v61 }
 0x356   : > { %v8037_v52 = vpop.eup %8036  ;;  %8056 = vpow2.f32 %v4034_v3  ;;  %v1996_v9 = vpop.f32.mrb[8].mxu0  ;;  %v4244_v49 = vand.u32 4294901760, %v8035_v60  ;;  %v9438_v50 = vsub.f32 %v9428_v34, %v4246_v63 }
 0x357   : > { %v3833_v55 = vpop.f32.mrb[8].mxu1  ;;  %v8039_v2 = vpop.eup %8038  ;;  %8058 = vpow2.f32 %v4032_v17  ;;  %v4038_v30 = vmul.f32 1.442695, %v1996_v9  ;;  %v9443_v40 = vsub.f32 %v9430_v61, %v5452_v19  ;;  %v5450_v25 = vand.u32 4294901760, %v8037_v52 }
 0x358   : > { %11877 = vst [vmem:[#allocation17_spill] sm:$0xff] %v9438_v50  ;;  %v4042_v26 = vmul.f32 1.442695, %v3833_v55  ;;  %v1998_v27 = vpop.f32.mrb[9].mxu0  ;;  %v3835_v1 = vpop.f32.mrb[9].mxu1  ;;  %8060 = vpow2.f32 %v4036_v47  ;;  %v9445_v28 = vsub.f32 %v8035_v60, %v4244_v49  ;;  %v4250_v29 = vand.u32 4294901760, %v8039_v2 }
 0x359   : > { %11878 = vst [vmem:[#allocation19_spill] sm:$0xff] %v9443_v40  ;;  %v8041_v6 = vpop.eup %8040  ;;  %v4040_v14 = vmul.f32 1.442695, %v1998_v27  ;;  %v4044_v44 = vmul.f32 1.442695, %v3835_v1  ;;  %8062 = vpow2.f32 %v4038_v30  ;;  %v9453_v35 = vsub.f32 %v8037_v52, %v5450_v25 }
 0x35a   : > { %11879 = vst [vmem:[#allocation21_spill] sm:$0xff] %v9445_v28  ;;  %v8043_v21 = vpop.eup %8042  ;;  %v5456_v43 = vand.u32 4294901760, %v8041_v6  ;;  %8064 = vpow2.f32 %v4042_v26  ;;  %v2003_v57 = vpop.f32.mrb[10].mxu0  ;;  %v9461_v15 = vpack.c.bf16 %v4250_v29, %v4246_v63  ;;  %v9466_v46 = vsub.f32 %v8039_v2, %v4250_v29 }
 0x35b   : > { %v8045_v56 = vpop.eup %8044  ;;  %v3840_v62 = vpop.f32.mrb[10].mxu1  ;;  %v4248_v16 = vand.u32 4294901760, %v8043_v21  ;;  %8066 = vpow2.f32 %v4040_v14  ;;  %v4046_v13 = vmul.f32 1.442695, %v2003_v57  ;;  %11881 = vst [vmem:[#allocation25_spill] sm:$0xff] %v9453_v35 }
 0x35c   : > { %v9451_v0 = vpop.eup %8046  ;;  %v4050_v18 = vmul.f32 1.442695, %v3840_v62  ;;  %v2005_v24 = vpop.f32.mrb[11].mxu0  ;;  %8068 = vpow2.f32 %v4044_v44  ;;  %v5454_v10 = vand.u32 4294901760, %v8045_v56  ;;  %11884 = vst [vmem:[#allocation31_spill] sm:$0xff] %v9461_v15  ;;  %11885 = vst [vmem:[#allocation33_spill] sm:$0xff] %v9466_v46  ;;  %v9468_v7 = vpack.c.bf16 %v5456_v43, %v5452_v19 }
 0x35d   : > { %v3842_v31 = vpop.f32.mrb[11].mxu1  ;;  %v9455_v36 = vpop.eup %8048  ;;  %v4048_v51 = vmul.f32 1.442695, %v2005_v24  ;;  %v9457_v58 = vpack.c.bf16 %v4248_v16, %v4244_v49  ;;  %8070 = vpow2.f32 %v4046_v13  ;;  %v9459_v5 = vsub.f32 %v8043_v21, %v4248_v16 }
 0x35e   : > { %v4052_v53 = vmul.f32 1.442695, %v3842_v31  ;;  %v8051_v4 = vpop.eup %8050  ;;  %8072 = vpow2.f32 %v4050_v18  ;;  %v2010_v32 = vpop.f32.mrb[12].mxu0  ;;  %11886 = vst [vmem:[#allocation35_spill] sm:$0xff] %v9468_v7  ;;  %v9470_v12 = vsub.f32 %v8041_v6, %v5456_v43  ;;  %v9472_v37 = vpack.c.bf16 %v5454_v10, %v5450_v25 }
 0x35f   : > { %11882 = vst [vmem:[#allocation26_spill] sm:$0xff] %v9457_v58  ;;  %11883 = vst [vmem:[#allocation29_spill] sm:$0xff] %v9459_v5  ;;  %v9463_v38 = vpop.eup %8052  ;;  %6748 = vmatprep.subr.bf16.mxu0 %v9457_v58  ;;  %v3847_v42 = vpop.f32.mrb[12].mxu1  ;;  %8074 = vpow2.f32 %v4048_v51  ;;  %v9474_v41 = vsub.f32 %v8045_v56, %v5454_v10  ;;  %v4054_v48 = vmul.f32 1.442695, %v2010_v32  ;;  %v4252_v61 = vand.u32 4294901760, %v8051_v4 }
 0x360   : > { %11887 = vst [vmem:[#allocation37_spill] sm:$0xff] %v9470_v12  ;;  %v8055_v23 = vpop.eup %8054  ;;  %11888 = vst [vmem:[#allocation4_spill] sm:$0xff] %v9472_v37  ;;  %6750 = vmatpush1.bf16.msra.mxu0 %v9461_v15  ;;  %v2012_v20 = vpop.f32.mrb[13].mxu0  ;;  %8076 = vpow2.f32 %v4052_v53  ;;  %v4058_v11 = vmul.f32 1.442695, %v3847_v42  ;;  %7084 = vmatprep.subr.bf16.mxu1 %v9472_v37  ;;  %v5458_v17 = vand.u32 4294901760, %v9463_v38 }
 0x361   : > { %11889 = vst [vmem:[#allocation5_spill] sm:$0xff] %v9474_v41  ;;  %v3849_v22 = vpop.f32.mrb[13].mxu1  ;;  %v9477_v34 = vpop.eup %8056  ;;  %v4056_v3 = vmul.f32 1.442695, %v2012_v20  ;;  %8078 = vpow2.f32 %v4054_v48  ;;  %v4254_v47 = vand.u32 4294901760, %v9451_v0  ;;  %7086 = vmatpush1.bf16.msra.mxu1 %v9468_v7  ;;  %v4258_v52 = vand.u32 4294901760, %v8055_v23 }
 0x362   : > { %v4060_v8 = vmul.f32 1.442695, %v3849_v22  ;;  %v8059_v54 = vpop.eup %8058  ;;  %8080 = vpow2.f32 %v4058_v11  ;;  %v2017_v60 = vpop.f32.mrb[14].mxu0  ;;  %v5460_v9 = vand.u32 4294901760, %v9455_v36  ;;  %v9486_v27 = vsub.f32 %v8051_v4, %v4252_v61 }
 0x363   : > { %v8061_v63 = vpop.eup %8060  ;;  %v3854_v19 = vpop.f32.mrb[14].mxu1  ;;  %v4256_v39 = vand.u32 4294901760, %v8059_v54  ;;  %8082 = vpow2.f32 %v4056_v3  ;;  %v4062_v49 = vmul.f32 1.442695, %v2017_v60  ;;  %v9495_v43 = vsub.f32 %v9463_v38, %v5458_v17 }
 0x364   : > { %v9484_v55 = vpop.eup %8062  ;;  %v4066_v2 = vmul.f32 1.442695, %v3854_v19  ;;  %v2019_v30 = vpop.f32.mrb[15].mxu0  ;;  %11890 = vst [vmem:[#allocation6_spill] sm:$0xff] %v9486_v27  ;;  %8084 = vpow2.f32 %v4060_v8  ;;  %v5462_v29 = vand.u32 4294901760, %v8061_v63  ;;  %v9500_v16 = vpack.c.bf16 %v4258_v52, %v4254_v47 }
 0x365   : > { %v3856_v26 = vpop.f32.mrb[15].mxu1  ;;  %v9488_v1 = vpop.eup %8064  ;;  %v4064_v6 = vmul.f32 1.442695, %v2019_v30  ;;  %v9490_v44 = vpack.c.bf16 %v4256_v39, %v4252_v61  ;;  %8086 = vpow2.f32 %v4062_v49  ;;  %v9492_v25 = vsub.f32 %v8059_v54, %v4256_v39  ;;  %11893 = vst [vmem:[#allocation9_spill] sm:$0xff] %v9495_v43 }
 0x366   : > { %v4068_v14 = vmul.f32 1.442695, %v3856_v26  ;;  %v8067_v21 = vpop.eup %8066  ;;  %8088 = vpow2.f32 %v4066_v2  ;;  %v2024_v57 = vpop.f32.mrb[16].mxu0  ;;  %11894 = vst [vmem:[#allocation10_spill] sm:$0xff] %v9500_v16  ;;  %v9503_v13 = vsub.f32 %v9451_v0, %v4254_v47  ;;  %v9505_v18 = vsub.f32 %v8055_v23, %v4258_v52 }
 0x367   : > { %11891 = vst [vmem:[#allocation7_spill] sm:$0xff] %v9490_v44  ;;  %11892 = vst [vmem:[#allocation8_spill] sm:$0xff] %v9492_v25  ;;  %v9497_v56 = vpop.eup %8068  ;;  %6752 = vmatprep.subr.bf16.mxu0 %v9490_v44  ;;  %v3861_v62 = vpop.f32.mrb[16].mxu1  ;;  %8090 = vpow2.f32 %v4064_v6  ;;  %v9509_v31 = vpack.c.bf16 %v5462_v29, %v5458_v17  ;;  %v9511_v51 = vsub.f32 %v8061_v63, %v5462_v29  ;;  %v4070_v53 = vmul.f32 1.442695, %v2024_v57 }
 0x368   : > { %11895 = vst [vmem:[#allocation11_spill] sm:$0xff] %v9503_v13  ;;  %11896 = vst [vmem:[#allocation12_spill] sm:$0xff] %v9505_v18  ;;  %v9507_v24 = vpop.eup %8070  ;;  %v2026_v4 = vpop.f32.mrb[17].mxu0  ;;  %8092 = vpow2.f32 %v4068_v14  ;;  %v4074_v32 = vmul.f32 1.442695, %v3861_v62  ;;  %6754 = vmatpush1.bf16.msra.mxu0 %v9500_v16  ;;  %v5464_v0 = vand.u32 4294901760, %v9477_v34  ;;  %v9518_v42 = vsub.f32 %v9455_v36, %v5460_v9 }
 0x369   : > { %11897 = vst [vmem:[#allocation13_spill] sm:$0xff] %v9509_v31  ;;  %11898 = vst [vmem:[#allocation14_spill] sm:$0xff] %v9511_v51  ;;  %v3863_v10 = vpop.f32.mrb[17].mxu1  ;;  %v9513_v38 = vpop.eup %8072  ;;  %7088 = vmatprep.subr.bf16.mxu1 %v9509_v31  ;;  %8094 = vpow2.f32 %v4070_v53  ;;  %v4072_v48 = vmul.f32 1.442695, %v2026_v4  ;;  %v4260_v22 = vand.u32 4294901760, %v8067_v21 }
 0x36a   : > { %11899 = vst [vmem:[#allocation15_spill] sm:$0xff] %v9518_v42  ;;  %v8075_v23 = vpop.eup %8074  ;;  %v4076_v20 = vmul.f32 1.442695, %v3863_v10  ;;  %8096 = vpow2.f32 %v4074_v32  ;;  %v9521_v3 = vpack.c.bf16 %v5464_v0, %v5460_v9  ;;  %v9524_v8 = vsub.f32 %v9477_v34, %v5464_v0  ;;  %v2031_v54 = vpop.f32.mrb[18].mxu0 }
 0x36b   : > { %v8077_v11 = vpop.eup %8076  ;;  %v3868_v61 = vpop.f32.mrb[18].mxu1  ;;  %v4264_v17 = vand.u32 4294901760, %v8075_v23  ;;  %8098 = vpow2.f32 %v4072_v48  ;;  %v4078_v36 = vmul.f32 1.442695, %v2031_v54  ;;  %v9528_v39 = vsub.f32 %v8067_v21, %v4260_v22 }
 0x36c   : > { %11900 = vst [vmem:[#allocation16_spill] sm:$0xff] %v9521_v3  ;;  %11901 = vst [vmem:[#allocation18_spill] sm:$0xff] %v9524_v8  ;;  %v9526_v47 = vpop.eup %8078  ;;  %v4082_v63 = vmul.f32 1.442695, %v3868_v61  ;;  %v2033_v60 = vpop.f32.mrb[19].mxu0  ;;  %7090 = vmatpush1.bf16.msra.mxu1 %v9521_v3  ;;  %8100 = vpow2.f32 %v4076_v20  ;;  %v5466_v26 = vand.u32 4294901760, %v9497_v56 }
 0x36d   : > { %v3870_v19 = vpop.f32.mrb[19].mxu1  ;;  %11902 = vst [vmem:[#allocation20_spill] sm:$0xff] %v9528_v39  ;;  %v9530_v52 = vpop.eup %8080  ;;  %v4080_v9 = vmul.f32 1.442695, %v2033_v60  ;;  %v9533_v49 = vpack.c.bf16 %v4264_v17, %v4260_v22  ;;  %8102 = vpow2.f32 %v4078_v36  ;;  %v9537_v30 = vsub.f32 %v8075_v23, %v4264_v17 }
 0x36e   : > { %v4084_v34 = vmul.f32 1.442695, %v3870_v19  ;;  %v9535_v2 = vpop.eup %8082  ;;  %v5470_v6 = vand.u32 4294901760, %v8077_v11  ;;  %8104 = vpow2.f32 %v4082_v63  ;;  %v2038_v21 = vpop.f32.mrb[20].mxu0  ;;  %v4262_v57 = vand.u32 4294901760, %v9484_v55 }
 0x36f   : > { %11903 = vst [vmem:[#allocation22_spill] sm:$0xff] %v9533_v49  ;;  %11904 = vst [vmem:[#allocation24_spill] sm:$0xff] %v9537_v30  ;;  %v9540_v14 = vpop.eup %8084  ;;  %6756 = vmatprep.subr.bf16.mxu0 %v9533_v49  ;;  %v3875_v29 = vpop.f32.mrb[20].mxu1  ;;  %v4266_v62 = vand.u32 4294901760, %v9507_v24  ;;  %v5468_v53 = vand.u32 4294901760, %v9488_v1  ;;  %8106 = vpow2.f32 %v4080_v9  ;;  %v9551_v32 = vsub.f32 %v9497_v56, %v5466_v26 }
 0x370   : > { %v9546_v4 = vpop.eup %8086  ;;  %v9548_v10 = vpack.c.bf16 %v5470_v6, %v5466_v26  ;;  %v9553_v0 = vsub.f32 %v8077_v11, %v5470_v6  ;;  %v2040_v23 = vpop.f32.mrb[21].mxu0  ;;  %8108 = vpow2.f32 %v4084_v34  ;;  %v4086_v22 = vmul.f32 1.442695, %v2038_v21 }
 0x371   : > { %11906 = vst [vmem:[#allocation28_spill] sm:$0xff] %v9551_v32  ;;  %v3877_v48 = vpop.f32.mrb[21].mxu1  ;;  %v9555_v20 = vpop.eup %8088  ;;  %v4090_v54 = vmul.f32 1.442695, %v3875_v29  ;;  %v9557_v61 = vpack.c.bf16 %v4266_v62, %v4262_v57  ;;  %v9561_v36 = vsub.f32 %v9484_v55, %v4262_v57  ;;  %v9564_v56 = vsub.f32 %v9507_v24, %v4266_v62 }
 0x372   : > { %11905 = vst [vmem:[#allocation27_spill] sm:$0xff] %v9548_v10  ;;  %11907 = vst [vmem:[#allocation30_spill] sm:$0xff] %v9553_v0  ;;  %v8091_v17 = vpop.eup %8090  ;;  %7092 = vmatprep.subr.bf16.mxu1 %v9548_v10  ;;  %v5472_v11 = vand.u32 4294901760, %v9513_v38  ;;  %v9568_v63 = vsub.f32 %v9488_v1, %v5468_v53  ;;  %8110 = vpow2.f32 %v4086_v22  ;;  %v4088_v19 = vmul.f32 1.442695, %v2040_v23  ;;  %v2045_v34 = vpop.f32.mrb[22].mxu0 }
 0x373   : > { %11908 = vst [vmem:[#allocation32_spill] sm:$0xff] %v9557_v61  ;;  %11909 = vst [vmem:[#allocation34_spill] sm:$0xff] %v9561_v36  ;;  %v8093_v60 = vpop.eup %8092  ;;  %6758 = vmatpush1.bf16.msra.mxu0 %v9557_v61  ;;  %v4092_v9 = vmul.f32 1.442695, %v3877_v48  ;;  %v3882_v26 = vpop.f32.mrb[22].mxu1  ;;  %v9573_v55 = vsub.f32 %v9440_v59, %v9448_v33  ;;  %8112 = vpow2.f32 %v4090_v54  ;;  %v4268_v59 = vand.u32 4294901760, %v9535_v2 }
 0x374   : > { %11910 = vst [vmem:[#allocation36_spill] sm:$0xff] %v9564_v56  ;;  %11911 = vst [vmem:[#allocation38_spill] sm:$0xff] %v9568_v63  ;;  %v9575_v6 = vpop.eup %8094  ;;  %v9577_v24 = vpack.c.bf16 %v5472_v11, %v5468_v53  ;;  %v9580_v1 = vsub.f32 %v9513_v38, %v5472_v11  ;;  %v4094_v21 = vmul.f32 1.442695, %v2045_v34  ;;  %v2047_v29 = vpop.f32.mrb[23].mxu0  ;;  %8114 = vpow2.f32 %v4088_v19 }
 0x375   : > { %11912 = vst [vmem:[#allocation39_spill] sm:$0xff] %v9573_v55  ;;  %v3884_v57 = vpop.f32.mrb[23].mxu1  ;;  %v9582_v62 = vpop.eup %8096  ;;  %v4098_v23 = vmul.f32 1.442695, %v3882_v26  ;;  %v4096_v48 = vmul.f32 1.442695, %v2047_v29  ;;  %8116 = vpow2.f32 %v4092_v9  ;;  %v9598_v9 = vsub.f32 %v9535_v2, %v4268_v59 }
 0x376   : > { %11913 = vst [vmem:[#allocation40_spill] sm:$0xff] %v9577_v24  ;;  %11914 = vst [vmem:[#allocation41_spill] sm:$0xff] %v9580_v1  ;;  %v4100_v22 = vmul.f32 1.442695, %v3884_v57  ;;  %v9584_v45 = vpop.eup %8098  ;;  %7094 = vmatpush1.bf16.msra.mxu1 %v9577_v24  ;;  %v4272_v53 = vand.u32 4294901760, %v8091_v17  ;;  %v5474_v38 = vand.u32 4294901760, %v9540_v14  ;;  %8118 = vpow2.f32 %v4094_v21 }
 0x377   : > { %v9589_v54 = vpop.eup %8100  ;;  %v5478_v11 = vand.u32 4294901760, %v8093_v60  ;;  %v2052_v34 = vpop.f32.mrb[24].mxu0  ;;  %v4270_v19 = vand.u32 4294901760, %v9526_v47  ;;  %v4274_v26 = vand.u32 4294901760, %v9546_v4  ;;  %8120 = vpow2.f32 %v4098_v23  ;;  %11916 = vst [vmem:[#allocation43_spill] sm:$0xff] %v9598_v9 }
 0x378   : > { %v3889_v61 = vpop.f32.mrb[24].mxu1  ;;  %v9593_v29 = vpop.eup %8102  ;;  %v9595_v57 = vpack.c.bf16 %v4272_v53, %v4268_v59  ;;  %v9600_v24 = vsub.f32 %v8091_v17, %v4272_v53  ;;  %8122 = vpow2.f32 %v4096_v48  ;;  %v9607_v16 = vsub.f32 %v9540_v14, %v5474_v38 }
 0x379   : > { %v2054_v10 = vpop.f32.mrb[25].mxu0  ;;  %v3891_v3 = vpop.f32.mrb[25].mxu1  ;;  %v9604_v49 = vpack.c.bf16 %v5478_v11, %v5474_v38  ;;  %v9609_v31 = vsub.f32 %v8093_v60, %v5478_v11  ;;  %8124 = vpow2.f32 %v4100_v22  ;;  %v4102_v2 = vmul.f32 1.442695, %v2052_v34 }
 0x37a   : > { %11915 = vst [vmem:[#allocation42_spill] sm:$0xff] %v9595_v57  ;;  %11917 = vst [vmem:[#allocation44_spill] sm:$0xff] %v9600_v24  ;;  %v9602_v21 = vpop.eup %8104  ;;  %6760 = vmatprep.subr.bf16.mxu0 %v9595_v57  ;;  %v4106_v59 = vmul.f32 1.442695, %v3889_v61  ;;  %v9612_v17 = vpack.c.bf16 %v4274_v26, %v4270_v19  ;;  %v9616_v48 = vsub.f32 %v9526_v47, %v4270_v19  ;;  %v5476_v14 = vand.u32 4294901760, %v9530_v52  ;;  %v2059_v22 = vpop.f32.mrb[26].mxu0 }
 0x37b   : > { %11918 = vst [vmem:[#allocation45_spill] sm:$0xff] %v9604_v49  ;;  %11919 = vst [vmem:[#allocation46_spill] sm:$0xff] %v9607_v16  ;;  %v8107_v23 = vpop.eup %8106  ;;  %7096 = vmatprep.subr.bf16.mxu1 %v9604_v49  ;;  %v9619_v44 = vsub.f32 %v9546_v4, %v4274_v26  ;;  %v5480_v60 = vand.u32 4294901760, %v9555_v20  ;;  %v3896_v38 = vpop.f32.mrb[26].mxu1  ;;  %8126 = vpow2.f32 %v4102_v2  ;;  %v4104_v61 = vmul.f32 1.442695, %v2054_v10 }
 0x37c   : > { %11920 = vst [vmem:[#allocation47_spill] sm:$0xff] %v9609_v31  ;;  %11921 = vst [vmem:[#allocation48_spill] sm:$0xff] %v9612_v17  ;;  %v8109_v53 = vpop.eup %8108  ;;  %6762 = vmatpush1.bf16.msra.mxu0 %v9612_v17  ;;  %v4108_v11 = vmul.f32 1.442695, %v3891_v3  ;;  %v4110_v34 = vmul.f32 1.442695, %v2059_v22  ;;  %8128 = vpow2.f32 %v4106_v59  ;;  %v9629_v4 = vsub.f32 %v9530_v52, %v5476_v14 }
 0x37d   : > { %11922 = vst [vmem:[#allocation49_spill] sm:$0xff] %v9616_v48  ;;  %11923 = vst [vmem:[#allocation50_spill] sm:$0xff] %v9619_v44  ;;  %v9624_v57 = vpop.eup %8110  ;;  %v9626_v47 = vpack.c.bf16 %v5480_v60, %v5476_v14  ;;  %v9632_v19 = vsub.f32 %v9555_v20, %v5480_v60  ;;  %v2061_v26 = vpop.f32.mrb[27].mxu0  ;;  %8130 = vpow2.f32 %v4104_v61  ;;  %v4114_v2 = vmul.f32 1.442695, %v3896_v38 }
 0x37e   : > { %11925 = vst [vmem:[#allocation52_spill] sm:$0xff] %v9629_v4  ;;  %v3898_v49 = vpop.f32.mrb[27].mxu1  ;;  %v9634_v7 = vpop.eup %8112  ;;  %v4112_v10 = vmul.f32 1.442695, %v2061_v26  ;;  %8132 = vpow2.f32 %v4108_v11  ;;  %v4276_v59 = vand.u32 4294901760, %v9584_v45  ;;  %v4280_v52 = vand.u32 4294901760, %v8107_v23 }
 0x37f   : > { %11924 = vst [vmem:[#allocation51_spill] sm:$0xff] %v9626_v47  ;;  %11926 = vst [vmem:[#allocation53_spill] sm:$0xff] %v9632_v19  ;;  %v4116_v3 = vmul.f32 1.442695, %v3898_v49  ;;  %v9636_v22 = vpop.eup %8114  ;;  %7098 = vmatpush1.bf16.msra.mxu1 %v9626_v47  ;;  %v5482_v14 = vand.u32 4294901760, %v9589_v54  ;;  %v2066_v20 = vpop.f32.mrb[28].mxu0  ;;  %8134 = vpow2.f32 %v4110_v34 }
 0x380   : > { %v3903_v60 = vpop.f32.mrb[28].mxu1  ;;  %v9641_v17 = vpop.eup %8116  ;;  %v5486_v37 = vand.u32 4294901760, %v8109_v53  ;;  %v4118_v61 = vmul.f32 1.442695, %v2066_v20  ;;  %8136 = vpow2.f32 %v4114_v2  ;;  %v9645_v15 = vpack.c.bf16 %v4280_v52, %v4276_v59 }
 0x381   : > { %v4122_v38 = vmul.f32 1.442695, %v3903_v60  ;;  %v2068_v26 = vpop.f32.mrb[29].mxu0  ;;  %v9643_v49 = vpop.eup %8118  ;;  %v9648_v11 = vsub.f32 %v9584_v45, %v4276_v59  ;;  %v9650_v47 = vsub.f32 %v8107_v23, %v4280_v52  ;;  %8138 = vpow2.f32 %v4112_v10 }
 0x382   : > { %11927 = vst [vmem:[#allocation54_spill] sm:$0xff] %v9645_v15  ;;  %v3905_v58 = vpop.f32.mrb[29].mxu1  ;;  %v9652_v19 = vpop.eup %8120  ;;  %v9654_v4 = vpack.c.bf16 %v5486_v37, %v5482_v14  ;;  %v9657_v34 = vsub.f32 %v9589_v54, %v5482_v14  ;;  %v9659_v20 = vsub.f32 %v8109_v53, %v5486_v37  ;;  %8140 = vpow2.f32 %v4116_v3  ;;  %6764 = vmatprep.subr.bf16.mxu0 %v9645_v15 }
 0x383   : > { %11928 = vst [vmem:[#allocation55_spill] sm:$0xff] %v9648_v11  ;;  %11929 = vst [vmem:[#allocation56_spill] sm:$0xff] %v9650_v47  ;;  %v8123_v60 = vpop.eup %8122  ;;  %v4278_v45 = vand.u32 4294901760, %v9575_v6  ;;  %v4282_v23 = vand.u32 4294901760, %v9593_v29  ;;  %v5484_v2 = vand.u32 4294901760, %v9582_v62  ;;  %v2073_v59 = vpop.f32.mrb[30].mxu0  ;;  %8142 = vpow2.f32 %v4118_v61 }
 0x384   : > { %11930 = vst [vmem:[#allocation57_spill] sm:$0xff] %v9654_v4  ;;  %11931 = vst [vmem:[#allocation58_spill] sm:$0xff] %v9657_v34  ;;  %v3910_v52 = vpop.f32.mrb[30].mxu1  ;;  %v8125_v10 = vpop.eup %8124  ;;  %7100 = vmatprep.subr.bf16.mxu1 %v9654_v4  ;;  %v5488_v54 = vand.u32 4294901760, %v9602_v21  ;;  %v4120_v37 = vmul.f32 1.442695, %v2068_v26  ;;  %8144 = vpow2.f32 %v4122_v38 }
 0x385   : > { %11932 = vst [vmem:[#allocation59_spill] sm:$0xff] %v9659_v20  ;;  %v4124_v53 = vmul.f32 1.442695, %v3905_v58  ;;  %v2075_v14 = vpop.f32.mrb[31].mxu0  ;;  %v9667_v3 = vpack.c.bf16 %v4282_v23, %v4278_v45  ;;  %v9670_v15 = vsub.f32 %v9575_v6, %v4278_v45  ;;  %v9673_v20 = vsub.f32 %v9593_v29, %v4282_v23  ;;  %v3912_v34 = vpop.f32.mrb[31].mxu1 }
 0x386   : > { %v9675_v47 = vpop.eup %8126  ;;  %v9677_v11 = vpack.c.bf16 %v5488_v54, %v5484_v2  ;;  %v9680_v61 = vsub.f32 %v9582_v62, %v5484_v2  ;;  %v9683_v58 = vsub.f32 %v9602_v21, %v5488_v54  ;;  %8146 = vpow2.f32 %v4120_v37  ;;  %v2080_v54 = vpop.f32.mrb[32].mxu0 }
 0x387   : > { %11933 = vst [vmem:[#allocation60_spill] sm:$0xff] %v9667_v3  ;;  %11934 = vst [vmem:[#allocation61_spill] sm:$0xff] %v9670_v15  ;;  %v9685_v38 = vpop.eup %8128  ;;  %6766 = vmatpush1.bf16.msra.mxu0 %v9667_v3  ;;  %8148 = vpow2.f32 %v4124_v53  ;;  %v4126_v6 = vmul.f32 1.442695, %v2073_v59  ;;  %v4130_v29 = vmul.f32 1.442695, %v3910_v52 }
 0x388   : > { %11935 = vst [vmem:[#allocation62_spill] sm:$0xff] %v9673_v20  ;;  %11936 = vst [vmem:[#allocation63_spill] sm:$0xff] %v9677_v11  ;;  %v4128_v26 = vmul.f32 1.442695, %v2075_v14  ;;  %v9688_v45 = vpop.eup %8130  ;;  %7102 = vmatpush1.bf16.msra.mxu1 %v9677_v11  ;;  %v4132_v23 = vmul.f32 1.442695, %v3912_v34 }
 0x389   : > { %11937 = vst [vmem:[#allocation64_spill] sm:$0xff] %v9680_v61  ;;  %11938 = vst [vmem:[#allocation65_spill] sm:$0xff] %v9683_v58  ;;  %v4284_v62 = vand.u32 4294901760, %v9636_v22  ;;  %v4288_v2 = vand.u32 4294901760, %v8123_v60  ;;  %v5490_v21 = vand.u32 4294901760, %v9641_v17  ;;  %v9693_v37 = vpop.eup %8132  ;;  %8150 = vpow2.f32 %v4126_v6  ;;  %v3917_v53 = vpop.f32.mrb[32].mxu1 }
 0x38a   : > { %v5494_v4 = vand.u32 4294901760, %v8125_v10  ;;  %v4134_v3 = vmul.f32 1.442695, %v2080_v54  ;;  %v4286_v59 = vand.u32 4294901760, %v9624_v57  ;;  %v2082_v52 = vpop.f32.mrb[33].mxu0  ;;  %v9696_v14 = vpop.eup %8134  ;;  %8152 = vpow2.f32 %v4130_v29 }
 0x38b   : > { %v9698_v11 = vpack.c.bf16 %v4288_v2, %v4284_v62  ;;  %v9701_v34 = vsub.f32 %v9636_v22, %v4284_v62  ;;  %v9703_v58 = vsub.f32 %v8123_v60, %v4288_v2  ;;  %v3919_v61 = vpop.f32.mrb[33].mxu1  ;;  %v9705_v20 = vpop.eup %8136  ;;  %8154 = vpow2.f32 %v4128_v26 }
 0x38c   : > { %v9707_v6 = vpack.c.bf16 %v5494_v4, %v5490_v21  ;;  %v9710_v54 = vsub.f32 %v9641_v17, %v5490_v21  ;;  %v9712_v15 = vsub.f32 %v8125_v10, %v5494_v4  ;;  %v2087_v44 = vpop.f32.mrb[34].mxu0  ;;  %v3924_v29 = vpop.f32.mrb[34].mxu1  ;;  %8156 = vpow2.f32 %v4132_v23 }
 0x38d   : > { %11939 = vst [vmem:[#allocation66_spill] sm:$0xff] %v9698_v11  ;;  %11940 = vst [vmem:[#allocation67_spill] sm:$0xff] %v9701_v34  ;;  %v8139_v48 = vpop.eup %8138  ;;  %6768 = vmatprep.subr.bf16.mxu0 %v9698_v11  ;;  %v4138_v22 = vmul.f32 1.442695, %v3917_v53  ;;  %v4290_v60 = vand.u32 4294901760, %v9643_v49  ;;  %v9717_v62 = vsub.f32 %v9624_v57, %v4286_v59  ;;  %v2089_v26 = vpop.f32.mrb[35].mxu0  ;;  %8158 = vpow2.f32 %v4134_v3 }
 0x38e   : > { %11941 = vst [vmem:[#allocation68_spill] sm:$0xff] %v9703_v58  ;;  %11942 = vst [vmem:[#allocation69_spill] sm:$0xff] %v9707_v6  ;;  %v3926_v2 = vpop.f32.mrb[35].mxu1  ;;  %v8141_v58 = vpop.eup %8140  ;;  %7104 = vmatprep.subr.bf16.mxu1 %v9707_v6  ;;  %v5492_v17 = vand.u32 4294901760, %v9634_v7  ;;  %v5496_v4 = vand.u32 4294901760, %v9652_v19 }
 0x38f   : > { %11943 = vst [vmem:[#allocation70_spill] sm:$0xff] %v9710_v54  ;;  %11944 = vst [vmem:[#allocation71_spill] sm:$0xff] %v9712_v15  ;;  %v4136_v10 = vmul.f32 1.442695, %v2082_v52  ;;  %v9722_v23 = vpop.eup %8142  ;;  %8160 = vpow2.f32 %v4138_v22  ;;  %v9724_v21 = vpack.c.bf16 %v4290_v60, %v4286_v59  ;;  %v9727_v53 = vsub.f32 %v9643_v49, %v4290_v60  ;;  %v2094_v52 = vpop.f32.mrb[36].mxu0 }
 0x390   : > { %11945 = vst [vmem:[#allocation72_spill] sm:$0xff] %v9717_v62  ;;  %v4140_v57 = vmul.f32 1.442695, %v3919_v61  ;;  %v9729_v11 = vpop.eup %8144  ;;  %v9731_v62 = vpack.c.bf16 %v5496_v4, %v5492_v17  ;;  %v9734_v3 = vsub.f32 %v9634_v7, %v5492_v17  ;;  %v9737_v6 = vsub.f32 %v9652_v19, %v5496_v4  ;;  %v3931_v15 = vpop.f32.mrb[36].mxu1 }
 0x391   : > { %11946 = vst [vmem:[#allocation73_spill] sm:$0xff] %v9724_v21  ;;  %11947 = vst [vmem:[#allocation74_spill] sm:$0xff] %v9727_v53  ;;  %8162 = vpow2.f32 %v4136_v10  ;;  %v9739_v22 = vpop.eup %8146  ;;  %6770 = vmatpush1.bf16.msra.mxu0 %v9724_v21  ;;  %v4142_v49 = vmul.f32 1.442695, %v2087_v44  ;;  %v4146_v61 = vmul.f32 1.442695, %v3924_v29 }
 0x392   : > { %11948 = vst [vmem:[#allocation75_spill] sm:$0xff] %v9731_v62  ;;  %11949 = vst [vmem:[#allocation76_spill] sm:$0xff] %v9734_v3  ;;  %8164 = vpow2.f32 %v4140_v57  ;;  %v4144_v59 = vmul.f32 1.442695, %v2089_v26  ;;  %v9742_v60 = vpop.eup %8148  ;;  %7106 = vmatpush1.bf16.msra.mxu1 %v9731_v62  ;;  %v4148_v7 = vmul.f32 1.442695, %v3926_v2 }
 0x393   : > { %11950 = vst [vmem:[#allocation77_spill] sm:$0xff] %v9737_v6  ;;  %v4292_v17 = vand.u32 4294901760, %v9688_v45  ;;  %v4296_v19 = vand.u32 4294901760, %v8139_v48  ;;  %v5498_v4 = vand.u32 4294901760, %v9693_v37  ;;  %v2096_v10 = vpop.f32.mrb[37].mxu0  ;;  %8166 = vpow2.f32 %v4142_v49  ;;  %v3933_v21 = vpop.f32.mrb[37].mxu1 }
 0x394   : > { %v5502_v6 = vand.u32 4294901760, %v8141_v58  ;;  %v4150_v3 = vmul.f32 1.442695, %v2094_v52  ;;  %v4154_v53 = vmul.f32 1.442695, %v3931_v15  ;;  %v9747_v57 = vpop.eup %8150  ;;  %8168 = vpow2.f32 %v4146_v61  ;;  %v2101_v2 = vpop.f32.mrb[38].mxu0 }
 0x395   : > { %v9749_v44 = vpack.c.bf16 %v4296_v19, %v4292_v17  ;;  %v9752_v29 = vsub.f32 %v9688_v45, %v4292_v17  ;;  %v9754_v26 = vsub.f32 %v8139_v48, %v4296_v19  ;;  %v3938_v62 = vpop.f32.mrb[38].mxu1  ;;  %v9756_v54 = vpop.eup %8152  ;;  %8170 = vpow2.f32 %v4144_v59 }
 0x396   : > { %v9758_v49 = vpack.c.bf16 %v5502_v6, %v5498_v4  ;;  %v9761_v15 = vsub.f32 %v9693_v37, %v5498_v4  ;;  %v9763_v52 = vsub.f32 %v8141_v58, %v5502_v6  ;;  %v2103_v61 = vpop.f32.mrb[39].mxu0  ;;  %v3940_v34 = vpop.f32.mrb[39].mxu1  ;;  %8172 = vpow2.f32 %v4148_v7 }
 0x397   : > { %11951 = vst [vmem:[#allocation78_spill] sm:$0xff] %v9749_v44  ;;  %11952 = vst [vmem:[#allocation79_spill] sm:$0xff] %v9752_v29  ;;  %v8155_v31 = vpop.eup %8154  ;;  %6772 = vmatprep.subr.bf16.mxu0 %v9749_v44  ;;  %v4294_v48 = vand.u32 4294901760, %v9675_v47  ;;  %v4298_v45 = vand.u32 4294901760, %v9696_v14  ;;  %v5500_v17 = vand.u32 4294901760, %v9685_v38  ;;  %8174 = vpow2.f32 %v4150_v3 }
 0x398   : > { %11953 = vst [vmem:[#allocation80_spill] sm:$0xff] %v9754_v26  ;;  %11954 = vst [vmem:[#allocation81_spill] sm:$0xff] %v9758_v49  ;;  %v8157_v59 = vpop.eup %8156  ;;  %7108 = vmatprep.subr.bf16.mxu1 %v9758_v49  ;;  %v5504_v37 = vand.u32 4294901760, %v9705_v20  ;;  %v4152_v58 = vmul.f32 1.442695, %v2096_v10  ;;  %8176 = vpow2.f32 %v4154_v53 }
 0x399   : > { %11955 = vst [vmem:[#allocation82_spill] sm:$0xff] %v9761_v15  ;;  %11956 = vst [vmem:[#allocation83_spill] sm:$0xff] %v9763_v52  ;;  %v4156_v6 = vmul.f32 1.442695, %v3933_v21  ;;  %v9771_v19 = vpop.eup %8158  ;;  %v9773_v7 = vpack.c.bf16 %v4298_v45, %v4294_v48  ;;  %v9776_v4 = vsub.f32 %v9675_v47, %v4294_v48  ;;  %v9779_v44 = vsub.f32 %v9696_v14, %v4298_v45  ;;  %v2108_v52 = vpop.f32.mrb[40].mxu0 }
 0x39a   : > { %v3945_v15 = vpop.f32.mrb[40].mxu1  ;;  %v9781_v26 = vpop.eup %8160  ;;  %v9783_v3 = vpack.c.bf16 %v5504_v37, %v5500_v17  ;;  %v9786_v10 = vsub.f32 %v9685_v38, %v5500_v17  ;;  %v9789_v21 = vsub.f32 %v9705_v20, %v5504_v37  ;;  %8178 = vpow2.f32 %v4152_v58 }
 0x39b   : > { %11957 = vst [vmem:[#allocation84_spill] sm:$0xff] %v9773_v7  ;;  %11958 = vst [vmem:[#allocation85_spill] sm:$0xff] %v9776_v4  ;;  %v2110_v53 = vpop.f32.mrb[41].mxu0  ;;  %v3947_v49 = vpop.f32.mrb[41].mxu1  ;;  %6774 = vmatpush1.bf16.msra.mxu0 %v9773_v7  ;;  %8180 = vpow2.f32 %v4156_v6  ;;  %v4158_v14 = vmul.f32 1.442695, %v2101_v2 }
 0x39c   : > { %11959 = vst [vmem:[#allocation86_spill] sm:$0xff] %v9779_v44  ;;  %11960 = vst [vmem:[#allocation87_spill] sm:$0xff] %v9783_v3  ;;  %v9791_v47 = vpop.eup %8162  ;;  %v4162_v48 = vmul.f32 1.442695, %v3938_v62  ;;  %v4160_v45 = vmul.f32 1.442695, %v2103_v61  ;;  %7110 = vmatpush1.bf16.msra.mxu1 %v9783_v3 }
 0x39d   : > { %11961 = vst [vmem:[#allocation88_spill] sm:$0xff] %v9786_v10  ;;  %11962 = vst [vmem:[#allocation89_spill] sm:$0xff] %v9789_v21  ;;  %v9794_v44 = vpop.eup %8164  ;;  %v4164_v38 = vmul.f32 1.442695, %v3940_v34  ;;  %v4300_v17 = vand.u32 4294901760, %v9739_v22  ;;  %v4304_v20 = vand.u32 4294901760, %v8155_v31  ;;  %8182 = vpow2.f32 %v4158_v14 }
 0x39e   : > { %v5506_v37 = vand.u32 4294901760, %v9742_v60  ;;  %v5510_v58 = vand.u32 4294901760, %v8157_v59  ;;  %v4166_v21 = vmul.f32 1.442695, %v2108_v52  ;;  %v4170_v10 = vmul.f32 1.442695, %v3945_v15  ;;  %v9799_v7 = vpop.eup %8166 }
 0x39f   : > { %v2115_v4 = vpop.f32.mrb[42].mxu0  ;;  %8184 = vpow2.f32 %v4162_v48  ;;  %v9801_v62 = vpack.c.bf16 %v4304_v20, %v4300_v17  ;;  %v9804_v2 = vsub.f32 %v9739_v22, %v4300_v17  ;;  %v9806_v61 = vsub.f32 %v8155_v31, %v4304_v20  ;;  %v3952_v34 = vpop.f32.mrb[42].mxu1 }
 0x3a0   : > { %v2117_v6 = vpop.f32.mrb[43].mxu0  ;;  %v9808_v3 = vpop.eup %8168  ;;  %8186 = vpow2.f32 %v4160_v45  ;;  %v9810_v14 = vpack.c.bf16 %v5510_v58, %v5506_v37  ;;  %v9813_v15 = vsub.f32 %v9742_v60, %v5506_v37  ;;  %v9815_v52 = vsub.f32 %v8157_v59, %v5510_v58 }
 0x3a1   : > { %11963 = vst [vmem:[#allocation90_spill] sm:$0xff] %v9801_v62  ;;  %11964 = vst [vmem:[#allocation91_spill] sm:$0xff] %v9804_v2  ;;  %v3954_v48 = vpop.f32.mrb[43].mxu1  ;;  %v8171_v29 = vpop.eup %8170  ;;  %8188 = vpow2.f32 %v4164_v38  ;;  %6776 = vmatprep.subr.bf16.mxu0 %v9801_v62  ;;  %v4302_v31 = vand.u32 4294901760, %v9722_v23  ;;  %v4306_v22 = vand.u32 4294901760, %v9747_v57  ;;  %v5508_v17 = vand.u32 4294901760, %v9729_v11 }
 0x3a2   : > { %11965 = vst [vmem:[#allocation92_spill] sm:$0xff] %v9806_v61  ;;  %11966 = vst [vmem:[#allocation93_spill] sm:$0xff] %v9810_v14  ;;  %v8173_v20 = vpop.eup %8172  ;;  %7112 = vmatprep.subr.bf16.mxu1 %v9810_v14  ;;  %8190 = vpow2.f32 %v4166_v21  ;;  %v5512_v60 = vand.u32 4294901760, %v9756_v54  ;;  %v4168_v45 = vmul.f32 1.442695, %v2110_v53  ;;  %v2122_v37 = vpop.f32.mrb[44].mxu0 }
 0x3a3   : > { %11967 = vst [vmem:[#allocation94_spill] sm:$0xff] %v9813_v15  ;;  %11968 = vst [vmem:[#allocation95_spill] sm:$0xff] %v9815_v52  ;;  %v4172_v59 = vmul.f32 1.442695, %v3947_v49  ;;  %v9823_v58 = vpop.eup %8174  ;;  %8192 = vpow2.f32 %v4170_v10  ;;  %v9825_v38 = vpack.c.bf16 %v4306_v22, %v4302_v31  ;;  %v9828_v62 = vsub.f32 %v9722_v23, %v4302_v31  ;;  %v3959_v15 = vpop.f32.mrb[44].mxu1 }
 0x3a4   : > { %v9831_v52 = vsub.f32 %v9747_v57, %v4306_v22  ;;  %v2124_v61 = vpop.f32.mrb[45].mxu0  ;;  %v9833_v14 = vpop.eup %8176  ;;  %v9835_v21 = vpack.c.bf16 %v5512_v60, %v5508_v17  ;;  %v9838_v49 = vsub.f32 %v9729_v11, %v5508_v17  ;;  %v9841_v53 = vsub.f32 %v9756_v54, %v5512_v60 }
 0x3a5   : > { %11969 = vst [vmem:[#allocation96_spill] sm:$0xff] %v9825_v38  ;;  %11970 = vst [vmem:[#allocation97_spill] sm:$0xff] %v9828_v62  ;;  %8194 = vpow2.f32 %v4168_v45  ;;  %v3961_v10 = vpop.f32.mrb[45].mxu1  ;;  %v9843_v2 = vpop.eup %8178  ;;  %6778 = vmatpush1.bf16.msra.mxu0 %v9825_v38  ;;  %v4174_v23 = vmul.f32 1.442695, %v2115_v4  ;;  %v4308_v11 = vand.u32 4294901760, %v9791_v47 }
 0x3a6   : > { %11971 = vst [vmem:[#allocation98_spill] sm:$0xff] %v9831_v52  ;;  %11972 = vst [vmem:[#allocation99_spill] sm:$0xff] %v9835_v21  ;;  %8196 = vpow2.f32 %v4172_v59  ;;  %v4178_v57 = vmul.f32 1.442695, %v3952_v34  ;;  %v4176_v31 = vmul.f32 1.442695, %v2117_v6  ;;  %v9846_v22 = vpop.eup %8180  ;;  %7114 = vmatpush1.bf16.msra.mxu1 %v9835_v21 }
 0x3a7   : > { %11973 = vst [vmem:[#allocation100_spill] sm:$0xff] %v9838_v49  ;;  %11974 = vst [vmem:[#allocation101_spill] sm:$0xff] %v9841_v53  ;;  %v4180_v52 = vmul.f32 1.442695, %v3954_v48  ;;  %v4312_v17 = vand.u32 4294901760, %v8171_v29  ;;  %v5514_v54 = vand.u32 4294901760, %v9794_v44  ;;  %8198 = vpow2.f32 %v4174_v23  ;;  %v9851_v59 = vpop.eup %8182 }
 0x3a8   : > { %v2129_v60 = vpop.f32.mrb[46].mxu0  ;;  %v5518_v45 = vand.u32 4294901760, %v8173_v20  ;;  %v4182_v53 = vmul.f32 1.442695, %v2122_v37  ;;  %v4186_v49 = vmul.f32 1.442695, %v3959_v15  ;;  %8200 = vpow2.f32 %v4178_v57 }
 0x3a9   : > { %v3966_v38 = vpop.f32.mrb[46].mxu1  ;;  %v9853_v4 = vpack.c.bf16 %v4312_v17, %v4308_v11  ;;  %v9856_v34 = vsub.f32 %v9791_v47, %v4308_v11  ;;  %v9858_v6 = vsub.f32 %v8171_v29, %v4312_v17  ;;  %v2131_v48 = vpop.f32.mrb[47].mxu0  ;;  %8202 = vpow2.f32 %v4176_v31 }
 0x3aa   : > { %v3968_v21 = vpop.f32.mrb[47].mxu1  ;;  %v9860_v62 = vpop.eup %8184  ;;  %v9862_v23 = vpack.c.bf16 %v5518_v45, %v5514_v54  ;;  %v9865_v15 = vsub.f32 %v9794_v44, %v5514_v54  ;;  %v9867_v37 = vsub.f32 %v8173_v20, %v5518_v45  ;;  %8204 = vpow2.f32 %v4180_v52 }
 0x3ab   : > { %11975 = vst [vmem:[#allocation102_spill] sm:$0xff] %v9853_v4  ;;  %11976 = vst [vmem:[#allocation103_spill] sm:$0xff] %v9856_v34  ;;  %v8187_v57 = vpop.eup %8186  ;;  %6780 = vmatprep.subr.bf16.mxu0 %v9853_v4  ;;  %v4310_v47 = vand.u32 4294901760, %v9771_v19  ;;  %v4314_v29 = vand.u32 4294901760, %v9799_v7  ;;  %v5516_v11 = vand.u32 4294901760, %v9781_v26  ;;  %v2136_v17 = vpop.f32.mrb[48].mxu0  ;;  %8206 = vpow2.f32 %v4182_v53 }
 0x3ac   : > { %11977 = vst [vmem:[#allocation104_spill] sm:$0xff] %v9858_v6  ;;  %11978 = vst [vmem:[#allocation105_spill] sm:$0xff] %v9862_v23  ;;  %v3973_v6 = vpop.f32.mrb[48].mxu1  ;;  %v8189_v31 = vpop.eup %8188  ;;  %7116 = vmatprep.subr.bf16.mxu1 %v9862_v23  ;;  %v5520_v44 = vand.u32 4294901760, %v9808_v3  ;;  %v4184_v20 = vmul.f32 1.442695, %v2124_v61  ;;  %8208 = vpow2.f32 %v4186_v49 }
 0x3ad   : > { %11979 = vst [vmem:[#allocation106_spill] sm:$0xff] %v9865_v15  ;;  %11980 = vst [vmem:[#allocation107_spill] sm:$0xff] %v9867_v37  ;;  %v4188_v54 = vmul.f32 1.442695, %v3961_v10  ;;  %v2138_v45 = vpop.f32.mrb[49].mxu0  ;;  %v9875_v52 = vpop.eup %8190  ;;  %v9877_v4 = vpack.c.bf16 %v4314_v29, %v4310_v47  ;;  %v9880_v37 = vsub.f32 %v9771_v19, %v4310_v47  ;;  %v9883_v15 = vsub.f32 %v9799_v7, %v4314_v29 }
 0x3ae   : > { %v3975_v34 = vpop.f32.mrb[49].mxu1  ;;  %v9885_v16 = vpop.eup %8192  ;;  %v9887_v53 = vpack.c.bf16 %v5520_v44, %v5516_v11  ;;  %v9890_v61 = vsub.f32 %v9781_v26, %v5516_v11  ;;  %v9893_v10 = vsub.f32 %v9808_v3, %v5520_v44  ;;  %8210 = vpow2.f32 %v4184_v20 }
 0x3af   : > { %11981 = vst [vmem:[#allocation108_spill] sm:$0xff] %v9877_v4  ;;  %11982 = vst [vmem:[#allocation109_spill] sm:$0xff] %v9880_v37  ;;  %v9895_v49 = vpop.eup %8194  ;;  %6782 = vmatpush1.bf16.msra.mxu0 %v9877_v4  ;;  %8212 = vpow2.f32 %v4188_v54  ;;  %v4190_v19 = vmul.f32 1.442695, %v2129_v60  ;;  %v4194_v7 = vmul.f32 1.442695, %v3966_v38 }
 0x3b0   : > { %11983 = vst [vmem:[#allocation110_spill] sm:$0xff] %v9883_v15  ;;  %11984 = vst [vmem:[#allocation111_spill] sm:$0xff] %v9887_v53  ;;  %v4192_v47 = vmul.f32 1.442695, %v2131_v48  ;;  %v9898_v29 = vpop.eup %8196  ;;  %7118 = vmatpush1.bf16.msra.mxu1 %v9887_v53  ;;  %v4196_v23 = vmul.f32 1.442695, %v3968_v21 }
 0x3b1   : > { %11985 = vst [vmem:[#allocation112_spill] sm:$0xff] %v9890_v61  ;;  %11986 = vst [vmem:[#allocation113_spill] sm:$0xff] %v9893_v10  ;;  %v4316_v26 = vand.u32 4294901760, %v9843_v2  ;;  %v4320_v11 = vand.u32 4294901760, %v8187_v57  ;;  %v5522_v3 = vand.u32 4294901760, %v9846_v22  ;;  %v2143_v44 = vpop.f32.mrb[50].mxu0  ;;  %8214 = vpow2.f32 %v4190_v19  ;;  %v9903_v54 = vpop.eup %8198 }
 0x3b2   : > { %v5526_v20 = vand.u32 4294901760, %v8189_v31  ;;  %v4198_v10 = vmul.f32 1.442695, %v2136_v17  ;;  %v4202_v61 = vmul.f32 1.442695, %v3973_v6  ;;  %v3980_v4 = vpop.f32.mrb[50].mxu1  ;;  %8216 = vpow2.f32 %v4194_v7  ;;  %v9912_v15 = vpop.eup %8200 }
 0x3b3   : > { %v9905_v38 = vpack.c.bf16 %v4320_v11, %v4316_v26  ;;  %v9908_v60 = vsub.f32 %v9843_v2, %v4316_v26  ;;  %v9910_v21 = vsub.f32 %v8187_v57, %v4320_v11  ;;  %v2145_v48 = vpop.f32.mrb[51].mxu0  ;;  %v3982_v53 = vpop.f32.mrb[51].mxu1  ;;  %8218 = vpow2.f32 %v4192_v47 }
 0x3b4   : > { %v9914_v19 = vpack.c.bf16 %v5526_v20, %v5522_v3  ;;  %v9917_v6 = vsub.f32 %v9846_v22, %v5522_v3  ;;  %v9919_v17 = vsub.f32 %v8189_v31, %v5526_v20  ;;  %v2150_v7 = vpop.f32.mrb[52].mxu0  ;;  %v3987_v37 = vpop.f32.mrb[52].mxu1  ;;  %8220 = vpow2.f32 %v4196_v23 }
 0x3b5   : > { %11987 = vst [vmem:[#allocation114_spill] sm:$0xff] %v9905_v38  ;;  %11988 = vst [vmem:[#allocation115_spill] sm:$0xff] %v9908_v60  ;;  %v8203_v24 = vpop.eup %8202  ;;  %6784 = vmatprep.subr.bf16.mxu0 %v9905_v38  ;;  %v4318_v2 = vand.u32 4294901760, %v9823_v58  ;;  %v4322_v57 = vand.u32 4294901760, %v9851_v59  ;;  %v5524_v26 = vand.u32 4294901760, %v9833_v14  ;;  %v2152_v47 = vpop.f32.mrb[53].mxu0  ;;  %8222 = vpow2.f32 %v4198_v10 }
 0x3b6   : > { %11989 = vst [vmem:[#allocation116_spill] sm:$0xff] %v9910_v21  ;;  %11990 = vst [vmem:[#allocation117_spill] sm:$0xff] %v9914_v19  ;;  %v3989_v11 = vpop.f32.mrb[53].mxu1  ;;  %v8205_v21 = vpop.eup %8204  ;;  %7120 = vmatprep.subr.bf16.mxu1 %v9914_v19  ;;  %v5528_v22 = vand.u32 4294901760, %v9860_v62  ;;  %v4200_v31 = vmul.f32 1.442695, %v2138_v45  ;;  %8224 = vpow2.f32 %v4202_v61 }
 0x3b7   : > { %11991 = vst [vmem:[#allocation118_spill] sm:$0xff] %v9917_v6  ;;  %11992 = vst [vmem:[#allocation119_spill] sm:$0xff] %v9919_v17  ;;  %v4204_v3 = vmul.f32 1.442695, %v3975_v34  ;;  %v9927_v20 = vpop.eup %8206  ;;  %v9929_v23 = vpack.c.bf16 %v4322_v57, %v4318_v2  ;;  %v9932_v38 = vsub.f32 %v9823_v58, %v4318_v2  ;;  %v9935_v17 = vsub.f32 %v9851_v59, %v4322_v57  ;;  %v2157_v45 = vpop.f32.mrb[54].mxu0 }
 0x3b8   : > { %v9937_v6 = vpop.eup %8208  ;;  %v9939_v60 = vpack.c.bf16 %v5528_v22, %v5524_v26  ;;  %v9942_v10 = vsub.f32 %v9833_v14, %v5524_v26  ;;  %v9945_v34 = vsub.f32 %v9860_v62, %v5528_v22  ;;  %8226 = vpow2.f32 %v4200_v31  ;;  %v3994_v61 = vpop.f32.mrb[54].mxu1 }
 0x3b9   : > { %11993 = vst [vmem:[#allocation120_spill] sm:$0xff] %v9929_v23  ;;  %11994 = vst [vmem:[#allocation121_spill] sm:$0xff] %v9932_v38  ;;  %v9947_v19 = vpop.eup %8210  ;;  %6786 = vmatpush1.bf16.msra.mxu0 %v9929_v23  ;;  %8228 = vpow2.f32 %v4204_v3  ;;  %v4206_v58 = vmul.f32 1.442695, %v2143_v44  ;;  %v4210_v59 = vmul.f32 1.442695, %v3980_v4 }
 0x3ba   : > { %11995 = vst [vmem:[#allocation122_spill] sm:$0xff] %v9935_v17  ;;  %11996 = vst [vmem:[#allocation123_spill] sm:$0xff] %v9939_v60  ;;  %v4208_v2 = vmul.f32 1.442695, %v2145_v48  ;;  %v9950_v57 = vpop.eup %8212  ;;  %7122 = vmatpush1.bf16.msra.mxu1 %v9939_v60  ;;  %v4212_v14 = vmul.f32 1.442695, %v3982_v53 }
 0x3bb   : > { %11997 = vst [vmem:[#allocation124_spill] sm:$0xff] %v9942_v10  ;;  %11998 = vst [vmem:[#allocation125_spill] sm:$0xff] %v9945_v34  ;;  %v4324_v26 = vand.u32 4294901760, %v9895_v49  ;;  %v4328_v62 = vand.u32 4294901760, %v8203_v24  ;;  %v5530_v22 = vand.u32 4294901760, %v9898_v29  ;;  %v2159_v31 = vpop.f32.mrb[55].mxu0  ;;  %8230 = vpow2.f32 %v4206_v58  ;;  %v9955_v3 = vpop.eup %8214 }
 0x3bc   : > { %v5534_v34 = vand.u32 4294901760, %v8205_v21  ;;  %v4214_v10 = vmul.f32 1.442695, %v2150_v7  ;;  %v4218_v17 = vmul.f32 1.442695, %v3987_v37  ;;  %v3996_v23 = vpop.f32.mrb[55].mxu1  ;;  %8232 = vpow2.f32 %v4210_v59  ;;  %v9964_v38 = vpop.eup %8216 }
 0x3bd   : > { %v9957_v4 = vpack.c.bf16 %v4328_v62, %v4324_v26  ;;  %v9960_v44 = vsub.f32 %v9895_v49, %v4324_v26  ;;  %v9962_v53 = vsub.f32 %v8203_v24, %v4328_v62  ;;  %v2164_v48 = vpop.f32.mrb[56].mxu0  ;;  %v4001_v60 = vpop.f32.mrb[56].mxu1  ;;  %8234 = vpow2.f32 %v4208_v2 }
 0x3be   : > { %v9966_v58 = vpack.c.bf16 %v5534_v34, %v5530_v22  ;;  %v9969_v37 = vsub.f32 %v9898_v29, %v5530_v22  ;;  %v9971_v7 = vsub.f32 %v8205_v21, %v5534_v34  ;;  %v2166_v59 = vpop.f32.mrb[57].mxu0  ;;  %v4003_v9 = vpop.f32.mrb[57].mxu1  ;;  %8236 = vpow2.f32 %v4212_v14 }
 0x3bf   : > { %11999 = vst [vmem:[#allocation126_spill] sm:$0xff] %v9957_v4  ;;  %12000 = vst [vmem:[#allocation127_spill] sm:$0xff] %v9962_v53  ;;  %v8219_v1 = vpop.eup %8218  ;;  %6788 = vmatprep.subr.bf16.mxu0 %v9957_v4  ;;  %v4326_v24 = vand.u32 4294901760, %v9875_v52  ;;  %v4330_v49 = vand.u32 4294901760, %v9903_v54  ;;  %v5532_v26 = vand.u32 4294901760, %v9885_v16  ;;  %8238 = vpow2.f32 %v4214_v10 }
 0x3c0   : > { %12001 = vst [vmem:[#allocation128_spill] sm:$0xff] %v9966_v58  ;;  %12002 = vst [vmem:[#allocation129_spill] sm:$0xff] %v9969_v37  ;;  %v8221_v2 = vpop.eup %8220  ;;  %7124 = vmatprep.subr.bf16.mxu1 %v9966_v58  ;;  %v5536_v29 = vand.u32 4294901760, %v9912_v15  ;;  %v4216_v21 = vmul.f32 1.442695, %v2152_v47  ;;  %8240 = vpow2.f32 %v4218_v17  ;;  %v4332_v58 = vand.u32 4294901760, %v9947_v19 }
 0x3c1   : > { %12003 = vst [vmem:[#allocation130_spill] sm:$0xff] %v9971_v7  ;;  %v4220_v34 = vmul.f32 1.442695, %v3989_v11  ;;  %v9979_v62 = vpop.eup %8222  ;;  %v9981_v14 = vpack.c.bf16 %v4330_v49, %v4326_v24  ;;  %v9984_v22 = vsub.f32 %v9875_v52, %v4326_v24  ;;  %v9987_v4 = vsub.f32 %v9903_v54, %v4330_v49 }
 0x3c2   : > { %v9989_v7 = vpop.eup %8224  ;;  %v9991_v37 = vpack.c.bf16 %v5536_v29, %v5532_v26  ;;  %v9994_v10 = vsub.f32 %v9885_v16, %v5532_v26  ;;  %v9997_v47 = vsub.f32 %v9912_v15, %v5536_v29  ;;  %8242 = vpow2.f32 %v4216_v21 }
 0x3c3   : > { %12004 = vst [vmem:[#allocation131_spill] sm:$0xff] %v9981_v14  ;;  %12005 = vst [vmem:[#allocation132_spill] sm:$0xff] %v9984_v22  ;;  %v8227_v17 = vpop.eup %8226  ;;  %6790 = vmatpush1.bf16.msra.mxu0 %v9981_v14  ;;  %8244 = vpow2.f32 %v4220_v34  ;;  %v4222_v52 = vmul.f32 1.442695, %v2157_v45  ;;  %v4226_v11 = vmul.f32 1.442695, %v3994_v61  ;;  %v10006_v45 = vsub.f32 %v9947_v19, %v4332_v58 }
 0x3c4   : > { %12006 = vst [vmem:[#allocation133_spill] sm:$0xff] %v9987_v4  ;;  %12007 = vst [vmem:[#allocation134_spill] sm:$0xff] %v9991_v37  ;;  %v4224_v24 = vmul.f32 1.442695, %v2159_v31  ;;  %v8229_v54 = vpop.eup %8228  ;;  %7126 = vmatpush1.bf16.msra.mxu1 %v9991_v37  ;;  %v4228_v49 = vmul.f32 1.442695, %v3996_v23 }
 0x3c5   : > { %v4336_v4 = vand.u32 4294901760, %v8219_v1  ;;  %v5538_v16 = vand.u32 4294901760, %v9950_v57  ;;  %8246 = vpow2.f32 %v4222_v52  ;;  %v5542_v15 = vand.u32 4294901760, %v8221_v2  ;;  %v8231_v21 = vpop.eup %8230 }
 0x3c6   : > { %v4230_v26 = vmul.f32 1.442695, %v2164_v48  ;;  %v4234_v29 = vmul.f32 1.442695, %v4001_v60  ;;  %8248 = vpow2.f32 %v4226_v11  ;;  %v10010_v31 = vpop.eup %8232  ;;  %v4334_v48 = vand.u32 4294901760, %v9927_v20 }
 0x3c7   : > { %v10003_v14 = vpack.c.bf16 %v4336_v4, %v4332_v58  ;;  %v10008_v61 = vsub.f32 %v8219_v1, %v4336_v4  ;;  %8250 = vpow2.f32 %v4224_v24  ;;  %v10012_v23 = vpack.c.bf16 %v5542_v15, %v5538_v16  ;;  %v8235_v60 = vpop.eup %8234 }
 0x3c8   : > { %v10015_v34 = vsub.f32 %v9950_v57, %v5538_v16  ;;  %v10017_v52 = vsub.f32 %v8221_v2, %v5542_v15  ;;  %8252 = vpow2.f32 %v4228_v49  ;;  %v4338_v19 = vand.u32 4294901760, %v9955_v3  ;;  %v8237_v4 = vpop.eup %8236 }
 0x3c9   : > { %12008 = vst [vmem:[#allocation135_spill] sm:$0xff] %v10003_v14  ;;  %12009 = vst [vmem:[#allocation136_spill] sm:$0xff] %v10008_v61  ;;  %6792 = vmatprep.subr.bf16.mxu0 %v10003_v14  ;;  %v5540_v1 = vand.u32 4294901760, %v9937_v6  ;;  %7128 = vmatprep.subr.bf16.mxu1 %v10012_v23  ;;  %8254 = vpow2.f32 %v4230_v26  ;;  %v5544_v58 = vand.u32 4294901760, %v9964_v38  ;;  %v4232_v57 = vmul.f32 1.442695, %v2166_v59  ;;  %v8239_v2 = vpop.eup %8238 }
 0x3ca   : > { %12010 = vst [vmem:[#allocation137_spill] sm:$0xff] %v10012_v23  ;;  %12011 = vst [vmem:[#allocation138_spill] sm:$0xff] %v10015_v34  ;;  %v4236_v11 = vmul.f32 1.442695, %v4003_v9  ;;  %8256 = vpow2.f32 %v4234_v29  ;;  %v10025_v24 = vpack.c.bf16 %v4338_v19, %v4334_v48  ;;  %v10028_v49 = vsub.f32 %v9927_v20, %v4334_v48  ;;  %v10033_v15 = vpop.eup %8240 }
 0x3cb   : > { %12012 = vst [vmem:[#allocation139_spill] sm:$0xff] %v10017_v52  ;;  %v10031_v16 = vsub.f32 %v9955_v3, %v4338_v19  ;;  %v10035_v37 = vpack.c.bf16 %v5544_v58, %v5540_v1  ;;  %v10038_v26 = vsub.f32 %v9937_v6, %v5540_v1  ;;  %v10041_v59 = vsub.f32 %v9964_v38, %v5544_v58 }
 0x3cc   : > { %12013 = vst [vmem:[#allocation140_spill] sm:$0xff] %v10025_v24  ;;  %12014 = vst [vmem:[#allocation141_spill] sm:$0xff] %v10028_v49  ;;  %8258 = vpow2.f32 %v4232_v57  ;;  %v8243_v9 = vpop.eup %8242  ;;  %6794 = vmatpush1.bf16.msra.mxu0 %v10025_v24  ;;  %v4340_v20 = vand.u32 4294901760, %v8227_v17  ;;  %v4344_v29 = vand.u32 4294901760, %v8235_v60  ;;  %v5546_v48 = vand.u32 4294901760, %v8229_v54 }
 0x3cd   : > { %12015 = vst [vmem:[#allocation142_spill] sm:$0xff] %v10031_v16  ;;  %12016 = vst [vmem:[#allocation143_spill] sm:$0xff] %v10035_v37  ;;  %8260 = vpow2.f32 %v4236_v11  ;;  %v8245_v3 = vpop.eup %8244  ;;  %7130 = vmatpush1.bf16.msra.mxu1 %v10035_v37  ;;  %v5550_v19 = vand.u32 4294901760, %v8237_v4  ;;  %v4342_v23 = vand.u32 4294901760, %v9979_v62  ;;  %v4346_v14 = vand.u32 4294901760, %v8231_v21 }
 0x3ce   : > { %12017 = vst [vmem:[#allocation144_spill] sm:$0xff] %v10038_v26  ;;  %12018 = vst [vmem:[#allocation145_spill] sm:$0xff] %v10041_v59  ;;  %v5548_v6 = vand.u32 4294901760, %v9989_v7  ;;  %v10047_v1 = vpack.c.bf16 %v4344_v29, %v4340_v20  ;;  %v10049_v38 = vsub.f32 %v8227_v17, %v4340_v20  ;;  %v10051_v58 = vsub.f32 %v8235_v60, %v4344_v29 }
 0x3cf   : > { %v10053_v57 = vsub.f32 %v8229_v54, %v5546_v48  ;;  %v8247_v11 = vpop.eup %8246  ;;  %v10055_v24 = vpack.c.bf16 %v5550_v19, %v5546_v48  ;;  %v10057_v59 = vsub.f32 %v8237_v4, %v5550_v19  ;;  %v10059_v37 = vpack.c.bf16 %v4346_v14, %v4342_v23 }
 0x3d0   : > { %12019 = vst [vmem:[#allocation146_spill] sm:$0xff] %v10047_v1  ;;  %12020 = vst [vmem:[#allocation147_spill] sm:$0xff] %v10049_v38  ;;  %v10062_v26 = vsub.f32 %v9979_v62, %v4342_v23  ;;  %v8249_v16 = vpop.eup %8248  ;;  %6796 = vmatprep.subr.bf16.mxu0 %v10047_v1  ;;  %v10065_v49 = vsub.f32 %v8231_v21, %v4346_v14  ;;  %v5552_v17 = vand.u32 4294901760, %v10010_v31  ;;  %v4348_v60 = vand.u32 4294901760, %v8243_v9 }
 0x3d1   : > { %12021 = vst [vmem:[#allocation148_spill] sm:$0xff] %v10051_v58  ;;  %12022 = vst [vmem:[#allocation149_spill] sm:$0xff] %v10053_v57  ;;  %v10069_v54 = vsub.f32 %v9989_v7, %v5548_v6  ;;  %v8251_v20 = vpop.eup %8250  ;;  %7132 = vmatprep.subr.bf16.mxu1 %v10055_v24  ;;  %6798 = vmatpush1.bf16.msra.mxu0 %v10059_v37  ;;  %v5554_v4 = vand.u32 4294901760, %v8245_v3  ;;  %v4350_v29 = vand.u32 4294901760, %v8239_v2  ;;  %v4354_v62 = vand.u32 4294901760, %v8247_v11 }
 0x3d2   : > { %12023 = vst [vmem:[#allocation150_spill] sm:$0xff] %v10055_v24  ;;  %12024 = vst [vmem:[#allocation151_spill] sm:$0xff] %v10057_v59  ;;  %v5556_v23 = vand.u32 4294901760, %v10033_v15  ;;  %v8253_v48 = vpop.eup %8252  ;;  %v10074_v19 = vpack.c.bf16 %v5552_v17, %v5548_v6  ;;  %v10077_v14 = vsub.f32 %v10010_v31, %v5552_v17  ;;  %v4352_v21 = vand.u32 4294901760, %v8251_v20 }
 0x3d3   : > { %12025 = vst [vmem:[#allocation152_spill] sm:$0xff] %v10059_v37  ;;  %12026 = vst [vmem:[#allocation153_spill] sm:$0xff] %v10062_v26  ;;  %v10079_v7 = vsub.f32 %v8243_v9, %v4348_v60  ;;  %v10081_v1 = vpop.eup %8254  ;;  %v10083_v24 = vsub.f32 %v8245_v3, %v5554_v4  ;;  %v10085_v37 = vpack.c.bf16 %v4354_v62, %v4350_v29  ;;  %v5560_v9 = vand.u32 4294901760, %v8249_v16 }
 0x3d4   : > { %12027 = vst [vmem:[#allocation154_spill] sm:$0xff] %v10065_v49  ;;  %12028 = vst [vmem:[#allocation155_spill] sm:$0xff] %v10069_v54  ;;  %v5558_v54 = vand.u32 4294901760, %v8253_v48  ;;  %v10087_v49 = vsub.f32 %v8239_v2, %v4350_v29  ;;  %v10089_v26 = vpop.eup %8256  ;;  %7134 = vmatpush1.bf16.msra.mxu1 %v10074_v19  ;;  %v10092_v6 = vpack.c.bf16 %v4352_v21, %v4348_v60  ;;  %v10108_v29 = vand.u32 4294901760, %v10081_v1  ;;  %v4238_v60 = vld [vmem:[%s11274_s2] sm:$0xff] }
 0x3d5   : > { %12029 = vst [vmem:[#allocation156_spill] sm:$0xff] %v10074_v19  ;;  %12030 = vst [vmem:[#allocation157_spill] sm:$0xff] %v10077_v14  ;;  %v10094_v31 = vsub.f32 %v8251_v20, %v4352_v21  ;;  %v10096_v17 = vsub.f32 %v8247_v11, %v4354_v62  ;;  %v10105_v2 = vsub.f32 %v10033_v15, %v5556_v23  ;;  %v10124_v15 = vand.u32 4294901760, %v10089_v26 }
 0x3d6   : > { %12031 = vst [vmem:[#allocation158_spill] sm:$0xff] %v10079_v7  ;;  %12032 = vst [vmem:[#allocation159_spill] sm:$0xff] %v10081_v1  ;;  %v10098_v7 = vpop.eup %8258  ;;  %v10100_v14 = vpack.c.bf16 %v5558_v54, %v5554_v4  ;;  %v10102_v3 = vsub.f32 %v8253_v48, %v5558_v54  ;;  %6800 = vmatprep.subr.bf16.mxu0 %v10092_v6  ;;  %v10116_v11 = vpack.c.bf16 %v5560_v9, %v5556_v23 }
 0x3d7   : > { %12033 = vst [vmem:[#allocation160_spill] sm:$0xff] %v10085_v37  ;;  %12034 = vst [vmem:[#allocation161_spill] sm:$0xff] %v10089_v26  ;;  %v10113_v20 = vpop.eup %8260  ;;  %v10118_v4 = vsub.f32 %v8249_v16, %v5560_v9  ;;  %v10121_v54 = vand.u32 4294901760, %v10098_v7  ;;  %6802 = vmatpush1.bf16.msra.mxu0 %v10085_v37  ;;  %v10132_v48 = vand.u32 4294901760, %v9573_v55  ;;  %v12043_v23 = vand.u32 4294901760, %v9445_v28 }
 0x3d8   : > { %12035 = vst [vmem:[#allocation162_spill] sm:$0xff] %v10092_v6  ;;  %12036 = vst [vmem:[#allocation163_spill] sm:$0xff] %v10100_v14  ;;  %7136 = vmatprep.subr.bf16.mxu1 %v10100_v14  ;;  %v10129_v62 = vand.u32 4294901760, %v10113_v20  ;;  %v11547_v21 = vand.u32 4294901760, %v9459_v5  ;;  %v11552_v9 = vand.u32 4294901760, %v9453_v35  ;;  %v10142_v14 = vand.u32 4294901760, %v4238_v60 }
 0x3d9   : > { %12037 = vst [vmem:[#allocation164_spill] sm:$0xff] %v10108_v29  ;;  %12038 = vst [vmem:[#allocation165_spill] sm:$0xff] %v10116_v11  ;;  %v4386_v16 = vsub.f32 %v9445_v28, %v12043_v23  ;;  %7138 = vmatpush1.bf16.msra.mxu1 %v10116_v11  ;;  %4357 = vmatprep.subr.mxu0 %v10121_v54  ;;  %v4369_v6 = vsub.f32 %v9573_v55, %v10132_v48  ;;  %v11559_v28 = vand.u32 4294901760, %v9466_v46 }
 0x3da   : > { %12039 = vst [vmem:[#allocation166_spill] sm:$0xff] %v10121_v54  ;;  %12040 = vst [vmem:[#allocation167_spill] sm:$0xff] %v10124_v15  ;;  %5563 = vmatprep.subr.mxu1 %v10129_v62  ;;  %v4398_v11 = vsub.f32 %v9459_v5, %v11547_v21  ;;  %v5592_v37 = vsub.f32 %v9453_v35, %v11552_v9  ;;  %v12045_v26 = vand.u32 4294901760, %v9474_v41  ;;  %v11568_v9 = vand.u32 4294901760, %v9443_v40 }
 0x3db   : > { %12041 = vst [vmem:[#allocation168_spill] sm:$0xff] %v10129_v62  ;;  %12042 = vst [vmem:[#allocation169_spill] sm:$0xff] %v10132_v48  ;;  %v4387_v23 = vand.u32 4294901760, %v4386_v16  ;;  %v10159_v1 = vsub.f32 %v4238_v60, %v10142_v14  ;;  %v12047_v48 = vand.u32 4294901760, %v9438_v50  ;;  %4359 = vmatpush1.msra.mxu0 %v10108_v29  ;;  %v4370_v21 = vand.u32 4294901760, %v4369_v6 }
 0x3dc   : > { %12044 = vst [vmem:[#allocation170_spill] sm:$0xff] %v10142_v14  ;;  %v5604_v19 = vsub.f32 %v9474_v41, %v12045_v26  ;;  %v4399_v55 = vand.u32 4294901760, %v4398_v11  ;;  %v4404_v5 = vsub.f32 %v9466_v46, %v11559_v28  ;;  %v5593_v26 = vand.u32 4294901760, %v5592_v37 }
 0x3dd   : > { %12046 = vst [vmem:[#allocation171_spill] sm:$0xff] %v10159_v1  ;;  %v4392_v16 = vsub.f32 %v9438_v50, %v12047_v48  ;;  %5565 = vmatpush1.msra.mxu1 %v10124_v15  ;;  %v10171_v60 = vand.u32 4294901760, %v10159_v1  ;;  %4371 = vmatprep.mubr.f32.mxu0 %v4370_v21  ;;  %v5598_v6 = vsub.f32 %v9443_v40, %v11568_v9  ;;  %v11566_v11 = vand.u32 4294901760, %v9470_v12 }
 0x3de   : > { %v5605_v41 = vand.u32 4294901760, %v5604_v19  ;;  %v6803_v48 = vpack.c.bf16 %v4399_v55, %v4387_v23  ;;  %5577 = vmatprep.mubr.f32.mxu1 %v4370_v21  ;;  %v4405_v35 = vand.u32 4294901760, %v4404_v5  ;;  %v11564_v37 = vand.u32 4294901760, %v9486_v27 }
 0x3df   : > { %12048 = vst [vmem:[#allocation172_spill] sm:$0xff] %v10171_v60  ;;  %v4393_v14 = vand.u32 4294901760, %v4392_v16  ;;  %v4375_v46 = vsub.f32 %v10159_v1, %v10171_v60  ;;  %v11565_v19 = vand.u32 4294901760, %v9492_v25  ;;  %v5599_v50 = vand.u32 4294901760, %v5598_v6  ;;  %v12051_v60 = vld [vmem:[#allocation44_spill] sm:$0xff] }
 0x3e0   : > { %v7139_v28 = vpack.c.bf16 %v5605_v41, %v5593_v26  ;;  %6804 = vmatprep.subr.bf16.mxu0 %v6803_v48  ;;  %v5610_v5 = vsub.f32 %v9470_v12, %v11566_v11  ;;  %v11567_v55 = vand.u32 4294901760, %v9495_v43  ;;  %v4410_v41 = vsub.f32 %v9486_v27, %v11564_v37 }
 0x3e1   : > { %v6805_v16 = vpack.c.bf16 %v4405_v35, %v4393_v14  ;;  %v4376_v21 = vand.u32 4294901760, %v4375_v46  ;;  %v4422_v23 = vsub.f32 %v9492_v25, %v11565_v19  ;;  %v11571_v26 = vand.u32 4294901760, %v9511_v51 }
 0x3e2   : > { %7140 = vmatprep.subr.bf16.mxu1 %v7139_v28  ;;  %v5611_v35 = vand.u32 4294901760, %v5610_v5  ;;  %v5616_v14 = vsub.f32 %v9495_v43, %v11567_v55  ;;  %v11569_v48 = vand.u32 4294901760, %v9503_v13  ;;  %v11570_v28 = vand.u32 4294901760, %v9505_v18 }
 0x3e3   : > { %4377 = vmatmul.mubr.f32.vlgmr.msra.gmra.mrb[58].mxu0 %v4376_v21  ;;  %5583 = vmatmul.mubr.f32.vlgmr.msra.gmra.mrb[58].mxu1 %v4376_v21  ;;  %v4411_v46 = vand.u32 4294901760, %v4410_v41  ;;  %v4423_v6 = vand.u32 4294901760, %v4422_v23  ;;  %v5628_v37 = vsub.f32 %v9511_v51, %v11571_v26  ;;  %v11573_v19 = vand.u32 4294901760, %v9518_v42 }
 0x3e4   : > { %6806 = vmatpush1.bf16.msra.mxu0 %v6805_v16  ;;  %v7141_v5 = vpack.c.bf16 %v5611_v35, %v5599_v50  ;;  %v5617_v11 = vand.u32 4294901760, %v5616_v14  ;;  %v4416_v55 = vsub.f32 %v9503_v13, %v11569_v48  ;;  %v4428_v9 = vsub.f32 %v9505_v18, %v11570_v28  ;;  %4738 = vmatprep.mubr.f32.mxu0 %v9448_v33 }
 0x3e5   : > { %v6807_v21 = vpack.c.bf16 %v4423_v6, %v4411_v46  ;;  %v5629_v41 = vand.u32 4294901760, %v5628_v37  ;;  %v5622_v23 = vsub.f32 %v9518_v42, %v11573_v19  ;;  %v11572_v16 = vand.u32 4294901760, %v9524_v8  ;;  %5944 = vmatprep.mubr.f32.mxu1 %v9448_v33 }
 0x3e6   : > { %7142 = vmatpush1.bf16.msra.mxu1 %v7141_v5  ;;  %v4417_v50 = vand.u32 4294901760, %v4416_v55  ;;  %v4429_v35 = vand.u32 4294901760, %v4428_v9  ;;  %v11576_v14 = vand.u32 4294901760, %v9528_v39  ;;  %v11574_v48 = vand.u32 4294901760, %v9537_v30 }
 0x3e7   : > { %6808 = vmatprep.subr.bf16.mxu0 %v6807_v21  ;;  %v7143_v28 = vpack.c.bf16 %v5629_v41, %v5617_v11  ;;  %v5623_v26 = vand.u32 4294901760, %v5622_v23  ;;  %v5634_v37 = vsub.f32 %v9524_v8, %v11572_v16  ;;  %v11575_v46 = vand.u32 4294901760, %v9551_v32 }
 0x3e8   : > { %v6809_v6 = vpack.c.bf16 %v4429_v35, %v4417_v50  ;;  %v4434_v5 = vsub.f32 %v9528_v39, %v11576_v14  ;;  %v4446_v9 = vsub.f32 %v9537_v30, %v11574_v48  ;;  %v11577_v55 = vand.u32 4294901760, %v9553_v0 }
 0x3e9   : > { %7144 = vmatprep.subr.bf16.mxu1 %v7143_v28  ;;  %v5635_v11 = vand.u32 4294901760, %v5634_v37  ;;  %v5640_v21 = vsub.f32 %v9551_v32, %v11575_v46  ;;  %v11584_v41 = vand.u32 4294901760, %v9561_v36  ;;  %v11587_v23 = vand.u32 4294901760, %v9564_v56 }
 0x3ea   : > { %6810 = vmatpush1.bf16.msra.mxu0 %v6809_v6  ;;  %v4435_v50 = vand.u32 4294901760, %v4434_v5  ;;  %v4447_v35 = vand.u32 4294901760, %v4446_v9  ;;  %v5652_v16 = vsub.f32 %v9553_v0, %v11577_v55  ;;  %v11588_v19 = vand.u32 4294901760, %v9568_v63  ;;  %v12049_v9 = vld [vmem:[#allocation41_spill] sm:$0xff] }
 0x3eb   : > { %v7145_v48 = vpack.c.bf16 %v5635_v11, %v5623_v26  ;;  %v5641_v28 = vand.u32 4294901760, %v5640_v21  ;;  %v4440_v37 = vsub.f32 %v9561_v36, %v11584_v41  ;;  %v4452_v46 = vsub.f32 %v9564_v56, %v11587_v23  ;;  %v12050_v11 = vld [vmem:[#allocation43_spill] sm:$0xff] }
 0x3ec   : > { %v6811_v14 = vpack.c.bf16 %v4447_v35, %v4435_v50  ;;  %v5653_v6 = vand.u32 4294901760, %v5652_v16  ;;  %v5646_v5 = vsub.f32 %v9568_v63, %v11588_v19  ;;  %v11589_v55 = vand.u32 4294901760, %v12049_v9  ;;  %v12052_v50 = vld [vmem:[#allocation46_spill] sm:$0xff]  ;;  %v12059_v63 = vld [vmem:[#allocation56_spill] sm:$0xff] }
 0x3ed   : > { %7146 = vmatpush1.bf16.msra.mxu1 %v7145_v48  ;;  %v4441_v33 = vand.u32 4294901760, %v4440_v37  ;;  %v4453_v26 = vand.u32 4294901760, %v4452_v46  ;;  %v11591_v21 = vand.u32 4294901760, %v12050_v11  ;;  %v11592_v1 = vand.u32 4294901760, %v12051_v60  ;;  %v12053_v37 = vld [vmem:[#allocation47_spill] sm:$0xff] }
 0x3ee   : > { %6812 = vmatprep.subr.bf16.mxu0 %v6811_v14  ;;  %v7147_v41 = vpack.c.bf16 %v5653_v6, %v5641_v28  ;;  %v5647_v36 = vand.u32 4294901760, %v5646_v5  ;;  %v5658_v16 = vsub.f32 %v12049_v9, %v11589_v55  ;;  %v11595_v35 = vand.u32 4294901760, %v12052_v50  ;;  %v12054_v6 = vld [vmem:[#allocation49_spill] sm:$0xff]  ;;  %v12055_v55 = vld [vmem:[#allocation50_spill] sm:$0xff] }
 0x3ef   : > { %v6813_v23 = vpack.c.bf16 %v4453_v26, %v4441_v33  ;;  %v4458_v48 = vsub.f32 %v12050_v11, %v11591_v21  ;;  %v4470_v46 = vsub.f32 %v12051_v60, %v11592_v1  ;;  %v11597_v19 = vand.u32 4294901760, %v12053_v37  ;;  %v12056_v1 = vld [vmem:[#allocation52_spill] sm:$0xff] }
 0x3f0   : > { %7148 = vmatprep.subr.bf16.mxu1 %v7147_v41  ;;  %v5659_v14 = vand.u32 4294901760, %v5658_v16  ;;  %v5664_v28 = vsub.f32 %v12052_v50, %v11595_v35  ;;  %v11603_v5 = vand.u32 4294901760, %v12054_v6  ;;  %v11605_v33 = vand.u32 4294901760, %v12055_v55 }
 0x3f1   : > { %6814 = vmatpush1.bf16.msra.mxu0 %v6813_v23  ;;  %v4459_v26 = vand.u32 4294901760, %v4458_v48  ;;  %v4471_v9 = vand.u32 4294901760, %v4470_v46  ;;  %v5676_v21 = vsub.f32 %v12053_v37, %v11597_v19  ;;  %v11606_v60 = vand.u32 4294901760, %v12056_v1  ;;  %v12057_v46 = vld [vmem:[#allocation53_spill] sm:$0xff] }
 0x3f2   : > { %v7149_v11 = vpack.c.bf16 %v5659_v14, %v5647_v36  ;;  %v5665_v41 = vand.u32 4294901760, %v5664_v28  ;;  %v4464_v16 = vsub.f32 %v12054_v6, %v11603_v5  ;;  %v4476_v35 = vsub.f32 %v12055_v55, %v11605_v33  ;;  %v12058_v14 = vld [vmem:[#allocation55_spill] sm:$0xff] }
 0x3f3   : > { %v6815_v50 = vpack.c.bf16 %v4471_v9, %v4459_v26  ;;  %v5677_v23 = vand.u32 4294901760, %v5676_v21  ;;  %v5670_v48 = vsub.f32 %v12056_v1, %v11606_v60  ;;  %v11607_v19 = vand.u32 4294901760, %v12057_v46  ;;  %v12060_v21 = vld [vmem:[#allocation58_spill] sm:$0xff] }
 0x3f4   : > { %7150 = vmatpush1.bf16.msra.mxu1 %v7149_v11  ;;  %v4465_v37 = vand.u32 4294901760, %v4464_v16  ;;  %v4477_v36 = vand.u32 4294901760, %v4476_v35  ;;  %v11609_v28 = vand.u32 4294901760, %v12058_v14  ;;  %v11610_v56 = vand.u32 4294901760, %v12059_v63  ;;  %v12061_v16 = vld [vmem:[#allocation59_spill] sm:$0xff] }
 0x3f5   : > { %6816 = vmatprep.subr.bf16.mxu0 %v6815_v50  ;;  %v7151_v5 = vpack.c.bf16 %v5677_v23, %v5665_v41  ;;  %v5671_v6 = vand.u32 4294901760, %v5670_v48  ;;  %v5682_v9 = vsub.f32 %v12057_v46, %v11607_v19  ;;  %v11613_v26 = vand.u32 4294901760, %v12060_v21  ;;  %v12062_v23 = vld [vmem:[#allocation61_spill] sm:$0xff]  ;;  %v12063_v19 = vld [vmem:[#allocation62_spill] sm:$0xff] }
 0x3f6   : > { %v6817_v33 = vpack.c.bf16 %v4477_v36, %v4465_v37  ;;  %v4482_v11 = vsub.f32 %v12058_v14, %v11609_v28  ;;  %v4494_v35 = vsub.f32 %v12059_v63, %v11610_v56  ;;  %v11615_v60 = vand.u32 4294901760, %v12061_v16  ;;  %v12064_v56 = vld [vmem:[#allocation64_spill] sm:$0xff] }
 0x3f7   : > { %7152 = vmatprep.subr.bf16.mxu1 %v7151_v5  ;;  %v5683_v50 = vand.u32 4294901760, %v5682_v9  ;;  %v5688_v41 = vsub.f32 %v12060_v21, %v11613_v26  ;;  %v11619_v48 = vand.u32 4294901760, %v12062_v23  ;;  %v11621_v37 = vand.u32 4294901760, %v12063_v19  ;;  %v12067_v14 = vld [vmem:[#allocation68_spill] sm:$0xff] }
 0x3f8   : > { %6818 = vmatpush1.bf16.msra.mxu0 %v6817_v33  ;;  %v4483_v36 = vand.u32 4294901760, %v4482_v11  ;;  %v4495_v46 = vand.u32 4294901760, %v4494_v35  ;;  %v5700_v28 = vsub.f32 %v12061_v16, %v11615_v60  ;;  %v11622_v1 = vand.u32 4294901760, %v12064_v56  ;;  %v12065_v35 = vld [vmem:[#allocation65_spill] sm:$0xff] }
 0x3f9   : > { %v7153_v63 = vpack.c.bf16 %v5683_v50, %v5671_v6  ;;  %v5689_v5 = vand.u32 4294901760, %v5688_v41  ;;  %v4488_v9 = vsub.f32 %v12062_v23, %v11619_v48  ;;  %v4500_v26 = vsub.f32 %v12063_v19, %v11621_v37  ;;  %v12066_v50 = vld [vmem:[#allocation67_spill] sm:$0xff] }
 0x3fa   : > { %v6819_v21 = vpack.c.bf16 %v4495_v46, %v4483_v36  ;;  %v5701_v33 = vand.u32 4294901760, %v5700_v28  ;;  %v5694_v11 = vsub.f32 %v12064_v56, %v11622_v1  ;;  %v11623_v60 = vand.u32 4294901760, %v12065_v35  ;;  %v12068_v28 = vld [vmem:[#allocation70_spill] sm:$0xff] }
 0x3fb   : > { %7154 = vmatpush1.bf16.msra.mxu1 %v7153_v63  ;;  %v4489_v16 = vand.u32 4294901760, %v4488_v9  ;;  %v4501_v6 = vand.u32 4294901760, %v4500_v26  ;;  %v11625_v41 = vand.u32 4294901760, %v12066_v50  ;;  %v11626_v55 = vand.u32 4294901760, %v12067_v14  ;;  %v12069_v9 = vld [vmem:[#allocation71_spill] sm:$0xff] }
 0x3fc   : > { %6820 = vmatprep.subr.bf16.mxu0 %v6819_v21  ;;  %v7155_v48 = vpack.c.bf16 %v5701_v33, %v5689_v5  ;;  %v5695_v23 = vand.u32 4294901760, %v5694_v11  ;;  %v5706_v46 = vsub.f32 %v12065_v35, %v11623_v60  ;;  %v11629_v36 = vand.u32 4294901760, %v12068_v28  ;;  %v12070_v33 = vld [vmem:[#allocation72_spill] sm:$0xff]  ;;  %v12071_v60 = vld [vmem:[#allocation74_spill] sm:$0xff] }
 0x3fd   : > { %v6821_v37 = vpack.c.bf16 %v4501_v6, %v4489_v16  ;;  %v4506_v63 = vsub.f32 %v12066_v50, %v11625_v41  ;;  %v4518_v26 = vsub.f32 %v12067_v14, %v11626_v55  ;;  %v11631_v1 = vand.u32 4294901760, %v12069_v9  ;;  %v12072_v55 = vld [vmem:[#allocation76_spill] sm:$0xff] }
 0x3fe   : > { %7156 = vmatprep.subr.bf16.mxu1 %v7155_v48  ;;  %v5707_v21 = vand.u32 4294901760, %v5706_v46  ;;  %v5712_v5 = vsub.f32 %v12068_v28, %v11629_v36  ;;  %v11635_v11 = vand.u32 4294901760, %v12070_v33  ;;  %v11637_v16 = vand.u32 4294901760, %v12071_v60  ;;  %v12075_v50 = vld [vmem:[#allocation80_spill] sm:$0xff] }
 0x3ff   : > { %6822 = vmatpush1.bf16.msra.mxu0 %v6821_v37  ;;  %v4507_v6 = vand.u32 4294901760, %v4506_v63  ;;  %v4519_v35 = vand.u32 4294901760, %v4518_v26  ;;  %v5724_v41 = vsub.f32 %v12069_v9, %v11631_v1  ;;  %v11638_v56 = vand.u32 4294901760, %v12072_v55  ;;  %v12073_v26 = vld [vmem:[#allocation77_spill] sm:$0xff] }
 0x400   : > { %v7157_v14 = vpack.c.bf16 %v5707_v21, %v5695_v23  ;;  %v5713_v48 = vand.u32 4294901760, %v5712_v5  ;;  %v4512_v46 = vsub.f32 %v12070_v33, %v11635_v11  ;;  %v4524_v36 = vsub.f32 %v12071_v60, %v11637_v16  ;;  %v12074_v21 = vld [vmem:[#allocation79_spill] sm:$0xff] }
 0x401   : > { %v6823_v28 = vpack.c.bf16 %v4519_v35, %v4507_v6  ;;  %v5725_v37 = vand.u32 4294901760, %v5724_v41  ;;  %v5718_v63 = vsub.f32 %v12072_v55, %v11638_v56  ;;  %v11639_v1 = vand.u32 4294901760, %v12073_v26  ;;  %v12076_v41 = vld [vmem:[#allocation82_spill] sm:$0xff]  ;;  %v12083_v55 = vld [vmem:[#allocation92_spill] sm:$0xff] }
 0x402   : > { %7158 = vmatpush1.bf16.msra.mxu1 %v7157_v14  ;;  %v4513_v9 = vand.u32 4294901760, %v4512_v46  ;;  %v4525_v23 = vand.u32 4294901760, %v4524_v36  ;;  %v11641_v5 = vand.u32 4294901760, %v12074_v21  ;;  %v11642_v19 = vand.u32 4294901760, %v12075_v50  ;;  %v12077_v46 = vld [vmem:[#allocation83_spill] sm:$0xff] }
 0x403   : > { %6824 = vmatprep.subr.bf16.mxu0 %v6823_v28  ;;  %v7159_v11 = vpack.c.bf16 %v5725_v37, %v5713_v48  ;;  %v5719_v33 = vand.u32 4294901760, %v5718_v63  ;;  %v5730_v35 = vsub.f32 %v12073_v26, %v11639_v1  ;;  %v11645_v6 = vand.u32 4294901760, %v12076_v41  ;;  %v12078_v37 = vld [vmem:[#allocation85_spill] sm:$0xff]  ;;  %v12079_v1 = vld [vmem:[#allocation86_spill] sm:$0xff] }
 0x404   : > { %v6825_v16 = vpack.c.bf16 %v4525_v23, %v4513_v9  ;;  %v4530_v14 = vsub.f32 %v12074_v21, %v11641_v5  ;;  %v4542_v36 = vsub.f32 %v12075_v50, %v11642_v19  ;;  %v11647_v56 = vand.u32 4294901760, %v12077_v46  ;;  %v12080_v19 = vld [vmem:[#allocation88_spill] sm:$0xff] }
 0x405   : > { %7160 = vmatprep.subr.bf16.mxu1 %v7159_v11  ;;  %v5731_v28 = vand.u32 4294901760, %v5730_v35  ;;  %v5736_v48 = vsub.f32 %v12076_v41, %v11645_v6  ;;  %v11651_v63 = vand.u32 4294901760, %v12078_v37  ;;  %v11653_v9 = vand.u32 4294901760, %v12079_v1 }
 0x406   : > { %6826 = vmatpush1.bf16.msra.mxu0 %v6825_v16  ;;  %v4531_v23 = vand.u32 4294901760, %v4530_v14  ;;  %v4543_v26 = vand.u32 4294901760, %v4542_v36  ;;  %v5748_v5 = vsub.f32 %v12077_v46, %v11647_v56  ;;  %v11654_v50 = vand.u32 4294901760, %v12080_v19  ;;  %v12081_v36 = vld [vmem:[#allocation89_spill] sm:$0xff] }
 0x407   : > { %v7161_v21 = vpack.c.bf16 %v5731_v28, %v5719_v33  ;;  %v5737_v11 = vand.u32 4294901760, %v5736_v48  ;;  %v4536_v35 = vsub.f32 %v12078_v37, %v11651_v63  ;;  %v4548_v6 = vsub.f32 %v12079_v1, %v11653_v9  ;;  %v12082_v28 = vld [vmem:[#allocation91_spill] sm:$0xff] }
 0x408   : > { %v6827_v41 = vpack.c.bf16 %v4543_v26, %v4531_v23  ;;  %v5749_v16 = vand.u32 4294901760, %v5748_v5  ;;  %v5742_v14 = vsub.f32 %v12080_v19, %v11654_v50  ;;  %v11655_v56 = vand.u32 4294901760, %v12081_v36  ;;  %v12084_v5 = vld [vmem:[#allocation94_spill] sm:$0xff] }
 0x409   : > { %7162 = vmatpush1.bf16.msra.mxu1 %v7161_v21  ;;  %v4537_v46 = vand.u32 4294901760, %v4536_v35  ;;  %v4549_v33 = vand.u32 4294901760, %v4548_v6  ;;  %v11657_v48 = vand.u32 4294901760, %v12082_v28  ;;  %v11658_v60 = vand.u32 4294901760, %v12083_v55  ;;  %v12085_v35 = vld [vmem:[#allocation95_spill] sm:$0xff] }
 0x40a   : > { %6828 = vmatprep.subr.bf16.mxu0 %v6827_v41  ;;  %v7163_v63 = vpack.c.bf16 %v5749_v16, %v5737_v11  ;;  %v5743_v37 = vand.u32 4294901760, %v5742_v14  ;;  %v5754_v26 = vsub.f32 %v12081_v36, %v11655_v56  ;;  %v11661_v23 = vand.u32 4294901760, %v12084_v5  ;;  %v12086_v16 = vld [vmem:[#allocation97_spill] sm:$0xff]  ;;  %v12087_v56 = vld [vmem:[#allocation98_spill] sm:$0xff] }
 0x40b   : > { %v6829_v9 = vpack.c.bf16 %v4549_v33, %v4537_v46  ;;  %v4554_v21 = vsub.f32 %v12082_v28, %v11657_v48  ;;  %v4566_v6 = vsub.f32 %v12083_v55, %v11658_v60  ;;  %v11663_v50 = vand.u32 4294901760, %v12085_v35  ;;  %v12088_v60 = vld [vmem:[#allocation100_spill] sm:$0xff] }
 0x40c   : > { %7164 = vmatprep.subr.bf16.mxu1 %v7163_v63  ;;  %v5755_v41 = vand.u32 4294901760, %v5754_v26  ;;  %v5760_v11 = vsub.f32 %v12084_v5, %v11661_v23  ;;  %v11667_v14 = vand.u32 4294901760, %v12086_v16  ;;  %v11669_v46 = vand.u32 4294901760, %v12087_v56  ;;  %v12091_v55 = vld [vmem:[#allocation104_spill] sm:$0xff] }
 0x40d   : > { %6830 = vmatpush1.bf16.msra.mxu0 %v6829_v9  ;;  %v4555_v33 = vand.u32 4294901760, %v4554_v21  ;;  %v4567_v36 = vand.u32 4294901760, %v4566_v6  ;;  %v5772_v48 = vsub.f32 %v12085_v35, %v11663_v50  ;;  %v11670_v19 = vand.u32 4294901760, %v12088_v60  ;;  %v12089_v6 = vld [vmem:[#allocation101_spill] sm:$0xff] }
 0x40e   : > { %v7165_v1 = vpack.c.bf16 %v5755_v41, %v5743_v37  ;;  %v5761_v63 = vand.u32 4294901760, %v5760_v11  ;;  %v4560_v26 = vsub.f32 %v12086_v16, %v11667_v14  ;;  %v4572_v23 = vsub.f32 %v12087_v56, %v11669_v46  ;;  %v12090_v41 = vld [vmem:[#allocation103_spill] sm:$0xff] }
 0x40f   : > { %v6831_v5 = vpack.c.bf16 %v4567_v36, %v4555_v33  ;;  %v5773_v9 = vand.u32 4294901760, %v5772_v48  ;;  %v5766_v21 = vsub.f32 %v12088_v60, %v11670_v19  ;;  %v11671_v50 = vand.u32 4294901760, %v12089_v6  ;;  %v12092_v48 = vld [vmem:[#allocation106_spill] sm:$0xff]  ;;  %v12099_v60 = vld [vmem:[#allocation116_spill] sm:$0xff] }
 0x410   : > { %7166 = vmatpush1.bf16.msra.mxu1 %v7165_v1  ;;  %v4561_v35 = vand.u32 4294901760, %v4560_v26  ;;  %v4573_v37 = vand.u32 4294901760, %v4572_v23  ;;  %v11673_v11 = vand.u32 4294901760, %v12090_v41  ;;  %v11674_v28 = vand.u32 4294901760, %v12091_v55  ;;  %v12093_v26 = vld [vmem:[#allocation107_spill] sm:$0xff] }
 0x411   : > { %6832 = vmatprep.subr.bf16.mxu0 %v6831_v5  ;;  %v7167_v14 = vpack.c.bf16 %v5773_v9, %v5761_v63  ;;  %v5767_v16 = vand.u32 4294901760, %v5766_v21  ;;  %v5778_v36 = vsub.f32 %v12089_v6, %v11671_v50  ;;  %v11677_v33 = vand.u32 4294901760, %v12092_v48  ;;  %v12094_v9 = vld [vmem:[#allocation109_spill] sm:$0xff]  ;;  %v12095_v50 = vld [vmem:[#allocation110_spill] sm:$0xff] }
 0x412   : > { %v6833_v46 = vpack.c.bf16 %v4573_v37, %v4561_v35  ;;  %v4578_v1 = vsub.f32 %v12090_v41, %v11673_v11  ;;  %v4590_v23 = vsub.f32 %v12091_v55, %v11674_v28  ;;  %v11679_v19 = vand.u32 4294901760, %v12093_v26  ;;  %v12096_v28 = vld [vmem:[#allocation112_spill] sm:$0xff] }
 0x413   : > { %7168 = vmatprep.subr.bf16.mxu1 %v7167_v14  ;;  %v5779_v5 = vand.u32 4294901760, %v5778_v36  ;;  %v5784_v63 = vsub.f32 %v12092_v48, %v11677_v33  ;;  %v11683_v21 = vand.u32 4294901760, %v12094_v9  ;;  %v11685_v35 = vand.u32 4294901760, %v12095_v50 }
 0x414   : > { %6834 = vmatpush1.bf16.msra.mxu0 %v6833_v46  ;;  %v4579_v37 = vand.u32 4294901760, %v4578_v1  ;;  %v4591_v6 = vand.u32 4294901760, %v4590_v23  ;;  %v5796_v11 = vsub.f32 %v12093_v26, %v11679_v19  ;;  %v11686_v55 = vand.u32 4294901760, %v12096_v28  ;;  %v12097_v23 = vld [vmem:[#allocation113_spill] sm:$0xff] }
 0x415   : > { %v7169_v41 = vpack.c.bf16 %v5779_v5, %v5767_v16  ;;  %v5785_v14 = vand.u32 4294901760, %v5784_v63  ;;  %v4584_v36 = vsub.f32 %v12094_v9, %v11683_v21  ;;  %v4596_v33 = vsub.f32 %v12095_v50, %v11685_v35  ;;  %v12098_v5 = vld [vmem:[#allocation115_spill] sm:$0xff] }
 0x416   : > { %v6835_v48 = vpack.c.bf16 %v4591_v6, %v4579_v37  ;;  %v5797_v46 = vand.u32 4294901760, %v5796_v11  ;;  %v5790_v1 = vsub.f32 %v12096_v28, %v11686_v55  ;;  %v11687_v19 = vand.u32 4294901760, %v12097_v23  ;;  %v12100_v11 = vld [vmem:[#allocation118_spill] sm:$0xff]  ;;  %v12167_v28 = vld [vmem:[#allocation149_spill] sm:$0xff]  ;;  %v12172_v50 = vld [vmem:[#allocation39_spill] sm:$0xff] }
 0x417   : > { %7170 = vmatpush1.bf16.msra.mxu1 %v7169_v41  ;;  %v4585_v26 = vand.u32 4294901760, %v4584_v36  ;;  %v4597_v16 = vand.u32 4294901760, %v4596_v33  ;;  %v11689_v63 = vand.u32 4294901760, %v12098_v5  ;;  %v11690_v56 = vand.u32 4294901760, %v12099_v60  ;;  %v12101_v36 = vld [vmem:[#allocation119_spill] sm:$0xff] }
 0x418   : > { %6836 = vmatprep.subr.bf16.mxu0 %v6835_v48  ;;  %v7171_v21 = vpack.c.bf16 %v5797_v46, %v5785_v14  ;;  %v5791_v9 = vand.u32 4294901760, %v5790_v1  ;;  %v5802_v6 = vsub.f32 %v12097_v23, %v11687_v19  ;;  %v11693_v37 = vand.u32 4294901760, %v12100_v11  ;;  %v12102_v46 = vld [vmem:[#allocation121_spill] sm:$0xff]  ;;  %v12103_v19 = vld [vmem:[#allocation122_spill] sm:$0xff] }
 0x419   : > { %v6837_v35 = vpack.c.bf16 %v4597_v16, %v4585_v26  ;;  %v4602_v41 = vsub.f32 %v12098_v5, %v11689_v63  ;;  %v4614_v33 = vsub.f32 %v12099_v60, %v11690_v56  ;;  %v11695_v55 = vand.u32 4294901760, %v12101_v36  ;;  %v12104_v56 = vld [vmem:[#allocation124_spill] sm:$0xff] }
 0x41a   : > { %7172 = vmatprep.subr.bf16.mxu1 %v7171_v21  ;;  %v5803_v48 = vand.u32 4294901760, %v5802_v6  ;;  %v5808_v14 = vsub.f32 %v12100_v11, %v11693_v37  ;;  %v11697_v1 = vand.u32 4294901760, %v12102_v46  ;;  %v11699_v26 = vand.u32 4294901760, %v12103_v19 }
 0x41b   : > { %6838 = vmatpush1.bf16.msra.mxu0 %v6837_v35  ;;  %v4603_v16 = vand.u32 4294901760, %v4602_v41  ;;  %v4615_v23 = vand.u32 4294901760, %v4614_v33  ;;  %v5820_v63 = vsub.f32 %v12101_v36, %v11695_v55  ;;  %v11700_v60 = vand.u32 4294901760, %v12104_v56  ;;  %v12105_v33 = vld [vmem:[#allocation125_spill] sm:$0xff] }
 0x41c   : > { %v7173_v5 = vpack.c.bf16 %v5803_v48, %v5791_v9  ;;  %v5809_v21 = vand.u32 4294901760, %v5808_v14  ;;  %v4608_v6 = vsub.f32 %v12102_v46, %v11697_v1  ;;  %v4620_v37 = vsub.f32 %v12103_v19, %v11699_v26 }
 0x41d   : > { %v6839_v11 = vpack.c.bf16 %v4615_v23, %v4603_v16  ;;  %v5821_v35 = vand.u32 4294901760, %v5820_v63  ;;  %v5814_v41 = vsub.f32 %v12104_v56, %v11700_v60  ;;  %v11701_v55 = vand.u32 4294901760, %v12105_v33  ;;  %v12106_v63 = vld [vmem:[#allocation129_spill] sm:$0xff] }
 0x41e   : > { %7174 = vmatpush1.bf16.msra.mxu1 %v7173_v5  ;;  %v4609_v36 = vand.u32 4294901760, %v4608_v6  ;;  %v4621_v9 = vand.u32 4294901760, %v4620_v37  ;;  %v11702_v48 = vand.u32 4294901760, %v9960_v44  ;;  %v11703_v14 = vand.u32 4294901760, %v9962_v53  ;;  %v12107_v6 = vld [vmem:[#allocation130_spill] sm:$0xff] }
 0x41f   : > { %6840 = vmatprep.subr.bf16.mxu0 %v6839_v11  ;;  %v7175_v1 = vpack.c.bf16 %v5821_v35, %v5809_v21  ;;  %v5815_v46 = vand.u32 4294901760, %v5814_v41  ;;  %v5826_v23 = vsub.f32 %v12105_v33, %v11701_v55  ;;  %v11706_v16 = vand.u32 4294901760, %v12106_v63  ;;  %v12108_v41 = vld [vmem:[#allocation133_spill] sm:$0xff] }
 0x420   : > { %v6841_v26 = vpack.c.bf16 %v4621_v9, %v4609_v36  ;;  %v4626_v5 = vsub.f32 %v9960_v44, %v11702_v48  ;;  %v4638_v37 = vsub.f32 %v9962_v53, %v11703_v14  ;;  %v11708_v60 = vand.u32 4294901760, %v12107_v6 }
 0x421   : > { %7176 = vmatprep.subr.bf16.mxu1 %v7175_v1  ;;  %v5827_v11 = vand.u32 4294901760, %v5826_v23  ;;  %v5832_v21 = vsub.f32 %v12106_v63, %v11706_v16  ;;  %v11709_v35 = vand.u32 4294901760, %v9984_v22  ;;  %v11716_v36 = vand.u32 4294901760, %v12108_v41 }
 0x422   : > { %6842 = vmatpush1.bf16.msra.mxu0 %v6841_v26  ;;  %v4627_v9 = vand.u32 4294901760, %v4626_v5  ;;  %v4639_v55 = vand.u32 4294901760, %v4638_v37  ;;  %v5844_v48 = vsub.f32 %v12107_v6, %v11708_v60  ;;  %v11713_v14 = vand.u32 4294901760, %v9994_v10 }
 0x423   : > { %v7177_v53 = vpack.c.bf16 %v5827_v11, %v5815_v46  ;;  %v5833_v1 = vand.u32 4294901760, %v5832_v21  ;;  %v4632_v23 = vsub.f32 %v9984_v22, %v11709_v35  ;;  %v4644_v16 = vsub.f32 %v12108_v41, %v11716_v36 }
 0x424   : > { %v6843_v63 = vpack.c.bf16 %v4639_v55, %v4627_v9  ;;  %v5845_v26 = vand.u32 4294901760, %v5844_v48  ;;  %v5838_v5 = vsub.f32 %v9994_v10, %v11713_v14  ;;  %v11712_v37 = vand.u32 4294901760, %v9997_v47 }
 0x425   : > { %7178 = vmatpush1.bf16.msra.mxu1 %v7177_v53  ;;  %v4633_v60 = vand.u32 4294901760, %v4632_v23  ;;  %v4645_v46 = vand.u32 4294901760, %v4644_v16  ;;  %v11714_v11 = vand.u32 4294901760, %v10006_v45  ;;  %v11715_v21 = vand.u32 4294901760, %v10008_v61 }
 0x426   : > { %6844 = vmatprep.subr.bf16.mxu0 %v6843_v63  ;;  %v7179_v35 = vpack.c.bf16 %v5845_v26, %v5833_v1  ;;  %v5839_v22 = vand.u32 4294901760, %v5838_v5  ;;  %v5850_v55 = vsub.f32 %v9997_v47, %v11712_v37  ;;  %v11719_v48 = vand.u32 4294901760, %v10015_v34  ;;  %v12109_v26 = vld [vmem:[#allocation141_spill] sm:$0xff]  ;;  %v12110_v37 = vld [vmem:[#allocation142_spill] sm:$0xff] }
 0x427   : > { %v6845_v9 = vpack.c.bf16 %v4645_v46, %v4633_v60  ;;  %v4650_v53 = vsub.f32 %v10006_v45, %v11714_v11  ;;  %v4662_v16 = vsub.f32 %v10008_v61, %v11715_v21  ;;  %v11722_v23 = vand.u32 4294901760, %v10017_v52  ;;  %v12111_v21 = vld [vmem:[#allocation144_spill] sm:$0xff] }
 0x428   : > { %7180 = vmatprep.subr.bf16.mxu1 %v7179_v35  ;;  %v5851_v63 = vand.u32 4294901760, %v5850_v55  ;;  %v5856_v1 = vsub.f32 %v10015_v34, %v11719_v48  ;;  %v11725_v5 = vand.u32 4294901760, %v12109_v26  ;;  %v11731_v60 = vand.u32 4294901760, %v12110_v37 }
 0x429   : > { %6846 = vmatpush1.bf16.msra.mxu0 %v6845_v9  ;;  %v4651_v46 = vand.u32 4294901760, %v4650_v53  ;;  %v4663_v14 = vand.u32 4294901760, %v4662_v16  ;;  %v5868_v11 = vsub.f32 %v10017_v52, %v11722_v23  ;;  %v11728_v36 = vand.u32 4294901760, %v12111_v21  ;;  %v12112_v16 = vld [vmem:[#allocation145_spill] sm:$0xff] }
 0x42a   : > { %v7181_v61 = vpack.c.bf16 %v5851_v63, %v5839_v22  ;;  %v5857_v35 = vand.u32 4294901760, %v5856_v1  ;;  %v4656_v55 = vsub.f32 %v12109_v26, %v11725_v5  ;;  %v4668_v48 = vsub.f32 %v12110_v37, %v11731_v60 }
 0x42b   : > { %v6847_v34 = vpack.c.bf16 %v4663_v14, %v4651_v46  ;;  %v5869_v9 = vand.u32 4294901760, %v5868_v11  ;;  %v5862_v53 = vsub.f32 %v12111_v21, %v11728_v36  ;;  %v11727_v23 = vand.u32 4294901760, %v12112_v16 }
 0x42c   : > { %7182 = vmatpush1.bf16.msra.mxu1 %v7181_v61  ;;  %v4657_v52 = vand.u32 4294901760, %v4656_v55  ;;  %v4669_v22 = vand.u32 4294901760, %v4668_v48  ;;  %v11729_v63 = vand.u32 4294901760, %v10049_v38  ;;  %v11730_v1 = vand.u32 4294901760, %v10051_v58 }
 0x42d   : > { %6848 = vmatprep.subr.bf16.mxu0 %v6847_v34  ;;  %v7183_v5 = vpack.c.bf16 %v5869_v9, %v5857_v35  ;;  %v5863_v26 = vand.u32 4294901760, %v5862_v53  ;;  %v5874_v14 = vsub.f32 %v12112_v16, %v11727_v23  ;;  %v11734_v11 = vand.u32 4294901760, %v10053_v57  ;;  %v12113_v9 = vld [vmem:[#allocation153_spill] sm:$0xff]  ;;  %v12114_v23 = vld [vmem:[#allocation154_spill] sm:$0xff] }
 0x42e   : > { %v6849_v46 = vpack.c.bf16 %v4669_v22, %v4657_v52  ;;  %v4674_v61 = vsub.f32 %v10049_v38, %v11729_v63  ;;  %v4686_v48 = vsub.f32 %v10051_v58, %v11730_v1  ;;  %v11737_v55 = vand.u32 4294901760, %v10057_v59  ;;  %v12115_v1 = vld [vmem:[#allocation155_spill] sm:$0xff] }
 0x42f   : > { %7184 = vmatprep.subr.bf16.mxu1 %v7183_v5  ;;  %v5875_v34 = vand.u32 4294901760, %v5874_v14  ;;  %v5880_v35 = vsub.f32 %v10053_v57, %v11734_v11  ;;  %v11742_v53 = vand.u32 4294901760, %v12113_v9  ;;  %v11756_v52 = vand.u32 4294901760, %v12114_v23 }
 0x430   : > { %6850 = vmatpush1.bf16.msra.mxu0 %v6849_v46  ;;  %v4675_v22 = vand.u32 4294901760, %v4674_v61  ;;  %v4687_v36 = vand.u32 4294901760, %v4686_v48  ;;  %v5892_v63 = vsub.f32 %v10057_v59, %v11737_v55  ;;  %v11748_v60 = vand.u32 4294901760, %v12115_v1  ;;  %v12116_v48 = vld [vmem:[#allocation157_spill] sm:$0xff] }
 0x431   : > { %v7185_v58 = vpack.c.bf16 %v5875_v34, %v5863_v26  ;;  %v5881_v5 = vand.u32 4294901760, %v5880_v35  ;;  %v4680_v14 = vsub.f32 %v12113_v9, %v11742_v53  ;;  %v4692_v11 = vsub.f32 %v12114_v23, %v11756_v52  ;;  %v12117_v34 = vld [vmem:[#allocation158_spill] sm:$0xff] }
 0x432   : > { %v6851_v57 = vpack.c.bf16 %v4687_v36, %v4675_v22  ;;  %v5893_v46 = vand.u32 4294901760, %v5892_v63  ;;  %v5886_v61 = vsub.f32 %v12115_v1, %v11748_v60  ;;  %v11746_v55 = vand.u32 4294901760, %v12116_v48 }
 0x433   : > { %7186 = vmatpush1.bf16.msra.mxu1 %v7185_v58  ;;  %v4681_v59 = vand.u32 4294901760, %v4680_v14  ;;  %v4693_v26 = vand.u32 4294901760, %v4692_v11  ;;  %v11744_v35 = vand.u32 4294901760, %v12117_v34  ;;  %v11745_v38 = vand.u32 4294901760, %v10094_v31 }
 0x434   : > { %6852 = vmatprep.subr.bf16.mxu0 %v6851_v57  ;;  %v7187_v53 = vpack.c.bf16 %v5893_v46, %v5881_v5  ;;  %v5887_v9 = vand.u32 4294901760, %v5886_v61  ;;  %v5898_v36 = vsub.f32 %v12116_v48, %v11746_v55  ;;  %v11747_v63 = vand.u32 4294901760, %v10083_v24 }
 0x435   : > { %v6853_v22 = vpack.c.bf16 %v4693_v26, %v4681_v59  ;;  %v4698_v58 = vsub.f32 %v12117_v34, %v11744_v35  ;;  %v4710_v11 = vsub.f32 %v10094_v31, %v11745_v38  ;;  %v11749_v14 = vand.u32 4294901760, %v10102_v3 }
 0x436   : > { %7188 = vmatprep.subr.bf16.mxu1 %v7187_v53  ;;  %v5899_v57 = vand.u32 4294901760, %v5898_v36  ;;  %v5904_v5 = vsub.f32 %v10083_v24, %v11747_v63  ;;  %v11755_v46 = vand.u32 4294901760, %v10087_v49  ;;  %v11751_v59 = vand.u32 4294901760, %v10096_v17 }
 0x437   : > { %6854 = vmatpush1.bf16.msra.mxu0 %v6853_v22  ;;  %v4699_v61 = vand.u32 4294901760, %v4698_v58  ;;  %v4711_v26 = vand.u32 4294901760, %v4710_v11  ;;  %v5916_v35 = vsub.f32 %v10102_v3, %v11749_v14  ;;  %v11750_v38 = vand.u32 4294901760, %v10105_v2 }
 0x438   : > { %v7189_v55 = vpack.c.bf16 %v5899_v57, %v5887_v9  ;;  %v5905_v53 = vand.u32 4294901760, %v5904_v5  ;;  %v4704_v36 = vsub.f32 %v10087_v49, %v11755_v46  ;;  %v4716_v63 = vsub.f32 %v10096_v17, %v11751_v59 }
 0x439   : > { %v6855_v60 = vpack.c.bf16 %v4711_v26, %v4699_v61  ;;  %v5917_v22 = vand.u32 4294901760, %v5916_v35  ;;  %v5910_v58 = vsub.f32 %v10105_v2, %v11750_v38  ;;  %v11753_v11 = vand.u32 4294901760, %v10118_v4  ;;  %v12120_v26 = vld [vmem:[#allocation159_spill] sm:$0xff] }
 0x43a   : > { %7190 = vmatpush1.bf16.msra.mxu1 %v7189_v55  ;;  %v4705_v14 = vand.u32 4294901760, %v4704_v36  ;;  %v4717_v9 = vand.u32 4294901760, %v4716_v63  ;;  %v10599_v57 = vsub.f32 %v10098_v7, %v10121_v54  ;;  %v10603_v5 = vsub.f32 %v10113_v20, %v10129_v62  ;;  %v12122_v36 = vld [vmem:[#allocation161_spill] sm:$0xff] }
 0x43b   : > { %6856 = vmatprep.subr.bf16.mxu0 %v6855_v60  ;;  %v7191_v61 = vpack.c.bf16 %v5917_v22, %v5905_v53  ;;  %v5922_v35 = vsub.f32 %v10118_v4, %v11753_v11  ;;  %v10610_v38 = vsub.f32 %v12120_v26, %v10108_v29  ;;  %v10616_v59 = vsub.f32 %v12122_v36, %v10124_v15  ;;  %v12125_v11 = vld [vmem:[#allocation29_spill] sm:$0xff]  ;;  %v12130_v15 = vld [vmem:[#allocation170_spill] sm:$0xff] }
 0x43c   : > { %12118 = vst [vmem:[#allocation122_spill] sm:$0xff] %v10599_v57  ;;  %12119 = vst [vmem:[#allocation124_spill] sm:$0xff] %v10603_v5  ;;  %v6857_v55 = vpack.c.bf16 %v4717_v9, %v4705_v14  ;;  %v11752_v63 = vand.u32 4294901760, %v10599_v57  ;;  %v11754_v7 = vand.u32 4294901760, %v10603_v5  ;;  %v5911_v20 = vand.u32 4294901760, %v5910_v58  ;;  %v12155_v29 = vld [vmem:[#allocation118_spill] sm:$0xff] }
 0x43d   : > { %12121 = vst [vmem:[#allocation125_spill] sm:$0xff] %v10610_v38  ;;  %12123 = vst [vmem:[#allocation130_spill] sm:$0xff] %v10616_v59  ;;  %7192 = vmatprep.subr.bf16.mxu1 %v7191_v61  ;;  %v5923_v60 = vand.u32 4294901760, %v5922_v35  ;;  %v11757_v53 = vand.u32 4294901760, %v10610_v38  ;;  %v11760_v9 = vand.u32 4294901760, %v10616_v59  ;;  %v12159_v62 = vld [vmem:[#allocation129_spill] sm:$0xff] }
 0x43e   : > { %6858 = vmatpush1.bf16.msra.mxu0 %v6857_v55  ;;  %v4722_v22 = vsub.f32 %v10599_v57, %v11752_v63  ;;  %v5928_v14 = vsub.f32 %v10603_v5, %v11754_v7  ;;  %v12124_v63 = vld [vmem:[#allocation21_spill] sm:$0xff]  ;;  %v12166_v57 = vld [vmem:[#allocation148_spill] sm:$0xff] }
 0x43f   : > { %v7193_v26 = vpack.c.bf16 %v5923_v60, %v5911_v20  ;;  %v4728_v61 = vsub.f32 %v10610_v38, %v11757_v53  ;;  %v5934_v55 = vsub.f32 %v10616_v59, %v11760_v9  ;;  %v6859_v7 = vpack.c.bf16 %v12125_v11, %v12124_v63  ;;  %v12126_v20 = vld [vmem:[#allocation17_spill] sm:$0xff]  ;;  %v12156_v11 = vld [vmem:[#allocation119_spill] sm:$0xff]  ;;  %v12162_v59 = vld [vmem:[#allocation138_spill] sm:$0xff] }
 0x440   : > { %v4723_v58 = vand.u32 4294901760, %v4722_v22  ;;  %v5929_v35 = vand.u32 4294901760, %v5928_v14  ;;  %v12127_v60 = vld [vmem:[#allocation33_spill] sm:$0xff]  ;;  %v12163_v38 = vld [vmem:[#allocation139_spill] sm:$0xff]  ;;  %v12174_v63 = vld [vmem:[#allocation56_spill] sm:$0xff] }
 0x441   : > { %7194 = vmatpush1.bf16.msra.mxu1 %v7193_v26  ;;  %v4729_v36 = vand.u32 4294901760, %v4728_v61  ;;  %v5935_v46 = vand.u32 4294901760, %v5934_v55  ;;  %v6861_v52 = vpack.c.bf16 %v12127_v60, %v12126_v20  ;;  %v12128_v53 = vld [vmem:[#allocation25_spill] sm:$0xff]  ;;  %v7197_v26 = vpack.c.bf16 %v9470_v12, %v9443_v40  ;;  %v12141_v12 = vld [vmem:[#allocation94_spill] sm:$0xff]  ;;  %v12154_v20 = vld [vmem:[#allocation116_spill] sm:$0xff] }
 0x442   : > { %4724 = vmatprep.subr.mxu0 %v4723_v58  ;;  %5930 = vmatprep.subr.mxu1 %v5929_v35  ;;  %v12129_v22 = vld [vmem:[#allocation5_spill] sm:$0xff]  ;;  %v6863_v61 = vpack.c.bf16 %v9492_v25, %v9486_v27  ;;  %v7199_v58 = vpack.c.bf16 %v9511_v51, %v9495_v43  ;;  %v6865_v35 = vpack.c.bf16 %v9505_v18, %v9503_v13  ;;  %v12133_v51 = vld [vmem:[#allocation38_spill] sm:$0xff]  ;;  %v12135_v13 = vld [vmem:[#allocation43_spill] sm:$0xff] }
 0x443   : > { %4730 = vmatpush1.msra.mxu0 %v4729_v36  ;;  %v7195_v14 = vpack.c.bf16 %v12129_v22, %v12128_v53  ;;  %v6867_v55 = vpack.c.bf16 %v9537_v30, %v9528_v39  ;;  %v7203_v36 = vpack.c.bf16 %v9553_v0, %v9551_v32  ;;  %v12134_v43 = vld [vmem:[#allocation41_spill] sm:$0xff]  ;;  %v12136_v25 = vld [vmem:[#allocation44_spill] sm:$0xff]  ;;  %v12139_v27 = vld [vmem:[#allocation91_spill] sm:$0xff] }
 0x444   : > { %6860 = vmatprep.subr.bf16.mxu0 %v6859_v7  ;;  %4740 = vmatmul.mubr.f32.vlgmr.msra.gmra.mrb[58].mxu0 %v12130_v15  ;;  %v7201_v7 = vpack.c.bf16 %v9524_v8, %v9518_v42  ;;  %v7205_v18 = vpack.c.bf16 %v12134_v43, %v12133_v51  ;;  %v6871_v8 = vpack.c.bf16 %v12136_v25, %v12135_v13  ;;  %v12138_v42 = vld [vmem:[#allocation47_spill] sm:$0xff]  ;;  %v12140_v30 = vld [vmem:[#allocation92_spill] sm:$0xff]  ;;  %v12171_v25 = vld [vmem:[#allocation50_spill] sm:$0xff] }
 0x445   : > { %5936 = vmatpush1.msra.mxu1 %v5935_v46  ;;  %6862 = vmatpush1.bf16.msra.mxu0 %v6861_v52  ;;  %v12131_v46 = vld [vmem:[#allocation34_spill] sm:$0xff]  ;;  %v12132_v52 = vld [vmem:[#allocation36_spill] sm:$0xff]  ;;  %v12142_v0 = vld [vmem:[#allocation95_spill] sm:$0xff] }
 0x446   : > { %7196 = vmatprep.subr.bf16.mxu1 %v7195_v14  ;;  %5946 = vmatmul.mubr.f32.vlgmr.msra.gmra.mrb[58].mxu1 %v12130_v15  ;;  %v6869_v9 = vpack.c.bf16 %v12132_v52, %v12131_v46  ;;  %v12137_v14 = vld [vmem:[#allocation46_spill] sm:$0xff]  ;;  %v12153_v32 = vld [vmem:[#allocation115_spill] sm:$0xff]  ;;  %v12161_v22 = vld [vmem:[#allocation136_spill] sm:$0xff] }
 0x447   : > { %7198 = vmatpush1.bf16.msra.mxu1 %v7197_v26  ;;  %6864 = vmatprep.subr.bf16.mxu0 %v6863_v61  ;;  %v7207_v15 = vpack.c.bf16 %v12138_v42, %v12137_v14  ;;  %v12158_v42 = vld [vmem:[#allocation127_spill] sm:$0xff]  ;;  %v12170_v26 = vld [vmem:[#allocation49_spill] sm:$0xff]  ;;  %v12175_v14 = vld [vmem:[#allocation52_spill] sm:$0xff] }
 0x448   : > { %7200 = vmatprep.subr.bf16.mxu1 %v7199_v58  ;;  %v12165_v60 = vld [vmem:[#allocation147_spill] sm:$0xff]  ;;  %v6873_v58 = vpack.c.bf16 %v12171_v25, %v12170_v26  ;;  %4928 = vmatprep.mubr.f32.mxu0 %v12172_v50  ;;  %v12176_v5 = vld [vmem:[#allocation53_spill] sm:$0xff]  ;;  %v12180_v46 = vld [vmem:[#allocation62_spill] sm:$0xff] }
 0x449   : > { %6866 = vmatpush1.bf16.msra.mxu0 %v6865_v35  ;;  %v12157_v35 = vld [vmem:[#allocation121_spill] sm:$0xff]  ;;  %v12168_v39 = vld [vmem:[#allocation151_spill] sm:$0xff]  ;;  %6134 = vmatprep.mubr.f32.mxu1 %v12172_v50  ;;  %v7209_v53 = vpack.c.bf16 %v12176_v5, %v12175_v14  ;;  %v12188_v14 = vld [vmem:[#allocation74_spill] sm:$0xff] }
 0x44a   : > { %6868 = vmatprep.subr.bf16.mxu0 %v6867_v55  ;;  %v12160_v55 = vld [vmem:[#allocation132_spill] sm:$0xff]  ;;  %v12178_v61 = vld [vmem:[#allocation59_spill] sm:$0xff]  ;;  %v12195_v52 = vld [vmem:[#allocation85_spill] sm:$0xff] }
 0x44b   : > { %7202 = vmatpush1.bf16.msra.mxu1 %v7201_v7  ;;  %v12164_v7 = vld [vmem:[#allocation141_spill] sm:$0xff]  ;;  %v12181_v26 = vld [vmem:[#allocation67_spill] sm:$0xff] }
 0x44c   : > { %7204 = vmatprep.subr.bf16.mxu1 %v7203_v36  ;;  %v12169_v36 = vld [vmem:[#allocation153_spill] sm:$0xff]  ;;  %v12186_v51 = vld [vmem:[#allocation71_spill] sm:$0xff] }
 0x44d   : > { %6870 = vmatpush1.bf16.msra.mxu0 %v6869_v9  ;;  %v12177_v9 = vld [vmem:[#allocation58_spill] sm:$0xff] }
 0x44e   : > { %6872 = vmatprep.subr.bf16.mxu0 %v6871_v8  ;;  %v12173_v8 = vld [vmem:[#allocation55_spill] sm:$0xff]  ;;  %v7211_v54 = vpack.c.bf16 %v12178_v61, %v12177_v9  ;;  %v12190_v9 = vld [vmem:[#allocation77_spill] sm:$0xff] }
 0x44f   : > { %7206 = vmatpush1.bf16.msra.mxu1 %v7205_v18  ;;  %v6875_v13 = vpack.c.bf16 %v12174_v63, %v12173_v8  ;;  %v12179_v18 = vld [vmem:[#allocation61_spill] sm:$0xff]  ;;  %v12183_v63 = vld [vmem:[#allocation64_spill] sm:$0xff] }
 0x450   : > { %7208 = vmatprep.subr.bf16.mxu1 %v7207_v15  ;;  %v6877_v25 = vpack.c.bf16 %v12180_v46, %v12179_v18  ;;  %v12182_v15 = vld [vmem:[#allocation68_spill] sm:$0xff]  ;;  %v12184_v8 = vld [vmem:[#allocation65_spill] sm:$0xff]  ;;  %v12191_v46 = vld [vmem:[#allocation79_spill] sm:$0xff] }
 0x451   : > { %6874 = vmatpush1.bf16.msra.mxu0 %v6873_v58  ;;  %v6879_v43 = vpack.c.bf16 %v12182_v15, %v12181_v26  ;;  %v7213_v50 = vpack.c.bf16 %v12184_v8, %v12183_v63  ;;  %v12185_v58 = vld [vmem:[#allocation70_spill] sm:$0xff]  ;;  %v12197_v63 = vand.u32 4294901760, %v12153_v32 }
 0x452   : > { %6876 = vmatprep.subr.bf16.mxu0 %v6875_v13  ;;  %v7215_v5 = vpack.c.bf16 %v12186_v51, %v12185_v58  ;;  %v12187_v13 = vld [vmem:[#allocation72_spill] sm:$0xff]  ;;  %v12193_v15 = vld [vmem:[#allocation82_spill] sm:$0xff] }
 0x453   : > { %7210 = vmatpush1.bf16.msra.mxu1 %v7209_v53  ;;  %v6881_v61 = vpack.c.bf16 %v12188_v14, %v12187_v13  ;;  %v12189_v53 = vld [vmem:[#allocation76_spill] sm:$0xff]  ;;  %v12196_v8 = vld [vmem:[#allocation86_spill] sm:$0xff]  ;;  %v12200_v14 = vand.u32 4294901760, %v12155_v29 }
 0x454   : > { %7212 = vmatprep.subr.bf16.mxu1 %v7211_v54  ;;  %v7217_v40 = vpack.c.bf16 %v12190_v9, %v12189_v53  ;;  %v12192_v54 = vld [vmem:[#allocation80_spill] sm:$0xff]  ;;  %v12201_v9 = vand.u32 4294901760, %v12156_v11 }
 0x455   : > { %6878 = vmatpush1.bf16.msra.mxu0 %v6877_v25  ;;  %v6883_v18 = vpack.c.bf16 %v12192_v54, %v12191_v46  ;;  %v12194_v25 = vld [vmem:[#allocation83_spill] sm:$0xff] }
 0x456   : > { %6880 = vmatprep.subr.bf16.mxu0 %v6879_v43  ;;  %v7219_v26 = vpack.c.bf16 %v12194_v25, %v12193_v15  ;;  %v6885_v43 = vpack.c.bf16 %v12196_v8, %v12195_v52  ;;  %v10756_v53 = vpack.c.bf16 %v12201_v9, %v12200_v14  ;;  %v12204_v25 = vand.u32 4294901760, %v12103_v19 }
 0x457   : > { %7214 = vmatpush1.bf16.msra.mxu1 %v7213_v50  ;;  %v12198_v50 = vand.u32 4294901760, %v12154_v20  ;;  %v12206_v8 = vand.u32 4294901760, %v12104_v56  ;;  %v12207_v52 = vand.u32 4294901760, %v12105_v33  ;;  %v12212_v14 = vand.u32 4294901760, %v12159_v62 }
 0x458   : > { %7216 = vmatprep.subr.bf16.mxu1 %v7215_v5  ;;  %12202 = vst [vmem:[#allocation142_spill] sm:$0xff] %v10756_v53  ;;  %v12203_v5 = vand.u32 4294901760, %v12157_v35  ;;  %v12274_v53 = vld [vmem:[#allocation109_spill] sm:$0xff] }
 0x459   : > { %v10750_v51 = vpack.c.bf16 %v12198_v50, %v12197_v63  ;;  %6882 = vmatpush1.bf16.msra.mxu0 %v6881_v61  ;;  %v10768_v54 = vpack.c.bf16 %v12207_v52, %v12206_v8  ;;  %v12209_v63 = vand.u32 4294901760, %v9960_v44  ;;  %v12210_v50 = vand.u32 4294901760, %v12158_v42 }
 0x45a   : > { %v10762_v15 = vpack.c.bf16 %v12204_v25, %v12203_v5  ;;  %v12213_v61 = vand.u32 4294901760, %v12107_v6  ;;  %6884 = vmatprep.subr.bf16.mxu0 %v6883_v18  ;;  %v12215_v25 = vand.u32 4294901760, %v12160_v55  ;;  %v12216_v5 = vand.u32 4294901760, %v12108_v41 }
 0x45b   : > { %12199 = vst [vmem:[#allocation133_spill] sm:$0xff] %v10750_v51  ;;  %12208 = vst [vmem:[#allocation145_spill] sm:$0xff] %v10768_v54  ;;  %v10774_v51 = vpack.c.bf16 %v12210_v50, %v12209_v63  ;;  %v12218_v52 = vand.u32 4294901760, %v9994_v10  ;;  %v12219_v8 = vand.u32 4294901760, %v9997_v47  ;;  %v12221_v63 = vand.u32 4294901760, %v10006_v45  ;;  %7218 = vmatpush1.bf16.msra.mxu1 %v7217_v40 }
 0x45c   : > { %12205 = vst [vmem:[#allocation144_spill] sm:$0xff] %v10762_v15  ;;  %v10780_v9 = vpack.c.bf16 %v12213_v61, %v12212_v14  ;;  %v10786_v15 = vpack.c.bf16 %v12216_v5, %v12215_v25  ;;  %v12222_v50 = vand.u32 4294901760, %v12161_v22  ;;  %v12224_v18 = vand.u32 4294901760, %v12162_v59  ;;  %7220 = vmatprep.subr.bf16.mxu1 %v7219_v26 }
 0x45d   : > { %12211 = vst [vmem:[#allocation154_spill] sm:$0xff] %v10774_v51  ;;  %v10792_v54 = vpack.c.bf16 %v12219_v8, %v12218_v52  ;;  %v12225_v14 = vand.u32 4294901760, %v12163_v38  ;;  %v12227_v25 = vand.u32 4294901760, %v12164_v7  ;;  %v12228_v5 = vand.u32 4294901760, %v12110_v37  ;;  %6886 = vmatpush1.bf16.msra.mxu0 %v6885_v43 }
 0x45e   : > { %12214 = vst [vmem:[#allocation155_spill] sm:$0xff] %v10780_v9  ;;  %12217 = vst [vmem:[#allocation157_spill] sm:$0xff] %v10786_v15  ;;  %v10798_v51 = vpack.c.bf16 %v12222_v50, %v12221_v63  ;;  %v12230_v52 = vand.u32 4294901760, %v12111_v21  ;;  %v12231_v8 = vand.u32 4294901760, %v12112_v16  ;;  %v12233_v63 = vand.u32 4294901760, %v12165_v60  ;;  %v12271_v9 = vld [vmem:[#allocation106_spill] sm:$0xff] }
 0x45f   : > { %12220 = vst [vmem:[#allocation158_spill] sm:$0xff] %v10792_v54  ;;  %v10804_v61 = vpack.c.bf16 %v12225_v14, %v12224_v18  ;;  %v10810_v15 = vpack.c.bf16 %v12228_v5, %v12227_v25  ;;  %v12234_v50 = vand.u32 4294901760, %v12166_v57  ;;  %v12236_v40 = vand.u32 4294901760, %v12167_v28 }
 0x460   : > { %12223 = vst [vmem:[#allocation159_spill] sm:$0xff] %v10798_v51  ;;  %v10816_v54 = vpack.c.bf16 %v12231_v8, %v12230_v52  ;;  %v12237_v18 = vand.u32 4294901760, %v12168_v39  ;;  %v12239_v25 = vand.u32 4294901760, %v12169_v36  ;;  %v12240_v5 = vand.u32 4294901760, %v12114_v23 }
 0x461   : > { %12226 = vst [vmem:[#allocation161_spill] sm:$0xff] %v10804_v61  ;;  %12229 = vst [vmem:[#allocation91_spill] sm:$0xff] %v10810_v15  ;;  %v10822_v51 = vpack.c.bf16 %v12234_v50, %v12233_v63  ;;  %v12242_v52 = vand.u32 4294901760, %v12115_v1  ;;  %v12243_v8 = vand.u32 4294901760, %v12116_v48  ;;  %v12245_v63 = vand.u32 4294901760, %v12117_v34  ;;  %v12267_v61 = vld [vmem:[#allocation101_spill] sm:$0xff] }
 0x462   : > { %12232 = vst [vmem:[#allocation92_spill] sm:$0xff] %v10816_v54  ;;  %v10828_v14 = vpack.c.bf16 %v12237_v18, %v12236_v40  ;;  %v10834_v15 = vpack.c.bf16 %v12240_v5, %v12239_v25  ;;  %v12246_v50 = vand.u32 4294901760, %v10094_v31  ;;  %v12248_v26 = vand.u32 4294901760, %v10083_v24  ;;  %v12251_v25 = vld [vmem:[#allocation88_spill] sm:$0xff]  ;;  %v12252_v5 = vld [vmem:[#allocation89_spill] sm:$0xff] }
 0x463   : > { %12235 = vst [vmem:[#allocation94_spill] sm:$0xff] %v10822_v51  ;;  %v10840_v54 = vpack.c.bf16 %v12243_v8, %v12242_v52  ;;  %v12249_v40 = vand.u32 4294901760, %v10102_v3  ;;  %v12254_v52 = vand.u32 4294901760, %v10096_v17  ;;  %v12260_v43 = vpack.c.bf16 %v12142_v0, %v12141_v12 }
 0x464   : > { %12238 = vst [vmem:[#allocation115_spill] sm:$0xff] %v10828_v14  ;;  %12241 = vst [vmem:[#allocation116_spill] sm:$0xff] %v10834_v15  ;;  %v10846_v51 = vpack.c.bf16 %v12246_v50, %v12245_v63  ;;  %v7221_v15 = vpack.c.bf16 %v12252_v5, %v12251_v25  ;;  %v12253_v14 = vand.u32 4294901760, %v10087_v49  ;;  %v12257_v63 = vand.u32 4294901760, %v10118_v4 }
 0x465   : > { %12244 = vst [vmem:[#allocation118_spill] sm:$0xff] %v10840_v54  ;;  %v10852_v18 = vpack.c.bf16 %v12249_v40, %v12248_v26  ;;  %v12256_v54 = vand.u32 4294901760, %v10105_v2  ;;  %v12259_v26 = vpack.c.bf16 %v12140_v30, %v12139_v27  ;;  %v12261_v40 = vld [vmem:[#allocation98_spill] sm:$0xff] }
 0x466   : > { %12247 = vst [vmem:[#allocation119_spill] sm:$0xff] %v10846_v51  ;;  %v10860_v8 = vpack.c.bf16 %v12254_v52, %v12253_v14  ;;  %7222 = vmatpush1.bf16.msra.mxu1 %v7221_v15  ;;  %v12264_v14 = vld [vmem:[#allocation104_spill] sm:$0xff]  ;;  %v12265_v52 = vld [vmem:[#allocation103_spill] sm:$0xff]  ;;  %v12273_v15 = vld [vmem:[#allocation110_spill] sm:$0xff] }
 0x467   : > { %12250 = vst [vmem:[#allocation121_spill] sm:$0xff] %v10852_v18  ;;  %v10866_v50 = vpack.c.bf16 %v12257_v63, %v12256_v54  ;;  %6888 = vmatprep.subr.bf16.mxu0 %v12259_v26  ;;  %7224 = vmatprep.subr.bf16.mxu1 %v12260_v43  ;;  %v12262_v18 = vld [vmem:[#allocation97_spill] sm:$0xff]  ;;  %v12268_v54 = vld [vmem:[#allocation100_spill] sm:$0xff]  ;;  %v12275_v0 = vpack.c.bf16 %v12273_v15, %v12274_v53 }
 0x468   : > { %12255 = vst [vmem:[#allocation127_spill] sm:$0xff] %v10860_v8  ;;  %v12263_v51 = vpack.c.bf16 %v12261_v40, %v12262_v18  ;;  %v12266_v8 = vpack.c.bf16 %v12264_v14, %v12265_v52  ;;  %v12269_v63 = vpack.c.bf16 %v12267_v61, %v12268_v54  ;;  %v12276_v43 = vpack.c.bf16 %v12154_v20, %v12153_v32  ;;  %v12278_v40 = vld [vmem:[#allocation112_spill] sm:$0xff] }
 0x469   : > { %12258 = vst [vmem:[#allocation129_spill] sm:$0xff] %v10866_v50  ;;  %v12270_v50 = vld [vmem:[#allocation107_spill] sm:$0xff]  ;;  %v12283_v32 = vpack.c.bf16 %v12105_v33, %v12104_v56  ;;  %v12288_v56 = vpack.c.bf16 %v12163_v38, %v12162_v59  ;;  %v12294_v38 = vpack.c.bf16 %v10094_v31, %v12117_v34  ;;  %v12295_v33 = vpack.c.bf16 %v12116_v48, %v12115_v1  ;;  %v12300_v31 = vld [vmem:[#allocation124_spill] sm:$0xff]  ;;  %v12311_v1 = vld [vmem:[#allocation10_spill] sm:$0xff] }
 0x46a   : > { %6890 = vmatpush1.bf16.msra.mxu0 %v12263_v51  ;;  %7226 = vmatpush1.bf16.msra.mxu1 %v12269_v63  ;;  %v12272_v26 = vpack.c.bf16 %v12270_v50, %v12271_v9  ;;  %v12277_v51 = vld [vmem:[#allocation113_spill] sm:$0xff]  ;;  %v12281_v63 = vpack.c.bf16 %v12103_v19, %v12157_v35  ;;  %v12286_v19 = vpack.c.bf16 %v12161_v22, %v10006_v45  ;;  %v12312_v48 = vld [vmem:[#allocation22_spill] sm:$0xff]  ;;  %v12313_v34 = vld [vmem:[#allocation16_spill] sm:$0xff] }
 0x46b   : > { %6892 = vmatprep.subr.bf16.mxu0 %v12266_v8  ;;  %v12279_v14 = vpack.c.bf16 %v12277_v51, %v12278_v40  ;;  %v12280_v8 = vpack.c.bf16 %v12156_v11, %v12155_v29  ;;  %v12285_v29 = vpack.c.bf16 %v12108_v41, %v12160_v55  ;;  %v12291_v45 = vpack.c.bf16 %v12112_v16, %v12111_v21  ;;  %v12302_v21 = vld [vmem:[#allocation26_spill] sm:$0xff]  ;;  %v12310_v16 = vld [vmem:[#allocation169_spill] sm:$0xff]  ;;  %v12314_v59 = vld [vmem:[#allocation27_spill] sm:$0xff] }
 0x46c   : > { %7228 = vmatprep.subr.bf16.mxu1 %v12272_v26  ;;  %v12282_v26 = vpack.c.bf16 %v12158_v42, %v9960_v44  ;;  %v12287_v42 = vpack.c.bf16 %v9997_v47, %v9994_v10  ;;  %v12289_v44 = vpack.c.bf16 %v12110_v37, %v12164_v7  ;;  %v12292_v10 = vpack.c.bf16 %v12168_v39, %v12167_v28  ;;  %v12298_v28 = vld [vmem:[#allocation122_spill] sm:$0xff]  ;;  %v12301_v37 = vld [vmem:[#allocation125_spill] sm:$0xff]  ;;  %v12315_v11 = vld [vmem:[#allocation32_spill] sm:$0xff] }
 0x46d   : > { %v12293_v47 = vpack.c.bf16 %v12114_v23, %v12169_v36  ;;  %v12297_v39 = vpack.c.bf16 %v10096_v17, %v10087_v49  ;;  %v12299_v41 = vpack.c.bf16 %v10118_v4, %v10105_v2  ;;  %v12303_v23 = vld [vmem:[#allocation171_spill] sm:$0xff]  ;;  %v12306_v49 = vld [vmem:[#allocation4_spill] sm:$0xff]  ;;  %v12309_v4 = vld [vmem:[#allocation13_spill] sm:$0xff] }
 0x46e   : > { %6894 = vmatpush1.bf16.msra.mxu0 %v12275_v0  ;;  %7230 = vmatpush1.bf16.msra.mxu1 %v12279_v14  ;;  %v12284_v0 = vpack.c.bf16 %v12107_v6, %v12159_v62  ;;  %v12290_v62 = vpack.c.bf16 %v12166_v57, %v12165_v60  ;;  %v12296_v6 = vpack.c.bf16 %v10102_v3, %v10083_v24  ;;  %v12304_v24 = vld [vmem:[#allocation130_spill] sm:$0xff]  ;;  %v12305_v3 = vld [vmem:[#allocation31_spill] sm:$0xff]  ;;  %v12317_v20 = vld [vmem:[#allocation40_spill] sm:$0xff] }
 0x46f   : > { %6896 = vmatprep.subr.bf16.mxu0 %v12276_v43  ;;  %7232 = vmatprep.subr.bf16.mxu1 %v12280_v8  ;;  %v12307_v17 = vld [vmem:[#allocation35_spill] sm:$0xff]  ;;  %v12316_v57 = vld [vmem:[#allocation42_spill] sm:$0xff]  ;;  %v12318_v60 = vld [vmem:[#allocation45_spill] sm:$0xff] }
 0x470   : > { %v12308_v2 = vld [vmem:[#allocation7_spill] sm:$0xff]  ;;  %v12319_v22 = vld [vmem:[#allocation48_spill] sm:$0xff]  ;;  %v12320_v35 = vld [vmem:[#allocation54_spill] sm:$0xff] }
 0x471   : > { %v12321_v55 = vld [vmem:[#allocation51_spill] sm:$0xff]  ;;  %v12322_v7 = vld [vmem:[#allocation57_spill] sm:$0xff]  ;;  %v12323_v36 = vld [vmem:[#allocation60_spill] sm:$0xff] }
 0x472   : > { %6898 = vmatpush1.bf16.msra.mxu0 %v12281_v63  ;;  %7234 = vmatpush1.bf16.msra.mxu1 %v12283_v32  ;;  %v12324_v14 = vld [vmem:[#allocation66_spill] sm:$0xff]  ;;  %v12325_v43 = vld [vmem:[#allocation63_spill] sm:$0xff]  ;;  %v12326_v8 = vld [vmem:[#allocation69_spill] sm:$0xff] }
 0x473   : > { %6900 = vmatprep.subr.bf16.mxu0 %v12282_v26  ;;  %7236 = vmatprep.subr.bf16.mxu1 %v12284_v0  ;;  %v12327_v63 = vld [vmem:[#allocation73_spill] sm:$0xff]  ;;  %v12328_v26 = vld [vmem:[#allocation78_spill] sm:$0xff]  ;;  %v12329_v32 = vld [vmem:[#allocation75_spill] sm:$0xff] }
 0x474   : > { %v12330_v0 = vld [vmem:[#allocation81_spill] sm:$0xff] }
 0x476   : > { %6902 = vmatpush1.bf16.msra.mxu0 %v12285_v29  ;;  %7238 = vmatpush1.bf16.msra.mxu1 %v12287_v42  ;;  %v12331_v29 = vld [vmem:[#allocation84_spill] sm:$0xff]  ;;  %v12333_v42 = vld [vmem:[#allocation87_spill] sm:$0xff] }
 0x477   : > { %6904 = vmatprep.subr.bf16.mxu0 %v12286_v19  ;;  %7240 = vmatprep.subr.bf16.mxu1 %v12288_v56  ;;  %v12332_v19 = vld [vmem:[#allocation90_spill] sm:$0xff]  ;;  %v12334_v56 = vld [vmem:[#allocation93_spill] sm:$0xff] }
 0x47a   : > { %6906 = vmatpush1.bf16.msra.mxu0 %v12289_v44  ;;  %7242 = vmatpush1.bf16.msra.mxu1 %v12291_v45  ;;  %v12335_v44 = vld [vmem:[#allocation96_spill] sm:$0xff]  ;;  %v12337_v45 = vld [vmem:[#allocation99_spill] sm:$0xff] }
 0x47b   : > { %6908 = vmatprep.subr.bf16.mxu0 %v12290_v62  ;;  %7244 = vmatprep.subr.bf16.mxu1 %v12292_v10  ;;  %v12336_v62 = vld [vmem:[#allocation102_spill] sm:$0xff]  ;;  %v12338_v10 = vld [vmem:[#allocation105_spill] sm:$0xff] }
 0x47e   : > { %6910 = vmatpush1.bf16.msra.mxu0 %v12293_v47  ;;  %7246 = vmatpush1.bf16.msra.mxu1 %v12295_v33  ;;  %v12339_v47 = vld [vmem:[#allocation108_spill] sm:$0xff]  ;;  %v12341_v33 = vld [vmem:[#allocation111_spill] sm:$0xff] }
 0x47f   : > { %6912 = vmatprep.subr.bf16.mxu0 %v12294_v38  ;;  %7248 = vmatprep.subr.bf16.mxu1 %v12296_v6  ;;  %v12340_v38 = vld [vmem:[#allocation114_spill] sm:$0xff]  ;;  %v12342_v6 = vld [vmem:[#allocation117_spill] sm:$0xff] }
 0x482   : > { %6914 = vmatpush1.bf16.msra.mxu0 %v12297_v39  ;;  %7250 = vmatpush1.bf16.msra.mxu1 %v12299_v41  ;;  %v12343_v39 = vld [vmem:[#allocation120_spill] sm:$0xff]  ;;  %v12344_v41 = vld [vmem:[#allocation126_spill] sm:$0xff] }
 0x483   : > { %4916 = vmatprep.subr.mxu0 %v12298_v28  ;;  %6122 = vmatprep.subr.mxu1 %v12300_v31 }
 0x486   : > { %4919 = vmatpush1.msra.mxu0 %v12301_v37  ;;  %6125 = vmatpush1.msra.mxu1 %v12304_v24 }
 0x487   : > { %6916 = vmatprep.subr.bf16.mxu0 %v12302_v21  ;;  %4931 = vmatmul.mubr.f32.vlgmr.msra.gmra.mrb[58].mxu0 %v12303_v23 }
 0x488   : > { %6918 = vmatpush1.bf16.msra.mxu0 %v12305_v3  ;;  %7252 = vmatprep.subr.bf16.mxu1 %v12306_v49 }
 0x489   : > { %6137 = vmatmul.mubr.f32.vlgmr.msra.gmra.mrb[58].mxu1 %v12303_v23  ;;  %6920 = vmatprep.subr.bf16.mxu0 %v12308_v2  ;;  %v12345_v23 = vld [vmem:[#allocation123_spill] sm:$0xff] }
 0x48a   : > { %7254 = vmatpush1.bf16.msra.mxu1 %v12307_v17  ;;  %5062 = vmatprep.mubr.f32.mxu0 %v12310_v16 }
 0x48b   : > { %7256 = vmatprep.subr.bf16.mxu1 %v12309_v4  ;;  %6268 = vmatprep.mubr.f32.mxu1 %v12310_v16  ;;  %v12346_v16 = vld [vmem:[#allocation128_spill] sm:$0xff] }
 0x48c   : > { %6922 = vmatpush1.bf16.msra.mxu0 %v12311_v1 }
 0x48d   : > { %6924 = vmatprep.subr.bf16.mxu0 %v12312_v48 }
 0x48e   : > { %7258 = vmatpush1.bf16.msra.mxu1 %v12313_v34 }
 0x48f   : > { %7260 = vmatprep.subr.bf16.mxu1 %v12314_v59 }
 0x490   : > { %6926 = vmatpush1.bf16.msra.mxu0 %v12315_v11 }
 0x491   : > { %6928 = vmatprep.subr.bf16.mxu0 %v12316_v57 }
 0x492   : > { %7262 = vmatpush1.bf16.msra.mxu1 %v12317_v20 }
 0x493   : > { %7264 = vmatprep.subr.bf16.mxu1 %v12318_v60 }
 0x494   : > { %6930 = vmatpush1.bf16.msra.mxu0 %v12319_v22 }
 0x495   : > { %6932 = vmatprep.subr.bf16.mxu0 %v12320_v35 }
 0x496   : > { %7266 = vmatpush1.bf16.msra.mxu1 %v12321_v55 }
 0x497   : > { %7268 = vmatprep.subr.bf16.mxu1 %v12322_v7 }
 0x498   : > { %6934 = vmatpush1.bf16.msra.mxu0 %v12323_v36 }
 0x499   : > { %6936 = vmatprep.subr.bf16.mxu0 %v12324_v14 }
 0x49a   : > { %7270 = vmatpush1.bf16.msra.mxu1 %v12325_v43 }
 0x49b   : > { %7272 = vmatprep.subr.bf16.mxu1 %v12326_v8 }
 0x49c   : > { %6938 = vmatpush1.bf16.msra.mxu0 %v12327_v63  ;;  %v12417_v63 = vld [vmem:[#allocation41_spill] sm:$0xff] }
 0x49d   : > { %6940 = vmatprep.subr.bf16.mxu0 %v12328_v26 }
 0x49e   : > { %7274 = vmatpush1.bf16.msra.mxu1 %v12329_v32  ;;  %v12376_v32 = vld [vmem:[#allocation172_spill] sm:$0xff] }
 0x49f   : > { %7276 = vmatprep.subr.bf16.mxu1 %v12330_v0 }
 0x4a0   : > { %6942 = vmatpush1.bf16.msra.mxu0 %v12331_v29 }
 0x4a1   : > { %6944 = vmatprep.subr.bf16.mxu0 %v12332_v19 }
 0x4a2   : > { %7278 = vmatpush1.bf16.msra.mxu1 %v12333_v42 }
 0x4a3   : > { %7280 = vmatprep.subr.bf16.mxu1 %v12334_v56 }
 0x4a4   : > { %6946 = vmatpush1.bf16.msra.mxu0 %v12335_v44  ;;  %v12365_v44 = vld [vmem:[#allocation29_spill] sm:$0xff] }
 0x4a5   : > { %6948 = vmatprep.subr.bf16.mxu0 %v12336_v62  ;;  %v12347_v62 = vld [vmem:[#allocation131_spill] sm:$0xff] }
 0x4a6   : > { %7282 = vmatpush1.bf16.msra.mxu1 %v12337_v45  ;;  %v12348_v45 = vld [vmem:[#allocation135_spill] sm:$0xff] }
 0x4a7   : > { %7284 = vmatprep.subr.bf16.mxu1 %v12338_v10  ;;  %v12349_v10 = vld [vmem:[#allocation134_spill] sm:$0xff] }
 0x4a8   : > { %6950 = vmatpush1.bf16.msra.mxu0 %v12339_v47  ;;  %v12350_v47 = vld [vmem:[#allocation137_spill] sm:$0xff] }
 0x4a9   : > { %6952 = vmatprep.subr.bf16.mxu0 %v12340_v38  ;;  %v12351_v38 = vld [vmem:[#allocation140_spill] sm:$0xff] }
 0x4aa   : > { %7286 = vmatpush1.bf16.msra.mxu1 %v12341_v33  ;;  %v12352_v33 = vld [vmem:[#allocation146_spill] sm:$0xff] }
 0x4ab   : > { %7288 = vmatprep.subr.bf16.mxu1 %v12342_v6  ;;  %v12353_v6 = vld [vmem:[#allocation143_spill] sm:$0xff] }
 0x4ac   : > { %6954 = vmatpush1.bf16.msra.mxu0 %v12343_v39  ;;  %v12354_v39 = vld [vmem:[#allocation150_spill] sm:$0xff] }
 0x4ad   : > { %6956 = vmatprep.subr.bf16.mxu0 %v12344_v41  ;;  %v12355_v41 = vld [vmem:[#allocation152_spill] sm:$0xff] }
 0x4ae   : > { %7290 = vmatpush1.bf16.msra.mxu1 %v12345_v23  ;;  %v12356_v23 = vld [vmem:[#allocation162_spill] sm:$0xff] }
 0x4af   : > { %7292 = vmatprep.subr.bf16.mxu1 %v12346_v16  ;;  %v12357_v16 = vld [vmem:[#allocation156_spill] sm:$0xff] }
 0x4b0   : > { %6958 = vmatpush1.bf16.msra.mxu0 %v12347_v62  ;;  %v12358_v62 = vld [vmem:[#allocation163_spill] sm:$0xff] }
 0x4b1   : > { %6960 = vmatprep.subr.bf16.mxu0 %v12348_v45  ;;  %v12359_v45 = vld [vmem:[#allocation160_spill] sm:$0xff] }
 0x4b2   : > { %7294 = vmatpush1.bf16.msra.mxu1 %v12349_v10  ;;  %v12360_v10 = vld [vmem:[#allocation166_spill] sm:$0xff] }
 0x4b3   : > { %7296 = vmatprep.subr.bf16.mxu1 %v12350_v47  ;;  %v12361_v47 = vld [vmem:[#allocation165_spill] sm:$0xff] }
 0x4b4   : > { %6962 = vmatpush1.bf16.msra.mxu0 %v12351_v38  ;;  %v12362_v38 = vld [vmem:[#allocation168_spill] sm:$0xff] }
 0x4b5   : > { %6964 = vmatprep.subr.bf16.mxu0 %v12352_v33  ;;  %v12363_v33 = vld [vmem:[#allocation21_spill] sm:$0xff] }
 0x4b6   : > { %7298 = vmatpush1.bf16.msra.mxu1 %v12353_v6  ;;  %v12364_v6 = vand.u32 4294901760, %v12363_v33 }
 0x4b7   : > { %7300 = vmatprep.subr.bf16.mxu1 %v12354_v39  ;;  %v12366_v39 = vand.u32 4294901760, %v12365_v44  ;;  %v12378_v44 = vld [vmem:[#allocation19_spill] sm:$0xff] }
 0x4b8   : > { %6966 = vmatpush1.bf16.msra.mxu0 %v12355_v41  ;;  %v12367_v41 = vld [vmem:[#allocation164_spill] sm:$0xff]  ;;  %v12379_v33 = vand.u32 4294901760, %v12378_v44 }
 0x4b9   : > { %6968 = vmatprep.subr.bf16.mxu0 %v12356_v23  ;;  %v6971_v56 = vpack.c.bf16 %v12366_v39, %v12364_v6  ;;  %v12368_v23 = vld [vmem:[#allocation17_spill] sm:$0xff] }
 0x4ba   : > { %7302 = vmatpush1.bf16.msra.mxu1 %v12357_v16  ;;  %v12369_v42 = vand.u32 4294901760, %v12368_v23  ;;  %v12370_v16 = vld [vmem:[#allocation33_spill] sm:$0xff]  ;;  %v12382_v23 = vld [vmem:[#allocation6_spill] sm:$0xff] }
 0x4bb   : > { %7304 = vmatprep.subr.bf16.mxu1 %v12358_v62  ;;  %v12371_v19 = vand.u32 4294901760, %v12370_v16  ;;  %v12380_v6 = vld [vmem:[#allocation37_spill] sm:$0xff]  ;;  %v12383_v26 = vand.u32 4294901760, %v12382_v23  ;;  %v12384_v16 = vld [vmem:[#allocation8_spill] sm:$0xff] }
 0x4bc   : > { %6970 = vmatpush1.bf16.msra.mxu0 %v12359_v45  ;;  %v12372_v45 = vld [vmem:[#allocation25_spill] sm:$0xff]  ;;  %v12381_v39 = vand.u32 4294901760, %v12380_v6 }
 0x4bd   : > { %5050 = vmatprep.subr.mxu0 %v12360_v10  ;;  %v6973_v62 = vpack.c.bf16 %v12371_v19, %v12369_v42  ;;  %v12373_v29 = vand.u32 4294901760, %v12372_v45  ;;  %v12374_v10 = vld [vmem:[#allocation5_spill] sm:$0xff]  ;;  %v12385_v19 = vand.u32 4294901760, %v12384_v16  ;;  %v12396_v16 = vld [vmem:[#allocation24_spill] sm:$0xff] }
 0x4be   : > { %7306 = vmatpush1.bf16.msra.mxu1 %v12361_v47  ;;  %v12375_v0 = vand.u32 4294901760, %v12374_v10 }
 0x4bf   : > { %6256 = vmatprep.subr.mxu1 %v12362_v38  ;;  %v12377_v38 = vld [vmem:[#allocation167_spill] sm:$0xff]  ;;  %v6975_v42 = vpack.c.bf16 %v12385_v19, %v12383_v26  ;;  %v12397_v26 = vand.u32 4294901760, %v12396_v16 }
 0x4c0   : > { %5052 = vmatpush1.msra.mxu0 %v12367_v41  ;;  %v7307_v47 = vpack.c.bf16 %v12375_v0, %v12373_v29  ;;  %v7309_v41 = vpack.c.bf16 %v12381_v39, %v12379_v33  ;;  %v12388_v29 = vld [vmem:[#allocation14_spill] sm:$0xff]  ;;  %v12394_v39 = vld [vmem:[#allocation20_spill] sm:$0xff]  ;;  %v12398_v19 = vld [vmem:[#allocation23_spill] sm:$0xff] }
 0x4c1   : > { %6972 = vmatprep.subr.bf16.mxu0 %v6971_v56  ;;  %5066 = vmatmul.mubr.f32.vlgmr.msra.gmra.mrb[58].mxu0 %v12376_v32  ;;  %v12386_v56 = vld [vmem:[#allocation9_spill] sm:$0xff]  ;;  %v12389_v45 = vand.u32 4294901760, %v12388_v29  ;;  %v12395_v23 = vand.u32 4294901760, %v12394_v39  ;;  %v12401_v29 = vld [vmem:[#allocation18_spill] sm:$0xff]  ;;  %v12409_v39 = vld [vmem:[#allocation36_spill] sm:$0xff] }
 0x4c2   : > { %6258 = vmatpush1.msra.mxu1 %v12377_v38  ;;  %6974 = vmatpush1.bf16.msra.mxu0 %v6973_v62  ;;  %v12387_v0 = vand.u32 4294901760, %v12386_v56  ;;  %v12390_v62 = vld [vmem:[#allocation11_spill] sm:$0xff]  ;;  %v12392_v38 = vld [vmem:[#allocation12_spill] sm:$0xff] }
 0x4c3   : > { %7308 = vmatprep.subr.bf16.mxu1 %v7307_v47  ;;  %6272 = vmatmul.mubr.f32.vlgmr.msra.gmra.mrb[58].mxu1 %v12376_v32  ;;  %v12391_v44 = vand.u32 4294901760, %v12390_v62  ;;  %v12393_v6 = vand.u32 4294901760, %v12392_v38  ;;  %v6979_v47 = vpack.c.bf16 %v12397_v26, %v12395_v23  ;;  %v12399_v32 = vld [vmem:[#allocation15_spill] sm:$0xff]  ;;  %v12410_v23 = vand.u32 4294901760, %v12409_v39  ;;  %v12425_v39 = vld [vmem:[#allocation50_spill] sm:$0xff] }
 0x4c4   : > { %v7311_v10 = vpack.c.bf16 %v12389_v45, %v12387_v0  ;;  %7310 = vmatpush1.bf16.msra.mxu1 %v7309_v41  ;;  %6976 = vmatprep.subr.bf16.mxu0 %v6975_v42  ;;  %v12400_v56 = vand.u32 4294901760, %v12399_v32  ;;  %v12402_v0 = vand.u32 4294901760, %v12401_v29  ;;  %v12403_v42 = vld [vmem:[#allocation28_spill] sm:$0xff]  ;;  %v12405_v45 = vld [vmem:[#allocation30_spill] sm:$0xff] }
 0x4c5   : > { %v6977_v33 = vpack.c.bf16 %v12393_v6, %v12391_v44  ;;  %5311 = vmatprep.mubr.f32.mxu0 %v12398_v19  ;;  %6517 = vmatprep.mubr.f32.mxu1 %v12398_v19  ;;  %v12404_v38 = vand.u32 4294901760, %v12403_v42  ;;  %v12407_v44 = vld [vmem:[#allocation34_spill] sm:$0xff]  ;;  %v12413_v32 = vld [vmem:[#allocation44_spill] sm:$0xff]  ;;  %v12418_v42 = vand.u32 4294901760, %v12417_v63 }
 0x4c6   : > { %7312 = vmatprep.subr.bf16.mxu1 %v7311_v10  ;;  %v7313_v41 = vpack.c.bf16 %v12402_v0, %v12400_v56  ;;  %v12406_v10 = vand.u32 4294901760, %v12405_v45  ;;  %v12408_v6 = vand.u32 4294901760, %v12407_v44  ;;  %v12414_v29 = vand.u32 4294901760, %v12413_v32  ;;  %v12415_v0 = vld [vmem:[#allocation38_spill] sm:$0xff]  ;;  %v12421_v45 = vld [vmem:[#allocation47_spill] sm:$0xff]  ;;  %v12429_v32 = vld [vmem:[#allocation56_spill] sm:$0xff] }
 0x4c7   : > { %6978 = vmatpush1.bf16.msra.mxu0 %v6977_v33  ;;  %v12411_v33 = vld [vmem:[#allocation43_spill] sm:$0xff]  ;;  %v12431_v63 = vld [vmem:[#allocation52_spill] sm:$0xff] }
 0x4c8   : > { %6980 = vmatprep.subr.bf16.mxu0 %v6979_v47  ;;  %v7315_v62 = vpack.c.bf16 %v12406_v10, %v12404_v38  ;;  %7314 = vmatpush1.bf16.msra.mxu1 %v7313_v41  ;;  %v6981_v16 = vpack.c.bf16 %v12410_v23, %v12408_v6  ;;  %v12412_v26 = vand.u32 4294901760, %v12411_v33  ;;  %v12416_v47 = vand.u32 4294901760, %v12415_v0  ;;  %v12419_v38 = vld [vmem:[#allocation46_spill] sm:$0xff]  ;;  %v12423_v6 = vld [vmem:[#allocation49_spill] sm:$0xff] }
 0x4c9   : > { %v12420_v41 = vand.u32 4294901760, %v12419_v38  ;;  %v12422_v10 = vand.u32 4294901760, %v12421_v45  ;;  %v12426_v23 = vand.u32 4294901760, %v12425_v39  ;;  %v12437_v45 = vld [vmem:[#allocation59_spill] sm:$0xff]  ;;  %v12441_v39 = vld [vmem:[#allocation62_spill] sm:$0xff] }
 0x4ca   : > { %7316 = vmatprep.subr.bf16.mxu1 %v7315_v62  ;;  %v6983_v56 = vpack.c.bf16 %v12414_v29, %v12412_v26  ;;  %v7317_v8 = vpack.c.bf16 %v12418_v42, %v12416_v47  ;;  %v12424_v62 = vand.u32 4294901760, %v12423_v6  ;;  %v12427_v26 = vld [vmem:[#allocation55_spill] sm:$0xff]  ;;  %v12430_v29 = vand.u32 4294901760, %v12429_v32  ;;  %v12433_v47 = vld [vmem:[#allocation53_spill] sm:$0xff]  ;;  %v12445_v32 = vld [vmem:[#allocation68_spill] sm:$0xff] }
 0x4cb   : > { %6982 = vmatpush1.bf16.msra.mxu0 %v6981_v16  ;;  %v7319_v44 = vpack.c.bf16 %v12422_v10, %v12420_v41  ;;  %v12428_v16 = vand.u32 4294901760, %v12427_v26  ;;  %v12434_v42 = vand.u32 4294901760, %v12433_v47  ;;  %v12435_v41 = vld [vmem:[#allocation58_spill] sm:$0xff]  ;;  %v12438_v10 = vand.u32 4294901760, %v12437_v45  ;;  %v12449_v47 = vld [vmem:[#allocation65_spill] sm:$0xff] }
 0x4cc   : > { %6984 = vmatprep.subr.bf16.mxu0 %v6983_v56  ;;  %7318 = vmatpush1.bf16.msra.mxu1 %v7317_v8  ;;  %v6985_v33 = vpack.c.bf16 %v12426_v23, %v12424_v62  ;;  %v12432_v56 = vand.u32 4294901760, %v12431_v63  ;;  %v12436_v8 = vand.u32 4294901760, %v12435_v41  ;;  %v12439_v62 = vld [vmem:[#allocation61_spill] sm:$0xff]  ;;  %v12442_v23 = vand.u32 4294901760, %v12441_v39 }
 0x4cd   : > { %7320 = vmatprep.subr.bf16.mxu1 %v7319_v44  ;;  %v6987_v0 = vpack.c.bf16 %v12430_v29, %v12428_v16  ;;  %v12440_v44 = vand.u32 4294901760, %v12439_v62  ;;  %v12443_v16 = vld [vmem:[#allocation67_spill] sm:$0xff]  ;;  %v12446_v29 = vand.u32 4294901760, %v12445_v32  ;;  %v12455_v62 = vld [vmem:[#allocation74_spill] sm:$0xff]  ;;  %v12460_v32 = vld [vmem:[#allocation76_spill] sm:$0xff] }
 0x4ce   : > { %v7321_v38 = vpack.c.bf16 %v12434_v42, %v12432_v56  ;;  %v7323_v6 = vpack.c.bf16 %v12438_v10, %v12436_v8  ;;  %v12447_v56 = vld [vmem:[#allocation64_spill] sm:$0xff]  ;;  %v12450_v42 = vand.u32 4294901760, %v12449_v47  ;;  %v12452_v8 = vld [vmem:[#allocation71_spill] sm:$0xff] }
 0x4cf   : > { %6986 = vmatpush1.bf16.msra.mxu0 %v6985_v33  ;;  %v6989_v26 = vpack.c.bf16 %v12442_v23, %v12440_v44  ;;  %v12444_v33 = vand.u32 4294901760, %v12443_v16  ;;  %v12453_v45 = vand.u32 4294901760, %v12452_v8  ;;  %v12456_v44 = vand.u32 4294901760, %v12455_v62 }
 0x4d0   : > { %6988 = vmatprep.subr.bf16.mxu0 %v6987_v0  ;;  %7322 = vmatpush1.bf16.msra.mxu1 %v7321_v38  ;;  %v12448_v0 = vand.u32 4294901760, %v12447_v56  ;;  %v12451_v38 = vand.u32 4294901760, %v12185_v58  ;;  %v12457_v23 = vand.u32 4294901760, %v12191_v46  ;;  %v12473_v62 = vand.u32 4294901760, %v12140_v30 }
 0x4d1   : > { %7324 = vmatprep.subr.bf16.mxu1 %v7323_v6  ;;  %v6991_v63 = vpack.c.bf16 %v12446_v29, %v12444_v33  ;;  %v12454_v6 = vand.u32 4294901760, %v12187_v13  ;;  %v12461_v29 = vand.u32 4294901760, %v12460_v32  ;;  %v12482_v30 = vand.u32 4294901760, %v12265_v52 }
 0x4d2   : > { %v7325_v41 = vpack.c.bf16 %v12450_v42, %v12448_v0  ;;  %v7327_v10 = vpack.c.bf16 %v12453_v45, %v12451_v38  ;;  %v12464_v0 = vld [vmem:[#allocation82_spill] sm:$0xff]  ;;  %v12466_v42 = vld [vmem:[#allocation83_spill] sm:$0xff]  ;;  %v12468_v38 = vld [vmem:[#allocation85_spill] sm:$0xff]  ;;  %v12490_v52 = vand.u32 4294901760, %v12273_v15 }
 0x4d3   : > { %6990 = vmatpush1.bf16.msra.mxu0 %v6989_v26  ;;  %v6993_v39 = vpack.c.bf16 %v12456_v44, %v12454_v6  ;;  %v12458_v26 = vld [vmem:[#allocation80_spill] sm:$0xff]  ;;  %v12465_v47 = vand.u32 4294901760, %v12464_v0  ;;  %v12467_v13 = vand.u32 4294901760, %v12466_v42  ;;  %v12469_v8 = vand.u32 4294901760, %v12468_v38  ;;  %v12470_v45 = vld [vmem:[#allocation86_spill] sm:$0xff]  ;;  %v12498_v15 = vld [vmem:[#allocation155_spill] sm:$0xff] }
 0x4d4   : > { %6992 = vmatprep.subr.bf16.mxu0 %v6991_v63  ;;  %7326 = vmatpush1.bf16.msra.mxu1 %v7325_v41  ;;  %v12459_v16 = vand.u32 4294901760, %v12458_v26  ;;  %v12462_v63 = vld [vmem:[#allocation77_spill] sm:$0xff]  ;;  %v12471_v46 = vand.u32 4294901760, %v12470_v45  ;;  %v12472_v6 = vand.u32 4294901760, %v12139_v27  ;;  %v12483_v0 = vld [vmem:[#allocation104_spill] sm:$0xff]  ;;  %v12489_v38 = vand.u32 4294901760, %v12274_v53 }
 0x4d5   : > { %7328 = vmatprep.subr.bf16.mxu1 %v7327_v10  ;;  %v12463_v58 = vand.u32 4294901760, %v12462_v63  ;;  %v7331_v41 = vpack.c.bf16 %v12467_v13, %v12465_v47  ;;  %v12479_v63 = vand.u32 4294901760, %v12262_v18  ;;  %v12487_v13 = vand.u32 4294901760, %v12271_v9  ;;  %v12494_v9 = vld [vmem:[#allocation142_spill] sm:$0xff]  ;;  %v12497_v53 = vld [vmem:[#allocation145_spill] sm:$0xff] }
 0x4d6   : > { %v6995_v33 = vpack.c.bf16 %v12459_v16, %v12457_v23  ;;  %v6997_v10 = vpack.c.bf16 %v12471_v46, %v12469_v8  ;;  %v6999_v44 = vpack.c.bf16 %v12473_v62, %v12472_v6  ;;  %v12475_v23 = vand.u32 4294901760, %v12252_v5  ;;  %v12493_v46 = vld [vmem:[#allocation133_spill] sm:$0xff]  ;;  %v12500_v62 = vld [vmem:[#allocation159_spill] sm:$0xff] }
 0x4d7   : > { %6994 = vmatpush1.bf16.msra.mxu0 %v6993_v39  ;;  %v7329_v56 = vpack.c.bf16 %v12463_v58, %v12461_v29  ;;  %v12474_v39 = vand.u32 4294901760, %v12251_v25  ;;  %v12476_v16 = vand.u32 4294901760, %v12141_v12  ;;  %v12480_v58 = vld [vmem:[#allocation98_spill] sm:$0xff]  ;;  %v12484_v25 = vand.u32 4294901760, %v12483_v0  ;;  %v12499_v6 = vld [vmem:[#allocation157_spill] sm:$0xff] }
 0x4d8   : > { %6996 = vmatprep.subr.bf16.mxu0 %v6995_v33  ;;  %v12477_v33 = vld [vmem:[#allocation95_spill] sm:$0xff]  ;;  %v12481_v27 = vand.u32 4294901760, %v12480_v58  ;;  %v12485_v5 = vand.u32 4294901760, %v12268_v54  ;;  %v12486_v12 = vand.u32 4294901760, %v12267_v61  ;;  %v12488_v18 = vand.u32 4294901760, %v12270_v50  ;;  %v12495_v50 = vld [vmem:[#allocation144_spill] sm:$0xff] }
 0x4d9   : > { %7330 = vmatpush1.bf16.msra.mxu1 %v7329_v56  ;;  %v7333_v26 = vpack.c.bf16 %v12475_v23, %v12474_v39  ;;  %v12478_v32 = vand.u32 4294901760, %v12477_v33  ;;  %v7003_v47 = vpack.c.bf16 %v12484_v25, %v12482_v30  ;;  %v7005_v8 = vpack.c.bf16 %v12490_v52, %v12489_v38  ;;  %v12504_v39 = vld [vmem:[#allocation94_spill] sm:$0xff]  ;;  %v12505_v23 = vld [vmem:[#allocation92_spill] sm:$0xff]  ;;  %v12508_v33 = vld [vmem:[#allocation119_spill] sm:$0xff] }
 0x4da   : > { %7332 = vmatprep.subr.bf16.mxu1 %v7331_v41  ;;  %v7001_v56 = vpack.c.bf16 %v12481_v27, %v12479_v63  ;;  %v7337_v42 = vpack.c.bf16 %v12486_v12, %v12485_v5  ;;  %v7339_v41 = vpack.c.bf16 %v12488_v18, %v12487_v13  ;;  %v12491_v45 = vand.u32 4294901760, %v12278_v40  ;;  %v12501_v40 = vld [vmem:[#allocation158_spill] sm:$0xff]  ;;  %v12511_v63 = vld [vmem:[#allocation127_spill] sm:$0xff]  ;;  %v12513_v27 = vld [vmem:[#allocation129_spill] sm:$0xff] }
 0x4db   : > { %6998 = vmatpush1.bf16.msra.mxu0 %v6997_v10  ;;  %v7335_v29 = vpack.c.bf16 %v12478_v32, %v12476_v16  ;;  %v12492_v54 = vand.u32 4294901760, %v12277_v51  ;;  %v12496_v10 = vld [vmem:[#allocation154_spill] sm:$0xff]  ;;  %v12502_v51 = vld [vmem:[#allocation161_spill] sm:$0xff]  ;;  %v12507_v16 = vld [vmem:[#allocation116_spill] sm:$0xff]  ;;  %v12512_v58 = vand.u32 4294901760, %v12298_v28  ;;  %v12515_v30 = vand.u32 4294901760, %v12301_v37 }
 0x4dc   : > { %7000 = vmatprep.subr.bf16.mxu0 %v6999_v44  ;;  %v12503_v44 = vld [vmem:[#allocation91_spill] sm:$0xff]  ;;  %v12509_v32 = vld [vmem:[#allocation118_spill] sm:$0xff]  ;;  %v12517_v25 = vand.u32 4294901760, %v12304_v24  ;;  %v12518_v28 = vld [vmem:[#allocation69_spill] sm:$0xff] }
 0x4dd   : > { %7334 = vmatpush1.bf16.msra.mxu1 %v7333_v26  ;;  %v7341_v61 = vpack.c.bf16 %v12492_v54, %v12491_v45  ;;  %v12506_v26 = vld [vmem:[#allocation115_spill] sm:$0xff]  ;;  %v12516_v0 = vld [vmem:[#allocation170_spill] sm:$0xff]  ;;  %v12522_v24 = vld [vmem:[#allocation81_spill] sm:$0xff] }
 0x4de   : > { %7336 = vmatprep.subr.bf16.mxu1 %v7335_v29  ;;  %v12510_v29 = vld [vmem:[#allocation121_spill] sm:$0xff]  ;;  %v12520_v37 = vld [vmem:[#allocation78_spill] sm:$0xff]  ;;  %v12545_v5 = vld [vmem:[#allocation143_spill] sm:$0xff] }
 0x4df   : > { %7002 = vmatpush1.bf16.msra.mxu0 %v7001_v56  ;;  %v12514_v56 = vand.u32 4294901760, %v12300_v31  ;;  %v12519_v31 = vld [vmem:[#allocation73_spill] sm:$0xff]  ;;  %v12546_v12 = vld [vmem:[#allocation150_spill] sm:$0xff]  ;;  %v12549_v18 = vld [vmem:[#allocation156_spill] sm:$0xff] }
 0x4e0   : > { %7004 = vmatprep.subr.bf16.mxu0 %v7003_v47  ;;  %v12544_v47 = vld [vmem:[#allocation146_spill] sm:$0xff]  ;;  %v12551_v38 = vld [vmem:[#allocation160_spill] sm:$0xff] }
 0x4e1   : > { %7338 = vmatpush1.bf16.msra.mxu1 %v7337_v42  ;;  %v12547_v42 = vld [vmem:[#allocation152_spill] sm:$0xff]  ;;  %v12548_v13 = vld [vmem:[#allocation162_spill] sm:$0xff] }
 0x4e2   : > { %7340 = vmatprep.subr.bf16.mxu1 %v7339_v41  ;;  %v12550_v41 = vld [vmem:[#allocation163_spill] sm:$0xff]  ;;  %v12552_v52 = vld [vmem:[#allocation166_spill] sm:$0xff]  ;;  %v12554_v45 = vld [vmem:[#allocation168_spill] sm:$0xff] }
 0x4e3   : > { %7006 = vmatpush1.bf16.msra.mxu0 %v7005_v8  ;;  %v12553_v8 = vld [vmem:[#allocation165_spill] sm:$0xff]  ;;  %v12555_v54 = vld [vmem:[#allocation164_spill] sm:$0xff] }
 0x4e4   : > { %7008 = vmatprep.subr.bf16.mxu0 %v12493_v46  ;;  %v8272_v46 = vmov 1966171168  }
 0x4e5   : > { %7342 = vmatpush1.bf16.msra.mxu1 %v7341_v61  ;;  %v12556_v61 = vld [vmem:[#allocation167_spill] sm:$0xff] }
 0x4e6   : > { %7344 = vmatprep.subr.bf16.mxu1 %v12494_v9  ;;  %v6663_v9 = vunpack.c.l.s4 %v8272_v46 }
 0x4e7   : > { %7010 = vmatpush1.bf16.msra.mxu0 %v12495_v50 }
 0x4e8   : > { %7012 = vmatprep.subr.bf16.mxu0 %v12496_v10  ;;  %v6664_v50 = vunpack.c.0.s8 %v6663_v9  ;;  %v12557_v10 = vlaneseq }
 0x4e9   : > { %7346 = vmatpush1.bf16.msra.mxu1 %v12497_v53 }
 0x4ea   : > { %7348 = vmatprep.subr.bf16.mxu1 %v12498_v15  ;;  %v6666_v53 = vshrl.u32 %v12557_v10, 7 }
 0x4eb   : > { %7014 = vmatpush1.bf16.msra.mxu0 %v12499_v6 }
 0x4ec   : > { %7016 = vmatprep.subr.bf16.mxu0 %v12500_v62  ;;  %v6667_v6 = vsub.s32 %v6664_v50, %v6666_v53 }
 0x4ed   : > { %7350 = vmatpush1.bf16.msra.mxu1 %v12501_v40 }
 0x4ee   : > { %7352 = vmatprep.subr.bf16.mxu1 %v12502_v51 }
 0x4ef   : > { %7018 = vmatpush1.bf16.msra.mxu0 %v12503_v44 }
 0x4f0   : > { %7020 = vmatprep.subr.bf16.mxu0 %v12504_v39 }
 0x4f1   : > { %7354 = vmatpush1.bf16.msra.mxu1 %v12505_v23 }
 0x4f2   : > { %7356 = vmatprep.subr.bf16.mxu1 %v12506_v26 }
 0x4f3   : > { %7022 = vmatpush1.bf16.msra.mxu0 %v12507_v16 }
 0x4f4   : > { %7024 = vmatprep.subr.bf16.mxu0 %v12508_v33 }
 0x4f5   : > { %7358 = vmatpush1.bf16.msra.mxu1 %v12509_v32 }
 0x4f6   : > { %7360 = vmatprep.subr.bf16.mxu1 %v12510_v29 }
 0x4f7   : > { %7026 = vmatpush1.bf16.msra.mxu0 %v12511_v63 }
 0x4f8   : > { %5299 = vmatprep.subr.mxu0 %v12512_v58 }
 0x4f9   : > { %7362 = vmatpush1.bf16.msra.mxu1 %v12513_v27 }
 0x4fa   : > { %6505 = vmatprep.subr.mxu1 %v12514_v56 }
 0x4fb   : > { %5303 = vmatpush1.msra.mxu0 %v12515_v30 }
 0x4fc   : > { %7028 = vmatprep.subr.bf16.mxu0 %v12302_v21  ;;  %5313 = vmatmul.mubr.f32.vlgmr.msra.gmra.mrb[58].mxu0 %v12516_v0  ;;  %v12521_v21 = vld [vmem:[#allocation75_spill] sm:$0xff] }
 0x4fd   : > { %6509 = vmatpush1.msra.mxu1 %v12517_v25  ;;  %7030 = vmatpush1.bf16.msra.mxu0 %v12305_v3  ;;  %v12523_v3 = vld [vmem:[#allocation84_spill] sm:$0xff] }
 0x4fe   : > { %7364 = vmatprep.subr.bf16.mxu1 %v12306_v49  ;;  %6519 = vmatmul.mubr.f32.vlgmr.msra.gmra.mrb[58].mxu1 %v12516_v0  ;;  %v12524_v49 = vld [vmem:[#allocation90_spill] sm:$0xff] }
 0x4ff   : > { %7366 = vmatpush1.bf16.msra.mxu1 %v12307_v17  ;;  %7032 = vmatprep.subr.bf16.mxu0 %v12308_v2  ;;  %v12525_v17 = vld [vmem:[#allocation87_spill] sm:$0xff]  ;;  %v12526_v2 = vld [vmem:[#allocation93_spill] sm:$0xff] }
 0x500   : > { %7368 = vmatprep.subr.bf16.mxu1 %v12309_v4  ;;  %5442 = vmatprep.mubr.f32.mxu0 %v12398_v19  ;;  %v12527_v4 = vld [vmem:[#allocation96_spill] sm:$0xff] }
 0x501   : > { %7034 = vmatpush1.bf16.msra.mxu0 %v12311_v1  ;;  %6648 = vmatprep.mubr.f32.mxu1 %v12398_v19  ;;  %v12528_v1 = vld [vmem:[#allocation102_spill] sm:$0xff]  ;;  %v12543_v19 = vld [vmem:[#allocation140_spill] sm:$0xff] }
 0x502   : > { %7036 = vmatprep.subr.bf16.mxu0 %v12312_v48  ;;  %v12529_v48 = vld [vmem:[#allocation99_spill] sm:$0xff] }
 0x503   : > { %7370 = vmatpush1.bf16.msra.mxu1 %v12313_v34  ;;  %v12530_v34 = vld [vmem:[#allocation105_spill] sm:$0xff] }
 0x504   : > { %7372 = vmatprep.subr.bf16.mxu1 %v12314_v59  ;;  %v12531_v59 = vld [vmem:[#allocation108_spill] sm:$0xff] }
 0x505   : > { %7038 = vmatpush1.bf16.msra.mxu0 %v12315_v11  ;;  %v12532_v11 = vld [vmem:[#allocation114_spill] sm:$0xff] }
 0x506   : > { %7040 = vmatprep.subr.bf16.mxu0 %v12316_v57  ;;  %v12533_v57 = vld [vmem:[#allocation111_spill] sm:$0xff] }
 0x507   : > { %7374 = vmatpush1.bf16.msra.mxu1 %v12317_v20  ;;  %v12534_v20 = vld [vmem:[#allocation117_spill] sm:$0xff] }
 0x508   : > { %7376 = vmatprep.subr.bf16.mxu1 %v12318_v60  ;;  %v12535_v60 = vld [vmem:[#allocation120_spill] sm:$0xff] }
 0x509   : > { %7042 = vmatpush1.bf16.msra.mxu0 %v12319_v22  ;;  %v12536_v22 = vld [vmem:[#allocation126_spill] sm:$0xff] }
 0x50a   : > { %7044 = vmatprep.subr.bf16.mxu0 %v12320_v35  ;;  %v12537_v35 = vld [vmem:[#allocation123_spill] sm:$0xff] }
 0x50b   : > { %7378 = vmatpush1.bf16.msra.mxu1 %v12321_v55  ;;  %v12538_v55 = vld [vmem:[#allocation128_spill] sm:$0xff] }
 0x50c   : > { %7380 = vmatprep.subr.bf16.mxu1 %v12322_v7  ;;  %v12539_v7 = vld [vmem:[#allocation131_spill] sm:$0xff] }
 0x50d   : > { %7046 = vmatpush1.bf16.msra.mxu0 %v12323_v36  ;;  %v12540_v36 = vld [vmem:[#allocation135_spill] sm:$0xff] }
 0x50e   : > { %7048 = vmatprep.subr.bf16.mxu0 %v12324_v14  ;;  %v12541_v14 = vld [vmem:[#allocation134_spill] sm:$0xff] }
 0x50f   : > { %7382 = vmatpush1.bf16.msra.mxu1 %v12325_v43  ;;  %v12542_v43 = vld [vmem:[#allocation137_spill] sm:$0xff] }
 0x510   : > { %7384 = vmatprep.subr.bf16.mxu1 %v12518_v28 }
 0x511   : > { %7050 = vmatpush1.bf16.msra.mxu0 %v12519_v31 }
 0x512   : > { %7052 = vmatprep.subr.bf16.mxu0 %v12520_v37 }
 0x513   : > { %7386 = vmatpush1.bf16.msra.mxu1 %v12521_v21 }
 0x514   : > { %7388 = vmatprep.subr.bf16.mxu1 %v12522_v24 }
 0x515   : > { %7054 = vmatpush1.bf16.msra.mxu0 %v12523_v3 }
 0x516   : > { %7056 = vmatprep.subr.bf16.mxu0 %v12524_v49 }
 0x517   : > { %7390 = vmatpush1.bf16.msra.mxu1 %v12525_v17 }
 0x518   : > { %7392 = vmatprep.subr.bf16.mxu1 %v12526_v2 }
 0x519   : > { %7058 = vmatpush1.bf16.msra.mxu0 %v12527_v4 }
 0x51a   : > { %7060 = vmatprep.subr.bf16.mxu0 %v12528_v1 }
 0x51b   : > { %7394 = vmatpush1.bf16.msra.mxu1 %v12529_v48 }
 0x51c   : > { %7396 = vmatprep.subr.bf16.mxu1 %v12530_v34 }
 0x51d   : > { %7062 = vmatpush1.bf16.msra.mxu0 %v12531_v59 }
 0x51e   : > { %7064 = vmatprep.subr.bf16.mxu0 %v12532_v11 }
 0x51f   : > { %7398 = vmatpush1.bf16.msra.mxu1 %v12533_v57 }
 0x520   : > { %7400 = vmatprep.subr.bf16.mxu1 %v12534_v20 }
 0x521   : > { %7066 = vmatpush1.bf16.msra.mxu0 %v12535_v60 }
 0x522   : > { %7068 = vmatprep.subr.bf16.mxu0 %v12536_v22 }
 0x523   : > { %7402 = vmatpush1.bf16.msra.mxu1 %v12537_v35 }
 0x524   : > { %7404 = vmatprep.subr.bf16.mxu1 %v12538_v55 }
 0x525   : > { %7070 = vmatpush1.bf16.msra.mxu0 %v12539_v7 }
 0x526   : > { %7072 = vmatprep.subr.bf16.mxu0 %v12540_v36 }
 0x527   : > { %7406 = vmatpush1.bf16.msra.mxu1 %v12541_v14 }
 0x528   : > { %7408 = vmatprep.subr.bf16.mxu1 %v12542_v43 }
 0x529   : > { %7074 = vmatpush1.bf16.msra.mxu0 %v12543_v19 }
 0x52a   : > { %7076 = vmatprep.subr.bf16.mxu0 %v12544_v47 }
 0x52b   : > { %7410 = vmatpush1.bf16.msra.mxu1 %v12545_v5 }
 0x52c   : > { %7412 = vmatprep.subr.bf16.mxu1 %v12546_v12 }
 0x52d   : > { %7078 = vmatpush1.bf16.msra.mxu0 %v12547_v42 }
 0x52e   : > { %7080 = vmatprep.subr.bf16.mxu0 %v12548_v13 }
 0x52f   : > { %7414 = vmatpush1.bf16.msra.mxu1 %v12549_v18 }
 0x530   : > { %7416 = vmatprep.subr.bf16.mxu1 %v12550_v41 }
 0x531   : > { %7082 = vmatpush1.bf16.msra.mxu0 %v12551_v38 }
 0x532   : > { %5432 = vmatprep.subr.mxu0 %v12552_v52 }
 0x533   : > { %7418 = vmatpush1.bf16.msra.mxu1 %v12553_v8 }
 0x534   : > { %6638 = vmatprep.subr.mxu1 %v12554_v45 }
 0x535   : > { %5434 = vmatpush1.msra.mxu0 %v12555_v54 }
 0x536   : > { %5444 = vmatmul.mubr.f32.vlgmr.msra.gmra.mrb[58].mxu0 %v12516_v0 }
 0x537   : > { %6640 = vmatpush1.msra.mxu1 %v12556_v61 }
 0x538   : > { %6650 = vmatmul.mubr.f32.vlgmr.msra.gmra.mrb[58].mxu1 %v12516_v0 }
 0x609   : > { %v5445_v15 = vpop.f32.mrb[58].mxu0 }
 0x60a   : > { %v5447_v62 = vpop.f32.mrb[59].mxu0 }
 0x60b   : > { %v6651_v40 = vpop.f32.mrb[58].mxu1  ;;  %v6660_v51 = vcombine.low %v5445_v15, %v5447_v62 }
 0x60c   : > { %v6653_v44 = vpop.f32.mrb[59].mxu1 }
 0x60d   : > { %v6668_v39 = vrot.slane %v6660_v51, %v6667_v6  ;;  %v6661_v23 = vcombine.low %v6651_v40, %v6653_v44 }
 0x60f   : > { %v6675_v26 = vrot.slane %v6661_v23, %v6667_v6 }
 0x611   : > { %v6676_v16 = vcombine.low %v6668_v39, %v6675_v26 }
 0x613   : > { %v6683_v33 = vrot.slane %v6676_v16, %v6667_v6 }
 0x615   : > { %6685 = vst.msk [vmem:[%s170_s6] sm:$0xf] %vm8304_vm0, %v6683_v33 }
 0x616 PF: > { %s13_s12 = sadd.s32 1, %s8268_s12  }
 0x617   : > { %p10_p4 = scmp.ge.s32.totalorder %s13_s12, 4  }
 0x619   :  { %12 = sbr.rel (!%p10_p4) target bundleno = 1 (0x1), region = 66 }

</bundles_post_ra>
